<compile_context>
chip_gen: v7x
topology: tpu7x:2x2x1
jax: 0.10.0
libtpu: 0.0.40
codegen_flags: <defaults>
</compile_context>

<pallas_src>
import jax
import jax.numpy as jnp
from jax import lax
from jax.experimental import pallas as pl
from jax.experimental.pallas import tpu as pltpu

STATE_DIM = 32      # state_dim (Linear(state_dim, 128))
HID = 128           # input_layer / hidden_1 width
GRU_H = 32          # GRU hidden size (2 layers)
H2_OUT = 31         # hidden_2 output width
N_ACT = 5           # action_head output width
LANE = 128          # TPU lane width; everything padded to 128 lanes
TB = 128            # batch rows per grid tile
BATCH = 256         # states per call (>=128 per perf review)
N_BLK = 10          # number of 128-wide column blocks in the weight slab

# Column-block indices into the lane-major slabs (each block is 128 lanes wide):
#   0 W_in | 1 W_h1 | 2..4 GRU0 r,z,n | 5..7 GRU1 r,z,n | 8 W_h2 | 9 W_act
_K_IN, _K_H1, _K_G0, _K_G1, _K_H2, _K_ACT = 0, 1, 2, 5, 8, 9


def _actor_kernel(s_ref, w_ref, b_ref, act_ref, logp_ref):
    f32 = jnp.float32

    def W(k, n=1):                          # (128, n*128) weight column block(s)
        return w_ref[:, k * LANE:(k + n) * LANE]

    def bias(k, n=1):                       # (1, n*128) bias row aligned with W(k, n)
        return b_ref[0:1, k * LANE:(k + n) * LANE]

    x_in = s_ref[...]                       # (TB,128): lanes 0:32 = state, lane 127 = u
    u = s_ref[:, LANE - 1:LANE]             # (TB,1) uniform for Categorical.sample()

    # x = sigmoid(input_layer(state)); x = tanh(hidden_1(x))
    # (u rides in lane 127; W_in slab rows >= 32 are exactly 0, so it adds 0.)
    x = jax.nn.sigmoid(
        jnp.dot(x_in, W(_K_IN), preferred_element_type=f32) + bias(_K_IN))
    x = jnp.tanh(
        jnp.dot(x, W(_K_H1), preferred_element_type=f32) + bias(_K_H1))

    # One GRU step with zero incoming hidden state (PyTorch gate order r,z,n).
    # h == 0 makes the W_hh matmuls dead; b_hh is folded into r/z biases and the
    # n-gate hh bias (row 1 of the bias slab) is scaled by r.
    # Padding-lane invariant: every padded weight column / bias lane is exactly
    # 0, so lanes >= 32 of h stay exactly 0  ->  (1 - 0.5) * tanh(0) = 0.
    def gru_zero_h(inp, k):
        g = jnp.dot(inp, W(k, 3), preferred_element_type=f32) + bias(k, 3)   # (TB,384)
        r = jax.nn.sigmoid(g[:, :LANE])
        z = jax.nn.sigmoid(g[:, LANE:2 * LANE])
        n = jnp.tanh(g[:, 2 * LANE:] + r * b_ref[1:2, (k + 2) * LANE:(k + 3) * LANE])
        return (1.0 - z) * n

    h = gru_zero_h(x, _K_G0)                # GRU layer 0
    h = gru_zero_h(h, _K_G1)                # GRU layer 1

    # x = relu(hidden_2(h)); scores = action_head(x)
    y = jnp.maximum(
        jnp.dot(h, W(_K_H2), preferred_element_type=f32) + bias(_K_H2), 0.0)
    scores = jnp.dot(y, W(_K_ACT), preferred_element_type=f32) + bias(_K_ACT)

    # Softmax-free sampling tail (only the N_ACT valid lanes participate).
    lane = lax.broadcasted_iota(jnp.int32, scores.shape, 1)        # (TB,128)
    valid = lane < N_ACT
    scores = jnp.where(valid, scores, -1e30)
    m = jnp.max(scores, axis=-1, keepdims=True)
    sh = scores - m
    e = jnp.where(valid, jnp.exp(sh), 0.0)
    sum_e = jnp.sum(e, axis=-1, keepdims=True)

    # Inclusive prefix sum over lanes via 3 XLU roll+add steps (lanes >= N_ACT
    # are exactly 0, so the circular wrap contributes nothing for lanes < 12).
    cdf = e
    cdf = cdf + pltpu.roll(cdf, 1, axis=1)
    cdf = cdf + pltpu.roll(cdf, 2, axis=1)
    cdf = cdf + pltpu.roll(cdf, 4, axis=1)

    # Inverse-CDF sample without division:  count lanes with cdf < u * sum(e).
    below = jnp.logical_and(cdf < u * sum_e, valid)
    action = jnp.minimum(
        jnp.sum(below.astype(jnp.int32), axis=-1, keepdims=True), N_ACT - 1)

    # log_prob(action) = shifted_score[action] - log(sum(e)).
    logp = (jnp.sum(jnp.where(lane == action, sh, 0.0), axis=-1, keepdims=True)
            - jnp.log(sum_e))

    act_ref[...] = action
    logp_ref[...] = logp


# ----------------------------------------------------------------------------
# Parameter construction / packing
# ----------------------------------------------------------------------------

def _uniform(key, shape, bound):
    return jax.random.uniform(key, shape, jnp.float32, minval=-bound, maxval=bound)


def make_params(key):
    """Deterministic params mimicking PyTorch default init (uniform +/-1/sqrt(fan_in)).
    Linear weights stored transposed as (in, out); GRU weights as (in, 3H), gate
    order r,z,n."""
    ks = jax.random.split(key, 16)
    inv = lambda n: 1.0 / jnp.sqrt(float(n))
    return (
        _uniform(ks[0], (STATE_DIM, HID), inv(STATE_DIM)),      # W_in
        _uniform(ks[1], (1, HID), inv(STATE_DIM)),              # b_in
        _uniform(ks[2], (HID, HID), inv(HID)),                  # W_h1
        _uniform(ks[3], (1, HID), inv(HID)),                    # b_h1
        _uniform(ks[4], (HID, 3 * GRU_H), inv(GRU_H)),          # W_ih_l0^T
        _uniform(ks[5], (GRU_H, 3 * GRU_H), inv(GRU_H)),        # W_hh_l0^T (dead, h0=0)
        _uniform(ks[6], (1, 3 * GRU_H), inv(GRU_H)),            # b_ih_l0
        _uniform(ks[7], (1, 3 * GRU_H), inv(GRU_H)),            # b_hh_l0
        _uniform(ks[8], (GRU_H, 3 * GRU_H), inv(GRU_H)),        # W_ih_l1^T
        _uniform(ks[9], (GRU_H, 3 * GRU_H), inv(GRU_H)),        # W_hh_l1^T (dead, h0=0)
        _uniform(ks[10], (1, 3 * GRU_H), inv(GRU_H)),           # b_ih_l1
        _uniform(ks[11], (1, 3 * GRU_H), inv(GRU_H)),           # b_hh_l1
        _uniform(ks[12], (GRU_H, H2_OUT), inv(GRU_H)),          # W_h2
        _uniform(ks[13], (1, H2_OUT), inv(GRU_H)),              # b_h2
        _uniform(ks[14], (H2_OUT, N_ACT), inv(H2_OUT)),         # W_act
        _uniform(ks[15], (1, N_ACT), inv(H2_OUT)),              # b_act
    )


def _pad_block(x):
    r, c = x.shape
    return jnp.pad(x, ((0, LANE - r), (0, LANE - c)))


def _pad_row(x):
    return jnp.pad(x, ((0, 0), (0, LANE - x.shape[1])))


def pack_params(params):
    """Pack all live parameters lane-major:
       weight slab (128, 1280): [W_in|W_h1|W0r|W0z|W0n|W1r|W1z|W1n|W_h2|W_act]
       bias   slab (8, 1280):   row 0 = bias aligned with each column block
                                (b_hh folded into r/z), row 1 = n-gate b_hh.
    W_hh matrices are dropped (dead with zero initial hidden state).  Every
    padded entry is exactly zero (required by the kernel's lane invariants)."""
    (w_in, b_in, w_h1, b_h1, wih0, _whh0, bih0, bhh0,
     wih1, _whh1, bih1, bhh1, w_h2, b_h2, w_act, b_act) = params
    H = GRU_H
    w_blocks = [w_in, w_h1,
                wih0[:, 0:H], wih0[:, H:2 * H], wih0[:, 2 * H:3 * H],
                wih1[:, 0:H], wih1[:, H:2 * H], wih1[:, 2 * H:3 * H],
                w_h2, w_act]
    w_slab = jnp.concatenate([_pad_block(b) for b in w_blocks], axis=1)  # (128,1280)

    row0 = [b_in, b_h1,
            bih0[:, 0:H] + bhh0[:, 0:H], bih0[:, H:2 * H] + bhh0[:, H:2 * H],
            bih0[:, 2 * H:3 * H],
            bih1[:, 0:H] + bhh1[:, 0:H], bih1[:, H:2 * H] + bhh1[:, H:2 * H],
            bih1[:, 2 * H:3 * H],
            b_h2, b_act]
    row0 = jnp.concatenate([_pad_row(r) for r in row0], axis=1)          # (1,1280)
    row1 = jnp.zeros((1, N_BLK * LANE), jnp.float32)
    row1 = row1.at[:, (_K_G0 + 2) * LANE:(_K_G0 + 2) * LANE + H].set(bhh0[:, 2 * H:])
    row1 = row1.at[:, (_K_G1 + 2) * LANE:(_K_G1 + 2) * LANE + H].set(bhh1[:, 2 * H:])
    b_slab = jnp.concatenate(
        [row0, row1, jnp.zeros((6, N_BLK * LANE), jnp.float32)], axis=0)  # (8,1280)
    return w_slab, b_slab


# ----------------------------------------------------------------------------
# Wrapper
# ----------------------------------------------------------------------------

@jax.jit
def actor_forward(states, u, w_slab, b_slab):
    """states: (B, STATE_DIM) f32; u: (B,) uniform[0,1) f32; packed slabs.
    Returns (actions (B,) int32, log_probs (B,) f32)."""
    B = states.shape[0]
    n_tiles = pl.cdiv(B, TB)
    Bp = n_tiles * TB
    s_pad = jnp.zeros((Bp, LANE), jnp.float32)
    s_pad = s_pad.at[:B, :STATE_DIM].set(states.astype(jnp.float32))
    s_pad = s_pad.at[:B, LANE - 1].set(u.astype(jnp.float32))   # u rides in lane 127
    act, logp = pl.pallas_call(
        _actor_kernel,
        out_shape=(jax.ShapeDtypeStruct((Bp, 1), jnp.int32),
                   jax.ShapeDtypeStruct((Bp, 1), jnp.float32)),
        grid=(n_tiles,),
        in_specs=[
            pl.BlockSpec((TB, LANE), lambda i: (i, 0)),              # state (+u)
            pl.BlockSpec((LANE, N_BLK * LANE), lambda i: (0, 0)),    # weights, resident
            pl.BlockSpec((8, N_BLK * LANE), lambda i: (0, 0)),       # biases, resident
        ],
        out_specs=(
            pl.BlockSpec((TB, 1), lambda i: (i, 0)),
            pl.BlockSpec((TB, 1), lambda i: (i, 0)),
        ),
        compiler_params=pltpu.CompilerParams(
            dimension_semantics=("parallel",)),
    )(s_pad, w_slab, b_slab)
    return act[:B, 0], logp[:B, 0]


# ----------------------------------------------------------------------------
# Pure-JAX reference (matches the PyTorch forward) for verification
# ----------------------------------------------------------------------------

def reference_forward(states, params, u):
    (w_in, b_in, w_h1, b_h1, wih0, whh0, bih0, bhh0,
     wih1, whh1, bih1, bhh1, w_h2, b_h2, w_act, b_act) = params
    B = states.shape[0]
    x = jax.nn.sigmoid(states @ w_in + b_in)
    x = jnp.tanh(x @ w_h1 + b_h1)

    def cell(inp, h, wih, whh, bih, bhh):
        gi = inp @ wih + bih
        gh = h @ whh + bhh
        r = jax.nn.sigmoid(gi[:, :GRU_H] + gh[:, :GRU_H])
        z = jax.nn.sigmoid(gi[:, GRU_H:2 * GRU_H] + gh[:, GRU_H:2 * GRU_H])
        n = jnp.tanh(gi[:, 2 * GRU_H:] + r * gh[:, 2 * GRU_H:])
        return (1.0 - z) * n + z * h

    h0 = jnp.zeros((B, GRU_H), jnp.float32)     # self.hidden_state is zeros(2,1,32)
    h = cell(x, h0, wih0, whh0, bih0, bhh0)
    h = cell(h, h0, wih1, whh1, bih1, bhh1)
    y = jax.nn.relu(h @ w_h2 + b_h2)
    scores = y @ w_act + b_act
    probs = jax.nn.softmax(scores, axis=-1)
    cdf = jnp.cumsum(probs, axis=-1)
    action = jnp.minimum(
        jnp.sum((cdf < u[:, None]).astype(jnp.int32), axis=-1), N_ACT - 1)
    logp = jnp.log(probs[jnp.arange(B), action])
    return action, logp, probs, cdf


if __name__ == "__main__":
    key = jax.random.PRNGKey(0)
    k_params, k_state, k_u = jax.random.split(key, 3)

    params = make_params(k_params)
    w_slab, b_slab = pack_params(params)        # packed once, reused every call

    states = jax.random.normal(k_state, (BATCH, STATE_DIM), jnp.float32)
    u = jax.random.uniform(k_u, (BATCH,), jnp.float32)   # uniforms for Categorical.sample()

    actions, logps = actor_forward(states, u, w_slab, b_slab)
    actions, logps = jax.block_until_ready((actions, logps))

    ref_actions, ref_logps, ref_probs, ref_cdf = reference_forward(states, params, u)

    # Actions must match except for f32 ties: the kernel compares cdf(e) < u*sum(e)
    # while the reference compares cumsum(softmax) < u, so a disagreement is only
    # acceptable when the two picks differ by one index AND u lies within rounding
    # of the CDF boundary between them.
    mism = actions != ref_actions
    if bool(jnp.any(mism)):
        assert bool(jnp.all(jnp.where(mism, jnp.abs(actions - ref_actions) == 1, True))), \
            (actions, ref_actions)
        lo = jnp.minimum(actions, ref_actions)
        boundary = jnp.take_along_axis(ref_cdf, lo[:, None], axis=1)[:, 0]
        assert bool(jnp.all(jnp.where(mism, jnp.abs(boundary - u) < 1e-5, True))), \
            (boundary, u)

    # log_prob must equal the reference log-probability OF THE ACTION TAKEN.
    logp_taken = jnp.log(jnp.take_along_axis(ref_probs, actions[:, None], axis=1)[:, 0])
    assert jnp.allclose(logps, logp_taken, atol=1e-4, rtol=1e-4), (logps, logp_taken)

    print("KERNEL_OK")
</pallas_src>

<mosaic_0001>
module attributes {stable_mosaic.version = 11 : i64} {
  func.func @_actor_kernel(%arg0: i32, %arg1: memref<128x128xf32, #tpu.memory_space<vmem>>, %arg2: memref<128x1280xf32, #tpu.memory_space<vmem>>, %arg3: memref<8x1280xf32, #tpu.memory_space<vmem>>, %arg4: memref<128x1xi32, #tpu.memory_space<vmem>>, %arg5: memref<128x1xf32, #tpu.memory_space<vmem>>) attributes {dimension_semantics = [#tpu.dimension_semantics<parallel>], iteration_bounds = array<i64: 2>, scalar_prefetch = 0 : i64, scratch_operands = 0 : i64, tpu.core_type = #tpu.core_type<tc>, window_params = [{transform_indices = @transform_0, window_bounds = array<i64: 128, 128>}, {pipeline_mode = #tpu.pipeline_mode<synchronous>, transform_indices = @transform_1, window_bounds = array<i64: 128, 1280>}, {pipeline_mode = #tpu.pipeline_mode<synchronous>, transform_indices = @transform_2, window_bounds = array<i64: 8, 1280>}, {transform_indices = @transform_3, window_bounds = array<i64: 128, 1>}, {transform_indices = @transform_4, window_bounds = array<i64: 128, 1>}]} {
    %c0 = arith.constant 0 : index
    %c0_0 = arith.constant 0 : index
    %0 = vector.load %arg1[%c0, %c0_0] : memref<128x128xf32, #tpu.memory_space<vmem>>, vector<128x128xf32>
    %c0_1 = arith.constant 0 : index
    %c127 = arith.constant 127 : index
    %1 = vector.load %arg1[%c0_1, %c127] : memref<128x128xf32, #tpu.memory_space<vmem>>, vector<128x1xf32>
    %c0_2 = arith.constant 0 : index
    %c0_3 = arith.constant 0 : index
    %2 = vector.load %arg2[%c0_2, %c0_3] : memref<128x1280xf32, #tpu.memory_space<vmem>>, vector<128x128xf32>
    %cst = arith.constant dense<0.000000e+00> : vector<128x128xf32>
    %3 = tpu.matmul %0, %2, %cst {dimension_numbers = #tpu.dot_dimension_numbers<[1], [0], [0], [1], [0, 0, 1, 1], [], []>} : vector<128x128xf32>, vector<128x128xf32>, vector<128x128xf32> -> vector<128x128xf32>
    %c0_4 = arith.constant 0 : index
    %c0_5 = arith.constant 0 : index
    %4 = vector.load %arg3[%c0_4, %c0_5] : memref<8x1280xf32, #tpu.memory_space<vmem>>, vector<1x128xf32>
    %5 = vector.broadcast %4 : vector<1x128xf32> to vector<128x128xf32>
    %6 = arith.addf %3, %5 : vector<128x128xf32>
    %7 = arith.negf %6 : vector<128x128xf32>
    %8 = math.exp %7 : vector<128x128xf32>
    %cst_6 = arith.constant 1.000000e+00 : f32
    %9 = vector.broadcast %cst_6 : f32 to vector<128x128xf32>
    %10 = arith.addf %9, %8 : vector<128x128xf32>
    %11 = arith.divf %9, %10 : vector<128x128xf32>
    %c0_7 = arith.constant 0 : index
    %c128 = arith.constant 128 : index
    %12 = vector.load %arg2[%c0_7, %c128] : memref<128x1280xf32, #tpu.memory_space<vmem>>, vector<128x128xf32>
    %cst_8 = arith.constant dense<0.000000e+00> : vector<128x128xf32>
    %13 = tpu.matmul %11, %12, %cst_8 {dimension_numbers = #tpu.dot_dimension_numbers<[1], [0], [0], [1], [0, 0, 1, 1], [], []>} : vector<128x128xf32>, vector<128x128xf32>, vector<128x128xf32> -> vector<128x128xf32>
    %c0_9 = arith.constant 0 : index
    %c128_10 = arith.constant 128 : index
    %14 = vector.load %arg3[%c0_9, %c128_10] : memref<8x1280xf32, #tpu.memory_space<vmem>>, vector<1x128xf32>
    %15 = vector.broadcast %14 : vector<1x128xf32> to vector<128x128xf32>
    %16 = arith.addf %13, %15 : vector<128x128xf32>
    %17 = math.tanh %16 : vector<128x128xf32>
    %c0_11 = arith.constant 0 : index
    %c256 = arith.constant 256 : index
    %18 = vector.load %arg2[%c0_11, %c256] : memref<128x1280xf32, #tpu.memory_space<vmem>>, vector<128x384xf32>
    %cst_12 = arith.constant dense<0.000000e+00> : vector<128x384xf32>
    %19 = tpu.matmul %17, %18, %cst_12 {dimension_numbers = #tpu.dot_dimension_numbers<[1], [0], [0], [1], [0, 0, 1, 1], [], []>} : vector<128x128xf32>, vector<128x384xf32>, vector<128x384xf32> -> vector<128x384xf32>
    %c0_13 = arith.constant 0 : index
    %c256_14 = arith.constant 256 : index
    %20 = vector.load %arg3[%c0_13, %c256_14] : memref<8x1280xf32, #tpu.memory_space<vmem>>, vector<1x384xf32>
    %21 = vector.broadcast %20 : vector<1x384xf32> to vector<128x384xf32>
    %22 = arith.addf %19, %21 : vector<128x384xf32>
    %23 = vector.extract_strided_slice %22 {offsets = [0, 0], sizes = [128, 128], strides = [1, 1]} : vector<128x384xf32> to vector<128x128xf32>
    %24 = arith.negf %23 : vector<128x128xf32>
    %25 = math.exp %24 : vector<128x128xf32>
    %cst_15 = arith.constant 1.000000e+00 : f32
    %26 = vector.broadcast %cst_15 : f32 to vector<128x128xf32>
    %27 = arith.addf %26, %25 : vector<128x128xf32>
    %28 = arith.divf %26, %27 : vector<128x128xf32>
    %29 = vector.extract_strided_slice %22 {offsets = [0, 128], sizes = [128, 128], strides = [1, 1]} : vector<128x384xf32> to vector<128x128xf32>
    %30 = arith.negf %29 : vector<128x128xf32>
    %31 = math.exp %30 : vector<128x128xf32>
    %cst_16 = arith.constant 1.000000e+00 : f32
    %32 = vector.broadcast %cst_16 : f32 to vector<128x128xf32>
    %33 = arith.addf %32, %31 : vector<128x128xf32>
    %34 = arith.divf %32, %33 : vector<128x128xf32>
    %35 = vector.extract_strided_slice %22 {offsets = [0, 256], sizes = [128, 128], strides = [1, 1]} : vector<128x384xf32> to vector<128x128xf32>
    %c1 = arith.constant 1 : index
    %c512 = arith.constant 512 : index
    %36 = vector.load %arg3[%c1, %c512] : memref<8x1280xf32, #tpu.memory_space<vmem>>, vector<1x128xf32>
    %37 = vector.broadcast %36 : vector<1x128xf32> to vector<128x128xf32>
    %38 = arith.mulf %28, %37 : vector<128x128xf32>
    %39 = arith.addf %35, %38 : vector<128x128xf32>
    %40 = math.tanh %39 : vector<128x128xf32>
    %cst_17 = arith.constant 1.000000e+00 : f32
    %41 = vector.broadcast %cst_17 : f32 to vector<128x128xf32>
    %42 = arith.subf %41, %34 : vector<128x128xf32>
    %43 = arith.mulf %42, %40 : vector<128x128xf32>
    %c0_18 = arith.constant 0 : index
    %c640 = arith.constant 640 : index
    %44 = vector.load %arg2[%c0_18, %c640] : memref<128x1280xf32, #tpu.memory_space<vmem>>, vector<128x384xf32>
    %cst_19 = arith.constant dense<0.000000e+00> : vector<128x384xf32>
    %45 = tpu.matmul %43, %44, %cst_19 {dimension_numbers = #tpu.dot_dimension_numbers<[1], [0], [0], [1], [0, 0, 1, 1], [], []>} : vector<128x128xf32>, vector<128x384xf32>, vector<128x384xf32> -> vector<128x384xf32>
    %c0_20 = arith.constant 0 : index
    %c640_21 = arith.constant 640 : index
    %46 = vector.load %arg3[%c0_20, %c640_21] : memref<8x1280xf32, #tpu.memory_space<vmem>>, vector<1x384xf32>
    %47 = vector.broadcast %46 : vector<1x384xf32> to vector<128x384xf32>
    %48 = arith.addf %45, %47 : vector<128x384xf32>
    %49 = vector.extract_strided_slice %48 {offsets = [0, 0], sizes = [128, 128], strides = [1, 1]} : vector<128x384xf32> to vector<128x128xf32>
    %50 = arith.negf %49 : vector<128x128xf32>
    %51 = math.exp %50 : vector<128x128xf32>
    %cst_22 = arith.constant 1.000000e+00 : f32
    %52 = vector.broadcast %cst_22 : f32 to vector<128x128xf32>
    %53 = arith.addf %52, %51 : vector<128x128xf32>
    %54 = arith.divf %52, %53 : vector<128x128xf32>
    %55 = vector.extract_strided_slice %48 {offsets = [0, 128], sizes = [128, 128], strides = [1, 1]} : vector<128x384xf32> to vector<128x128xf32>
    %56 = arith.negf %55 : vector<128x128xf32>
    %57 = math.exp %56 : vector<128x128xf32>
    %cst_23 = arith.constant 1.000000e+00 : f32
    %58 = vector.broadcast %cst_23 : f32 to vector<128x128xf32>
    %59 = arith.addf %58, %57 : vector<128x128xf32>
    %60 = arith.divf %58, %59 : vector<128x128xf32>
    %61 = vector.extract_strided_slice %48 {offsets = [0, 256], sizes = [128, 128], strides = [1, 1]} : vector<128x384xf32> to vector<128x128xf32>
    %c1_24 = arith.constant 1 : index
    %c896 = arith.constant 896 : index
    %62 = vector.load %arg3[%c1_24, %c896] : memref<8x1280xf32, #tpu.memory_space<vmem>>, vector<1x128xf32>
    %63 = vector.broadcast %62 : vector<1x128xf32> to vector<128x128xf32>
    %64 = arith.mulf %54, %63 : vector<128x128xf32>
    %65 = arith.addf %61, %64 : vector<128x128xf32>
    %66 = math.tanh %65 : vector<128x128xf32>
    %cst_25 = arith.constant 1.000000e+00 : f32
    %67 = vector.broadcast %cst_25 : f32 to vector<128x128xf32>
    %68 = arith.subf %67, %60 : vector<128x128xf32>
    %69 = arith.mulf %68, %66 : vector<128x128xf32>
    %c0_26 = arith.constant 0 : index
    %c1024 = arith.constant 1024 : index
    %70 = vector.load %arg2[%c0_26, %c1024] : memref<128x1280xf32, #tpu.memory_space<vmem>>, vector<128x128xf32>
    %cst_27 = arith.constant dense<0.000000e+00> : vector<128x128xf32>
    %71 = tpu.matmul %69, %70, %cst_27 {dimension_numbers = #tpu.dot_dimension_numbers<[1], [0], [0], [1], [0, 0, 1, 1], [], []>} : vector<128x128xf32>, vector<128x128xf32>, vector<128x128xf32> -> vector<128x128xf32>
    %c0_28 = arith.constant 0 : index
    %c1024_29 = arith.constant 1024 : index
    %72 = vector.load %arg3[%c0_28, %c1024_29] : memref<8x1280xf32, #tpu.memory_space<vmem>>, vector<1x128xf32>
    %73 = vector.broadcast %72 : vector<1x128xf32> to vector<128x128xf32>
    %74 = arith.addf %71, %73 : vector<128x128xf32>
    %cst_30 = arith.constant 0.000000e+00 : f32
    %75 = vector.broadcast %cst_30 : f32 to vector<128x128xf32>
    %76 = arith.maximumf %74, %75 : vector<128x128xf32>
    %c0_31 = arith.constant 0 : index
    %c1152 = arith.constant 1152 : index
    %77 = vector.load %arg2[%c0_31, %c1152] : memref<128x1280xf32, #tpu.memory_space<vmem>>, vector<128x128xf32>
    %cst_32 = arith.constant dense<0.000000e+00> : vector<128x128xf32>
    %78 = tpu.matmul %76, %77, %cst_32 {dimension_numbers = #tpu.dot_dimension_numbers<[1], [0], [0], [1], [0, 0, 1, 1], [], []>} : vector<128x128xf32>, vector<128x128xf32>, vector<128x128xf32> -> vector<128x128xf32>
    %c0_33 = arith.constant 0 : index
    %c1152_34 = arith.constant 1152 : index
    %79 = vector.load %arg3[%c0_33, %c1152_34] : memref<8x1280xf32, #tpu.memory_space<vmem>>, vector<1x128xf32>
    %80 = vector.broadcast %79 : vector<1x128xf32> to vector<128x128xf32>
    %81 = arith.addf %78, %80 : vector<128x128xf32>
    %82 = tpu.iota {dimensions = array<i32: 1>} : vector<128x128xi32>
    %c5_i32 = arith.constant 5 : i32
    %83 = vector.broadcast %c5_i32 : i32 to vector<128x128xi32>
    %84 = arith.cmpi slt, %82, %83 : vector<128x128xi32>
    %cst_35 = arith.constant -1.000000e+30 : f32
    %85 = vector.broadcast %cst_35 : f32 to vector<128x128xf32>
    %86 = arith.select %84, %81, %85 : vector<128x128xi1>, vector<128x128xf32>
    %cst_36 = arith.constant dense<0xFF800000> : vector<128xf32>
    %87 = vector.multi_reduction <maximumf>, %86, %cst_36 [1] : vector<128x128xf32> to vector<128xf32>
    %88 = vector.shape_cast %87 : vector<128xf32> to vector<128x1xf32>
    %89 = vector.broadcast %88 : vector<128x1xf32> to vector<128x128xf32>
    %90 = arith.subf %86, %89 : vector<128x128xf32>
    %91 = math.exp %90 : vector<128x128xf32>
    %cst_37 = arith.constant 0.000000e+00 : f32
    %92 = vector.broadcast %cst_37 : f32 to vector<128x128xf32>
    %93 = arith.select %84, %91, %92 : vector<128x128xi1>, vector<128x128xf32>
    %cst_38 = arith.constant dense<0.000000e+00> : vector<128xf32>
    %94 = vector.multi_reduction <add>, %93, %cst_38 [1] : vector<128x128xf32> to vector<128xf32>
    %95 = vector.shape_cast %94 : vector<128xf32> to vector<128x1xf32>
    %c1_i32 = arith.constant 1 : i32
    %96 = tpu.dynamic_rotate %93 by %c1_i32 dim 1 : vector<128x128xf32>, i32 -> vector<128x128xf32>
    %97 = arith.addf %93, %96 : vector<128x128xf32>
    %c2_i32 = arith.constant 2 : i32
    %98 = tpu.dynamic_rotate %97 by %c2_i32 dim 1 : vector<128x128xf32>, i32 -> vector<128x128xf32>
    %99 = arith.addf %97, %98 : vector<128x128xf32>
    %c4_i32 = arith.constant 4 : i32
    %100 = tpu.dynamic_rotate %99 by %c4_i32 dim 1 : vector<128x128xf32>, i32 -> vector<128x128xf32>
    %101 = arith.addf %99, %100 : vector<128x128xf32>
    %102 = arith.mulf %1, %95 : vector<128x1xf32>
    %103 = vector.broadcast %102 : vector<128x1xf32> to vector<128x128xf32>
    %104 = arith.cmpf olt, %101, %103 : vector<128x128xf32>
    %105 = arith.andi %104, %84 : vector<128x128xi1>
    %106 = arith.extui %105 : vector<128x128xi1> to vector<128x128xi32>
    %cst_39 = arith.constant dense<0> : vector<128xi32>
    %107 = vector.multi_reduction <add>, %106, %cst_39 [1] : vector<128x128xi32> to vector<128xi32>
    %108 = vector.shape_cast %107 : vector<128xi32> to vector<128x1xi32>
    %c4_i32_40 = arith.constant 4 : i32
    %109 = vector.broadcast %c4_i32_40 : i32 to vector<128x1xi32>
    %110 = arith.minsi %108, %109 : vector<128x1xi32>
    %111 = vector.broadcast %110 : vector<128x1xi32> to vector<128x128xi32>
    %112 = arith.cmpi eq, %82, %111 : vector<128x128xi32>
    %cst_41 = arith.constant 0.000000e+00 : f32
    %113 = vector.broadcast %cst_41 : f32 to vector<128x128xf32>
    %114 = arith.select %112, %90, %113 : vector<128x128xi1>, vector<128x128xf32>
    %cst_42 = arith.constant dense<0.000000e+00> : vector<128xf32>
    %115 = vector.multi_reduction <add>, %114, %cst_42 [1] : vector<128x128xf32> to vector<128xf32>
    %116 = vector.shape_cast %115 : vector<128xf32> to vector<128x1xf32>
    %117 = math.log %95 : vector<128x1xf32>
    %118 = arith.subf %116, %117 : vector<128x1xf32>
    %c0_43 = arith.constant 0 : index
    %c0_44 = arith.constant 0 : index
    %119 = vector.load %arg4[%c0_43, %c0_44] : memref<128x1xi32, #tpu.memory_space<vmem>>, vector<128x1xi32>
    tpu.vector_store %arg4[%c0_43, %c0_44], %110 {strides = array<i32>} : memref<128x1xi32, #tpu.memory_space<vmem>>, vector<128x1xi32>,
    %c0_45 = arith.constant 0 : index
    %c0_46 = arith.constant 0 : index
    %120 = vector.load %arg5[%c0_45, %c0_46] : memref<128x1xf32, #tpu.memory_space<vmem>>, vector<128x1xf32>
    tpu.vector_store %arg5[%c0_45, %c0_46], %118 {strides = array<i32>} : memref<128x1xf32, #tpu.memory_space<vmem>>, vector<128x1xf32>,
    return
  }
  func.func @transform_0(%arg0: i32) -> (i32, i32) {
    %c0_i32 = arith.constant 0 : i32
    %c0_i32_0 = arith.constant 0 : i32
    return %arg0, %c0_i32 : i32, i32
  }
  func.func @transform_1(%arg0: i32) -> (i32, i32) {
    %c0_i32 = arith.constant 0 : i32
    %c0_i32_0 = arith.constant 0 : i32
    %c0_i32_1 = arith.constant 0 : i32
    return %c0_i32, %c0_i32_0 : i32, i32
  }
  func.func @transform_2(%arg0: i32) -> (i32, i32) {
    %c0_i32 = arith.constant 0 : i32
    %c0_i32_0 = arith.constant 0 : i32
    %c0_i32_1 = arith.constant 0 : i32
    return %c0_i32, %c0_i32_0 : i32, i32
  }
  func.func @transform_3(%arg0: i32) -> (i32, i32) {
    %c0_i32 = arith.constant 0 : i32
    %c0_i32_0 = arith.constant 0 : i32
    return %arg0, %c0_i32 : i32, i32
  }
  func.func @transform_4(%arg0: i32) -> (i32, i32) {
    %c0_i32 = arith.constant 0 : i32
    %c0_i32_0 = arith.constant 0 : i32
    return %arg0, %c0_i32 : i32, i32
  }
}

</mosaic_0001>

<bundles_post_ra>
// kernel: actor_forward.1
= control target key start
LH: loop header
LB: loop body
LE: loop exit
PB: predicated region body
PF: predicated region fallthrough
CT: control target
= control target key end

     0   :  { %s4621_s15 = smov 0   ;;  %s6234_s0 = inlined_call_operand.vmem [shape: f32[256,128], index: 0, kind: input, shape index: {}]   ;;  %s6235_s1 = inlined_call_operand.vmem [shape: f32[128,1280], index: 1, kind: input, shape index: {}]   ;;  %s6236_s2 = inlined_call_operand.vmem [shape: f32[8,1280], index: 2, kind: input, shape index: {}]   ;;  %s6237_s3 = inlined_call_operand.vmem [shape: s32[256,1], index: 3, kind: output, shape index: {0}]   ;;  %s6238_s4 = inlined_call_operand.vmem [shape: f32[256,1], index: 4, kind: output, shape index: {1}]  }
   0x1 LB: > { %s3191_s16 = sadd.s32 4294967295, %s4588_s15   ;;  %p3195_p0 = scmp.ge.s32.totalorder %s4588_s15, 1  ;;  %s4588_s15 = sphi %s4621_s15, %s15_s15  }
   0x2   : > { %p166_p1 = scmp.lt.s32.totalorder %s4588_s15, 3 }
   0x4   : > { %p167_p2 = pnand %p3195_p0, %p166_p1 }
   0x6   : > { %170 = sbr.rel (%p167_p2) target bundleno = 2657 (0xa61), region = 32 }
   0xd   : > { %v231_v0 = vld [vmem:[%s6235_s1] sm:$0xff]  ;;  %v232_v1 = vld [vmem:[%s6235_s1 + $0x50] sm:$0xff]  ;;  %s3196_s23 = sshll.u32 %s3191_s16, 4  ;;  %v489_v9 = vld [vmem:[%s6235_s1 + $0x8] sm:$0xff]  ;;  %s4591_s9 = smov 1  }
   0xe   : > { %v233_v2 = vld [vmem:[%s6235_s1 + $0xa0] sm:$0xff]  ;;  %v3814_v3 = vpack.c.bf16 %v232_v1, %v231_v0  ;;  %v234_v4 = vld [vmem:[%s6235_s1 + $0xf0] sm:$0xff]  ;;  %p198_p3 = scmp.lt.s32.totalorder %s3196_s23, 31  ;;  %v490_v10 = vld [vmem:[%s6235_s1 + $0x58] sm:$0xff]  ;;  %s4593_s10 = smov 2  }
   0xf   : > { %v3818_v5 = vpack.c.bf16 %v234_v4, %v233_v2  ;;  %v235_v6 = vld [vmem:[%s6235_s1 + $0x140] sm:$0xff]  ;;  %v236_v7 = vld [vmem:[%s6235_s1 + $0x190] sm:$0xff]  ;;  %v3846_v13 = vpack.c.bf16 %v490_v10, %v489_v9  ;;  %v491_v43 = vld [vmem:[%s6235_s1 + $0xa8] sm:$0xff]  ;;  %s4594_s11 = smov 4  }
  0x10   : > { %3815 = vmatprep.subr.bf16.mxu0 %v3814_v3  ;;  %s6270_s23 = smov (!%p198_p3, %s3196_s23), 31  ;;  %v3822_v8 = vpack.c.bf16 %v236_v7, %v235_v6  ;;  %v237_v11 = vld [vmem:[%s6235_s1 + $0x1e0] sm:$0xff]  ;;  %v238_v12 = vld [vmem:[%s6235_s1 + $0x230] sm:$0xff]  ;;  %v492_v44 = vld [vmem:[%s6235_s1 + $0xf8] sm:$0xff] }
  0x11   : > { %3817 = vmatpush3.bf16.msra.mxu0 %v3814_v3  ;;  %s4647_s30 = sshll.u32 %s6270_s23, 3  ;;  %v3826_v15 = vpack.c.bf16 %v238_v12, %v237_v11  ;;  %3847 = vmatprep.subr.bf16.mxu1 %v3846_v13  ;;  %v239_v16 = vld [vmem:[%s6235_s1 + $0x280] sm:$0xff]  ;;  %v240_v17 = vld [vmem:[%s6235_s1 + $0x2d0] sm:$0xff]  ;;  %v3850_v45 = vpack.c.bf16 %v492_v44, %v491_v43  ;;  %v493_v46 = vld [vmem:[%s6235_s1 + $0x148] sm:$0xff] }
  0x12   : > { %3819 = vmatprep.subr.bf16.mxu0 %v3818_v5  ;;  %s4665_s16 = scalar_lea.vmem %s6234_s0, %s4647_s30  ;;  %3849 = vmatpush3.bf16.msra.mxu1 %v3846_v13  ;;  %v3830_v18 = vpack.c.bf16 %v240_v17, %v239_v16  ;;  %v241_v19 = vld [vmem:[%s6235_s1 + $0x320] sm:$0xff]  ;;  %v242_v20 = vld [vmem:[%s6235_s1 + $0x370] sm:$0xff]  ;;  %v494_v47 = vld [vmem:[%s6235_s1 + $0x198] sm:$0xff]  ;;  %s6111_s13 = scalar_lea.vmem %s6237_s3, %s4647_s30 }
  0x13   : > { %v215_v14 = vld [vmem:[%s4665_s16] sm:$0xff]  ;;  %v3834_v21 = vpack.c.bf16 %v242_v20, %v241_v19  ;;  %v244_v23 = vld [vmem:[%s6235_s1 + $0x410] sm:$0xff]  ;;  %v216_v28 = vld [vmem:[%s4665_s16 + $0x8] sm:$0xff]  ;;  %3851 = vmatprep.subr.bf16.mxu1 %v3850_v45  ;;  %v3854_v48 = vpack.c.bf16 %v494_v47, %v493_v46  ;;  %s6184_s18 = scalar_lea.vmem %s6238_s4, %s4647_s30 }
  0x14   : > { %3510 = vmatprep.mubr.f32.mxu0 %v215_v14  ;;  %v243_v22 = vld [vmem:[%s6235_s1 + $0x3c0] sm:$0xff]  ;;  %v246_v26 = vld [vmem:[%s6235_s1 + $0x4b0] sm:$0xff]  ;;  %v218_v30 = vld [vmem:[%s4665_s16 + $0x18] sm:$0xff] }
  0x15   : > { %3821 = vmatpush3.bf16.msra.mxu0 %v3818_v5  ;;  %v3838_v24 = vpack.c.bf16 %v244_v23, %v243_v22  ;;  %v245_v25 = vld [vmem:[%s6235_s1 + $0x460] sm:$0xff]  ;;  %v217_v29 = vld [vmem:[%s4665_s16 + $0x10] sm:$0xff]  ;;  %v220_v32 = vld [vmem:[%s4665_s16 + $0x28] sm:$0xff] }
  0x16   : > { %3823 = vmatprep.subr.bf16.mxu0 %v3822_v8  ;;  %v3842_v27 = vpack.c.bf16 %v246_v26, %v245_v25  ;;  %v219_v31 = vld [vmem:[%s4665_s16 + $0x20] sm:$0xff]  ;;  %v221_v33 = vld [vmem:[%s4665_s16 + $0x30] sm:$0xff]  ;;  %v222_v34 = vld [vmem:[%s4665_s16 + $0x38] sm:$0xff]  ;;  %3853 = vmatpush3.bf16.msra.mxu1 %v3850_v45 }
  0x17   : > { %v223_v35 = vld [vmem:[%s4665_s16 + $0x40] sm:$0xff]  ;;  %v224_v36 = vld [vmem:[%s4665_s16 + $0x48] sm:$0xff]  ;;  %v225_v37 = vld [vmem:[%s4665_s16 + $0x50] sm:$0xff]  ;;  %3855 = vmatprep.subr.bf16.mxu1 %v3854_v48 }
  0x18   : > { %v226_v38 = vld [vmem:[%s4665_s16 + $0x58] sm:$0xff]  ;;  %v227_v39 = vld [vmem:[%s4665_s16 + $0x60] sm:$0xff]  ;;  %v228_v40 = vld [vmem:[%s4665_s16 + $0x68] sm:$0xff] }
  0x19   : > { %3825 = vmatpush3.bf16.msra.mxu0 %v3822_v8  ;;  %v229_v41 = vld [vmem:[%s4665_s16 + $0x70] sm:$0xff]  ;;  %v230_v42 = vld [vmem:[%s4665_s16 + $0x78] sm:$0xff]  ;;  %v495_v49 = vld [vmem:[%s6235_s1 + $0x1e8] sm:$0xff] }
  0x1a   : > { %3827 = vmatprep.subr.bf16.mxu0 %v3826_v15  ;;  %3857 = vmatpush3.bf16.msra.mxu1 %v3854_v48  ;;  %v496_v50 = vld [vmem:[%s6235_s1 + $0x238] sm:$0xff]  ;;  %v497_v52 = vld [vmem:[%s6235_s1 + $0x288] sm:$0xff]  ;;  %v667_v2 = vld [vmem:[%s6235_s1 + $0x10] sm:$0xff] }
  0x1b   : > { %v3858_v51 = vpack.c.bf16 %v496_v50, %v495_v49  ;;  %v498_v53 = vld [vmem:[%s6235_s1 + $0x2d8] sm:$0xff]  ;;  %v499_v55 = vld [vmem:[%s6235_s1 + $0x328] sm:$0xff]  ;;  %v670_v4 = vld [vmem:[%s6235_s1 + $0x60] sm:$0xff] }
  0x1c   : > { %v3862_v54 = vpack.c.bf16 %v498_v53, %v497_v52  ;;  %v500_v56 = vld [vmem:[%s6235_s1 + $0x378] sm:$0xff]  ;;  %v501_v58 = vld [vmem:[%s6235_s1 + $0x3c8] sm:$0xff]  ;;  %v669_v5 = vld [vmem:[%s6235_s1 + $0x20] sm:$0xff]  ;;  %v3880_v7 = vpack.c.bf16 %v670_v4, %v667_v2 }
  0x1d   : > { %3829 = vmatpush3.bf16.msra.mxu0 %v3826_v15  ;;  %3859 = vmatprep.subr.bf16.mxu1 %v3858_v51  ;;  %v3866_v57 = vpack.c.bf16 %v500_v56, %v499_v55  ;;  %v502_v59 = vld [vmem:[%s6235_s1 + $0x418] sm:$0xff]  ;;  %v503_v61 = vld [vmem:[%s6235_s1 + $0x468] sm:$0xff]  ;;  %v672_v6 = vld [vmem:[%s6235_s1 + $0x70] sm:$0xff] }
  0x1e   : > { %3831 = vmatprep.subr.bf16.mxu0 %v3830_v18  ;;  %3861 = vmatpush3.bf16.msra.mxu1 %v3858_v51  ;;  %v3870_v60 = vpack.c.bf16 %v502_v59, %v501_v58  ;;  %v504_v62 = vld [vmem:[%s6235_s1 + $0x4b8] sm:$0xff]  ;;  %v671_v1 = vld [vmem:[%s6235_s1 + $0x68] sm:$0xff]  ;;  %v4767_v8 = vpack.c.bf16 %v672_v6, %v669_v5  ;;  %v673_v11 = vld [vmem:[%s6235_s1 + $0xb0] sm:$0xff] }
  0x1f   : > { %3863 = vmatprep.subr.bf16.mxu1 %v3862_v54  ;;  %v3874_v63 = vpack.c.bf16 %v504_v62, %v503_v61  ;;  %v668_v0 = vld [vmem:[%s6235_s1 + $0x18] sm:$0xff]  ;;  %v677_v10 = vld [vmem:[%s6235_s1 + $0x108] sm:$0xff]  ;;  %v676_v13 = vld [vmem:[%s6235_s1 + $0x100] sm:$0xff] }
  0x20   : > { %v3878_v3 = vpack.c.bf16 %v671_v1, %v668_v0  ;;  %v674_v9 = vld [vmem:[%s6235_s1 + $0xb8] sm:$0xff]  ;;  %v3884_v14 = vpack.c.bf16 %v676_v13, %v673_v11  ;;  %v683_v16 = vld [vmem:[%s6235_s1 + $0x1a8] sm:$0xff]  ;;  %v682_v19 = vld [vmem:[%s6235_s1 + $0x1a0] sm:$0xff] }
  0x21   : > { %3833 = vmatpush3.bf16.msra.mxu0 %v3830_v18  ;;  %v3882_v12 = vpack.c.bf16 %v677_v10, %v674_v9  ;;  %v680_v15 = vld [vmem:[%s6235_s1 + $0x158] sm:$0xff]  ;;  %v679_v18 = vld [vmem:[%s6235_s1 + $0x150] sm:$0xff]  ;;  %v688_v25 = vld [vmem:[%s6235_s1 + $0x240] sm:$0xff] }
  0x22   : > { %3835 = vmatprep.subr.bf16.mxu0 %v3834_v21  ;;  %3865 = vmatpush3.bf16.msra.mxu1 %v3862_v54  ;;  %v3886_v17 = vpack.c.bf16 %v683_v16, %v680_v15  ;;  %v686_v20 = vld [vmem:[%s6235_s1 + $0x1f8] sm:$0xff]  ;;  %v3888_v22 = vpack.c.bf16 %v682_v19, %v679_v18 }
  0x23   : > { %3867 = vmatprep.subr.bf16.mxu1 %v3866_v57  ;;  %v692_v26 = vld [vmem:[%s6235_s1 + $0x298] sm:$0xff] }
  0x25   : > { %3837 = vmatpush3.bf16.msra.mxu0 %v3834_v21  ;;  %v689_v21 = vld [vmem:[%s6235_s1 + $0x248] sm:$0xff] }
  0x26   : > { %3839 = vmatprep.subr.bf16.mxu0 %v3838_v24  ;;  %3869 = vmatpush3.bf16.msra.mxu1 %v3866_v57  ;;  %v3890_v23 = vpack.c.bf16 %v689_v21, %v686_v20 }
  0x27   : > { %3871 = vmatprep.subr.bf16.mxu1 %v3870_v60 }
  0x29   : > { %3841 = vmatpush3.bf16.msra.mxu0 %v3838_v24  ;;  %v685_v24 = vld [vmem:[%s6235_s1 + $0x1f0] sm:$0xff] }
  0x2a   : > { %3843 = vmatprep.subr.bf16.mxu0 %v3842_v27  ;;  %3873 = vmatpush3.bf16.msra.mxu1 %v3870_v60 }
  0x2b   : > { %3875 = vmatprep.subr.bf16.mxu1 %v3874_v63 }
  0x2d   : > { %3845 = vmatpush3.bf16.msra.mxu0 %v3842_v27  ;;  %v695_v27 = vld [vmem:[%s6235_s1 + $0x2e8] sm:$0xff] }
  0x2e   : > { %3877 = vmatpush3.bf16.msra.mxu1 %v3874_v63  ;;  %3879 = vmatprep.subr.bf16.mxu0 %v3878_v3 }
  0x2f   : > { %3911 = vmatprep.subr.bf16.mxu1 %v4767_v8 }
  0x30   : > { %3511 = vmatmul.mubr.f32.vlgmr.msra.gmra.mrb[0].mxu0 %v216_v28  ;;  %v3892_v28 = vpack.c.bf16 %v688_v25, %v685_v24  ;;  %v675_v25 = vld [vmem:[%s6235_s1 + $0xc0] sm:$0xff] }
  0x31   : > { %3513 = vmatprep.mubr.f32.mxu0 %v217_v29  ;;  %3881 = vmatpush1.bf16.msra.mxu0 %v3880_v7  ;;  %v3894_v29 = vpack.c.bf16 %v695_v27, %v692_v26  ;;  %v678_v26 = vld [vmem:[%s6235_s1 + $0x110] sm:$0xff] }
  0x32   : > { %3883 = vmatprep.subr.bf16.mxu0 %v3882_v12 }
  0x34   : > { %3514 = vmatmul.mubr.f32.gmra.mrb[2].mxu0 %v218_v30  ;;  %v691_v30 = vld [vmem:[%s6235_s1 + $0x290] sm:$0xff] }
  0x35   : > { %3516 = vmatprep.mubr.f32.mxu0 %v219_v31  ;;  %3885 = vmatpush1.bf16.msra.mxu0 %v3884_v14  ;;  %v694_v31 = vld [vmem:[%s6235_s1 + $0x2e0] sm:$0xff] }
  0x36   : > { %3887 = vmatprep.subr.bf16.mxu0 %v3886_v17 }
  0x38   : > { %3517 = vmatmul.mubr.f32.gmra.mrb[4].mxu0 %v220_v32  ;;  %v3896_v32 = vpack.c.bf16 %v694_v31, %v691_v30 }
  0x39   : > { %3519 = vmatprep.mubr.f32.mxu0 %v221_v33  ;;  %3889 = vmatpush1.bf16.msra.mxu0 %v3888_v22  ;;  %v4821_v33 = vld [vmem:[%s6236_s2] ss:$0 sm:$0xff] }
  0x3a   : > { %3891 = vmatprep.subr.bf16.mxu0 %v3890_v23 }
  0x3c   : > { %3520 = vmatmul.mubr.f32.gmra.mrb[6].mxu0 %v222_v34 }
  0x3d   : > { %3522 = vmatprep.mubr.f32.mxu0 %v223_v35  ;;  %3893 = vmatpush1.bf16.msra.mxu0 %v3892_v28 }
  0x3e   : > { %3895 = vmatprep.subr.bf16.mxu0 %v3894_v29 }
  0x40   : > { %3523 = vmatmul.mubr.f32.gmra.mrb[8].mxu0 %v224_v36 }
  0x41   : > { %3525 = vmatprep.mubr.f32.mxu0 %v225_v37  ;;  %3897 = vmatpush1.bf16.msra.mxu0 %v3896_v32 }
  0x44   : > { %3526 = vmatmul.mubr.f32.gmra.mrb[10].mxu0 %v226_v38 }
  0x45   : > { %3528 = vmatprep.mubr.f32.mxu0 %v227_v39 }
  0x48   : > { %3529 = vmatmul.mubr.f32.gmra.mrb[12].mxu0 %v228_v40 }
  0x49   : > { %3531 = vmatprep.mubr.f32.mxu0 %v229_v41 }
  0x4c   : > { %3532 = vmatmul.mubr.f32.gmra.mrb[14].mxu0 %v230_v42 }
 0x103   : > { %v3512_v34 = vpop.f32.mrb[0].mxu0 }
 0x104   : > { %v320_v35 = vadd.f32 %v3512_v34, %v4821_v33  ;;  %v314_v36 = vpop.f32.mrb[1].mxu0 }
 0x105   : > { %v315_v37 = vadd.f32 %v314_v36, %v4821_v33 }
 0x106   : > { %v3203_v38 = vmul.f32 -1.442695, %v320_v35 }
 0x107   : > { %v3202_v39 = vmul.f32 -1.442695, %v315_v37  ;;  %v3515_v40 = vpop.f32.mrb[2].mxu0 }
 0x108   : > { %4086 = vpow2.f32 %v3203_v38  ;;  %v330_v41 = vadd.f32 %v3515_v40, %v4821_v33  ;;  %v324_v42 = vpop.f32.mrb[3].mxu0  ;;  %v3914_v38 = vpack.c.bf16 %v678_v26, %v675_v25  ;;  %v707_v25 = vld [vmem:[%s6235_s1 + $0x428] sm:$0xff]  ;;  %v703_v26 = vld [vmem:[%s6235_s1 + $0x3d0] sm:$0xff] }
 0x109   : > { %4088 = vpow2.f32 %v3202_v39  ;;  %v325_v43 = vadd.f32 %v324_v42, %v4821_v33  ;;  %v684_v42 = vld [vmem:[%s6235_s1 + $0x1b0] sm:$0xff] }
 0x10a   : > { %v3205_v44 = vmul.f32 -1.442695, %v330_v41  ;;  %v681_v41 = vld [vmem:[%s6235_s1 + $0x160] sm:$0xff] }
 0x10b   : > { %v3204_v45 = vmul.f32 -1.442695, %v325_v43  ;;  %v3518_v46 = vpop.f32.mrb[4].mxu0 }
 0x10c   : > { %4090 = vpow2.f32 %v3205_v44  ;;  %v340_v47 = vadd.f32 %v3518_v46, %v4821_v33  ;;  %v334_v48 = vpop.f32.mrb[5].mxu0 }
 0x10d   : > { %4092 = vpow2.f32 %v3204_v45  ;;  %v335_v49 = vadd.f32 %v334_v48, %v4821_v33 }
 0x10e   : > { %v3207_v50 = vmul.f32 -1.442695, %v340_v47  ;;  %v3918_v47 = vpack.c.bf16 %v684_v42, %v681_v41  ;;  %v4590_v41 = vmov 0.0  }
 0x10f   : > { %v3206_v51 = vmul.f32 -1.442695, %v335_v49  ;;  %v3521_v52 = vpop.f32.mrb[6].mxu0  ;;  %797 = vmatprep.mubr.f32.mxu0 %v4590_v41 }
 0x110   : > { %4094 = vpow2.f32 %v3207_v50  ;;  %v350_v53 = vadd.f32 %v3521_v52, %v4821_v33  ;;  %v344_v54 = vpop.f32.mrb[7].mxu0  ;;  %v687_v50 = vld [vmem:[%s6235_s1 + $0x200] sm:$0xff] }
 0x111   : > { %4096 = vpow2.f32 %v3206_v51  ;;  %v345_v55 = vadd.f32 %v344_v54, %v4821_v33  ;;  %v690_v51 = vld [vmem:[%s6235_s1 + $0x250] sm:$0xff] }
 0x112   : > { %v4087_v56 = vpop.eup %4086  ;;  %v3209_v57 = vmul.f32 -1.442695, %v350_v53 }
 0x113   : > { %v4089_v58 = vpop.eup %4088  ;;  %v442_v59 = vadd.f32 1.0, %v4087_v56  ;;  %v3208_v60 = vmul.f32 -1.442695, %v345_v55  ;;  %v3524_v61 = vpop.f32.mrb[8].mxu0  ;;  %v3922_v55 = vpack.c.bf16 %v690_v51, %v687_v50 }
 0x114   : > { %4098 = vpow2.f32 %v3209_v57  ;;  %v441_v62 = vadd.f32 1.0, %v4089_v58  ;;  %v360_v63 = vadd.f32 %v3524_v61, %v4821_v33  ;;  %v354_v0 = vpop.f32.mrb[9].mxu0 }
 0x115   : > { %4100 = vrcp.f32 %v442_v59  ;;  %v355_v1 = vadd.f32 %v354_v0, %v4821_v33 }
 0x116   : > { %v4091_v2 = vpop.eup %4090  ;;  %4102 = vpow2.f32 %v3208_v60  ;;  %v3211_v3 = vmul.f32 -1.442695, %v360_v63 }
 0x117   : > { %v4093_v4 = vpop.eup %4092  ;;  %v444_v5 = vadd.f32 1.0, %v4091_v2  ;;  %4104 = vrcp.f32 %v441_v62  ;;  %v3210_v6 = vmul.f32 -1.442695, %v355_v1  ;;  %v3527_v7 = vpop.f32.mrb[10].mxu0 }
 0x118   : > { %v443_v9 = vadd.f32 1.0, %v4093_v4  ;;  %4106 = vpow2.f32 %v3211_v3  ;;  %v370_v10 = vadd.f32 %v3527_v7, %v4821_v33  ;;  %v364_v11 = vpop.f32.mrb[11].mxu0 }
 0x119   : > { %4108 = vrcp.f32 %v444_v5  ;;  %v365_v12 = vadd.f32 %v364_v11, %v4821_v33 }
 0x11a   : > { %v4095_v13 = vpop.eup %4094  ;;  %4110 = vrcp.f32 %v443_v9  ;;  %v3213_v14 = vmul.f32 -1.442695, %v370_v10 }
 0x11b   : > { %v4097_v15 = vpop.eup %4096  ;;  %v446_v16 = vadd.f32 1.0, %v4095_v13  ;;  %4112 = vpow2.f32 %v3210_v6  ;;  %v3212_v17 = vmul.f32 -1.442695, %v365_v12  ;;  %v3530_v18 = vpop.f32.mrb[12].mxu0  ;;  %v693_v12 = vld [vmem:[%s6235_s1 + $0x2a0] sm:$0xff]  ;;  %v696_v13 = vld [vmem:[%s6235_s1 + $0x2f0] sm:$0xff] }
 0x11c   : > { %v445_v19 = vadd.f32 1.0, %v4097_v15  ;;  %4114 = vpow2.f32 %v3213_v14  ;;  %v380_v20 = vadd.f32 %v3530_v18, %v4821_v33  ;;  %v374_v21 = vpop.f32.mrb[13].mxu0  ;;  %v3926_v14 = vpack.c.bf16 %v696_v13, %v693_v12  ;;  %v698_v15 = vld [vmem:[%s6235_s1 + $0x338] sm:$0xff]  ;;  %v697_v18 = vld [vmem:[%s6235_s1 + $0x330] sm:$0xff] }
 0x11d   : > { %4116 = vrcp.f32 %v446_v16  ;;  %v375_v22 = vadd.f32 %v374_v21, %v4821_v33  ;;  %v701_v16 = vld [vmem:[%s6235_s1 + $0x388] sm:$0xff] }
 0x11e   : > { %v4099_v23 = vpop.eup %4098  ;;  %4118 = vrcp.f32 %v445_v19  ;;  %v3215_v24 = vmul.f32 -1.442695, %v380_v20  ;;  %v700_v19 = vld [vmem:[%s6235_s1 + $0x380] sm:$0xff] }
 0x11f   : > { %v4101_v27 = vpop.eup %4100  ;;  %v448_v28 = vadd.f32 1.0, %v4099_v23  ;;  %4120 = vpow2.f32 %v3212_v17  ;;  %v3214_v29 = vmul.f32 -1.442695, %v375_v22  ;;  %v3533_v30 = vpop.f32.mrb[14].mxu0  ;;  %v3898_v17 = vpack.c.bf16 %v701_v16, %v698_v15  ;;  %v699_v20 = vld [vmem:[%s6235_s1 + $0x340] sm:$0xff]  ;;  %v702_v22 = vld [vmem:[%s6235_s1 + $0x390] sm:$0xff] }
 0x120   : > { %v4103_v31 = vpop.eup %4102  ;;  %4122 = vpow2.f32 %v3215_v24  ;;  %v390_v32 = vadd.f32 %v3533_v30, %v4821_v33  ;;  %v384_v34 = vpop.f32.mrb[15].mxu0  ;;  %v3900_v21 = vpack.c.bf16 %v700_v19, %v697_v18  ;;  %v3930_v23 = vpack.c.bf16 %v702_v22, %v699_v20  ;;  %v704_v24 = vld [vmem:[%s6235_s1 + $0x3d8] sm:$0xff]  ;;  %v708_v30 = vld [vmem:[%s6235_s1 + $0x430] sm:$0xff] }
 0x121   : > { %v4105_v35 = vpop.eup %4104  ;;  %4124 = vrcp.f32 %v448_v28  ;;  %v447_v36 = vadd.f32 1.0, %v4103_v31  ;;  %v385_v37 = vadd.f32 %v384_v34, %v4821_v33  ;;  %3899 = vmatprep.subr.bf16.mxu0 %v3898_v17  ;;  %v706_v28 = vld [vmem:[%s6235_s1 + $0x420] sm:$0xff]  ;;  %v710_v34 = vld [vmem:[%s6235_s1 + $0x478] sm:$0xff] }
 0x122   : > { %v4107_v39 = vpop.eup %4106  ;;  %3566 = vmatprep.mubr.f32.mxu1 %v4105_v35  ;;  %4126 = vpow2.f32 %v3214_v29  ;;  %v3217_v40 = vmul.f32 -1.442695, %v390_v32  ;;  %3901 = vmatpush1.bf16.msra.mxu0 %v3900_v21  ;;  %v705_v29 = vld [vmem:[%s6235_s1 + $0x3e0] sm:$0xff]  ;;  %v3904_v31 = vpack.c.bf16 %v706_v28, %v703_v26  ;;  %v713_v35 = vld [vmem:[%s6235_s1 + $0x4c8] sm:$0xff]  ;;  %v1313_v28 = vld [vmem:[%s6235_s1 + $0x30] sm:$0xff] }
 0x123   : > { %v4109_v43 = vpop.eup %4108  ;;  %4128 = vrcp.f32 %v447_v36  ;;  %3567 = vmatmul.mubr.f32.vlgmr.msra.gmra.mrb[0].mxu1 %v4101_v27  ;;  %v450_v44 = vadd.f32 1.0, %v4107_v39  ;;  %v3216_v45 = vmul.f32 -1.442695, %v385_v37  ;;  %v3902_v27 = vpack.c.bf16 %v707_v25, %v704_v24  ;;  %v709_v36 = vld [vmem:[%s6235_s1 + $0x470] sm:$0xff]  ;;  %v711_v39 = vld [vmem:[%s6235_s1 + $0x480] sm:$0xff] }
 0x124   : > { %v4111_v46 = vpop.eup %4110  ;;  %4130 = vpow2.f32 %v3217_v40  ;;  %3913 = vmatpush3.bf16.msra.mxu1 %v4767_v8  ;;  %v3934_v32 = vpack.c.bf16 %v708_v30, %v705_v29  ;;  %v3906_v37 = vpack.c.bf16 %v713_v35, %v710_v34  ;;  %v714_v40 = vld [vmem:[%s6235_s1 + $0x4d0] sm:$0xff]  ;;  %v1316_v29 = vld [vmem:[%s6235_s1 + $0x80] sm:$0xff]  ;;  %v1314_v35 = vld [vmem:[%s6235_s1 + $0x38] sm:$0xff] }
 0x125   : > { %v4113_v33 = vpop.eup %4112  ;;  %3569 = vmatprep.mubr.f32.mxu1 %v4111_v46  ;;  %3915 = vmatprep.subr.bf16.mxu1 %v3914_v38  ;;  %4132 = vpow2.f32 %v3216_v45  ;;  %v3942_v30 = vpack.c.bf16 %v1316_v29, %v1313_v28  ;;  %v1354_v29 = vld [vmem:[%s6235_s1 + $0x488] sm:$0xff] }
 0x126   : > { %v4115_v48 = vpop.eup %4114  ;;  %v449_v49 = vadd.f32 1.0, %v4113_v33  ;;  %4134 = vrcp.f32 %v450_v44  ;;  %3903 = vmatprep.subr.bf16.mxu0 %v3902_v27  ;;  %v4922_v44 = vld [vmem:[%s6236_s2 + $0x8] ss:$0 sm:$0xff] }
 0x127   : > { %v4117_v52 = vpop.eup %4116  ;;  %3570 = vmatmul.mubr.f32.gmra.mrb[2].mxu1 %v4109_v43  ;;  %v452_v53 = vadd.f32 1.0, %v4115_v48  ;;  %3905 = vmatpush1.bf16.msra.mxu0 %v3904_v31  ;;  %v3938_v43 = vpack.c.bf16 %v714_v40, %v711_v39  ;;  %v1312_v31 = vld [vmem:[%s6235_s1 + $0x28] sm:$0xff]  ;;  %v1322_v39 = vld [vmem:[%s6235_s1 + $0x120] sm:$0xff] }
 0x128   : > { %v4119_v8 = vpop.eup %4118  ;;  %4136 = vrcp.f32 %v449_v49  ;;  %3917 = vmatpush3.bf16.msra.mxu1 %v3914_v38  ;;  %v712_v38 = vld [vmem:[%s6235_s1 + $0x4c0] sm:$0xff]  ;;  %3907 = vmatprep.subr.bf16.mxu0 %v3906_v37 }
 0x129   : > { %v4121_v54 = vpop.eup %4120  ;;  %3572 = vmatprep.mubr.f32.mxu1 %v4119_v8  ;;  %3919 = vmatprep.subr.bf16.mxu1 %v3918_v47  ;;  %4138 = vrcp.f32 %v452_v53  ;;  %v3908_v42 = vpack.c.bf16 %v712_v38, %v709_v36  ;;  %v1317_v36 = vld [vmem:[%s6235_s1 + $0x88] sm:$0xff]  ;;  %v1319_v38 = vld [vmem:[%s6235_s1 + $0xd0] sm:$0xff] }
 0x12a   : > { %v4123_v56 = vpop.eup %4122  ;;  %v451_v57 = vadd.f32 1.0, %v4121_v54  ;;  %v3974_v37 = vpack.c.bf16 %v1317_v36, %v1314_v35  ;;  %v3946_v40 = vpack.c.bf16 %v1322_v39, %v1319_v38  ;;  %v1356_v35 = vld [vmem:[%s6235_s1 + $0x498] sm:$0xff]  ;;  %v1359_v36 = vld [vmem:[%s6235_s1 + $0x4e8] sm:$0xff]  ;;  %v718_v38 = vlaneseq }
 0x12b   : > { %v4125_v58 = vpop.eup %4124  ;;  %3573 = vmatmul.mubr.f32.gmra.mrb[4].mxu1 %v4117_v52  ;;  %v454_v59 = vadd.f32 1.0, %v4123_v56  ;;  %3909 = vmatpush1.bf16.msra.mxu0 %v3908_v42  ;;  %v1318_v42 = vld [vmem:[%s6235_s1 + $0xc8] sm:$0xff] }
 0x12c   : > { %v4127_v60 = vpop.eup %4126  ;;  %4140 = vrcp.f32 %v451_v57  ;;  %3921 = vmatpush3.bf16.msra.mxu1 %v3918_v47  ;;  %3975 = vmatprep.subr.bf16.mxu0 %v3974_v37  ;;  %v5101_v39 = vshrl.u32 %v718_v38, 7 }
 0x12d   : > { %v4129_v61 = vpop.eup %4128  ;;  %v453_v62 = vadd.f32 1.0, %v4127_v60  ;;  %3923 = vmatprep.subr.bf16.mxu1 %v3922_v55  ;;  %4142 = vrcp.f32 %v454_v59 }
 0x12e   : > { %v4131_v63 = vpop.eup %4130  ;;  %3575 = vmatprep.mubr.f32.mxu1 %v4129_v61 }
 0x12f   : > { %4144 = vrcp.f32 %v453_v62  ;;  %3576 = vmatmul.mubr.f32.gmra.mrb[6].mxu1 %v4125_v58  ;;  %v456_v0 = vadd.f32 1.0, %v4131_v63  ;;  %v4133_v1 = vpop.eup %4132 }
 0x130   : > { %3925 = vmatpush3.bf16.msra.mxu1 %v3922_v55  ;;  %v4135_v2 = vpop.eup %4134  ;;  %v455_v3 = vadd.f32 1.0, %v4133_v1 }
 0x131   : > { %4146 = vrcp.f32 %v456_v0  ;;  %3927 = vmatprep.subr.bf16.mxu1 %v3926_v14 }
 0x132   : > { %v4137_v4 = vpop.eup %4136  ;;  %4148 = vrcp.f32 %v455_v3 }
 0x133   : > { %3578 = vmatprep.mubr.f32.mxu1 %v4137_v4  ;;  %v4139_v5 = vpop.eup %4138 }
 0x134   : > { %3579 = vmatmul.mubr.f32.gmra.mrb[8].mxu1 %v4135_v2 }
 0x135   : > { %3929 = vmatpush3.bf16.msra.mxu1 %v3926_v14 }
 0x136   : > { %v4141_v6 = vpop.eup %4140  ;;  %3931 = vmatprep.subr.bf16.mxu1 %v3930_v23 }
 0x137   : > { %3581 = vmatprep.mubr.f32.mxu1 %v4141_v6  ;;  %v4143_v7 = vpop.eup %4142 }
 0x138   : > { %3582 = vmatmul.mubr.f32.gmra.mrb[10].mxu1 %v4139_v5 }
 0x139   : > { %v4145_v9 = vpop.eup %4144  ;;  %3933 = vmatpush3.bf16.msra.mxu1 %v3930_v23 }
 0x13a   : > { %3584 = vmatprep.mubr.f32.mxu1 %v4145_v9  ;;  %3935 = vmatprep.subr.bf16.mxu1 %v3934_v32 }
 0x13b   : > { %v4147_v10 = vpop.eup %4146 }
 0x13c   : > { %3585 = vmatmul.mubr.f32.gmra.mrb[12].mxu1 %v4143_v7  ;;  %v4149_v11 = vpop.eup %4148 }
 0x13d   : > { %3587 = vmatprep.mubr.f32.mxu1 %v4149_v11  ;;  %3937 = vmatpush3.bf16.msra.mxu1 %v3934_v32  ;;  %v1315_v32 = vld [vmem:[%s6235_s1 + $0x78] sm:$0xff] }
 0x13e   : > { %3939 = vmatprep.subr.bf16.mxu1 %v3938_v43  ;;  %v3944_v34 = vpack.c.bf16 %v1315_v32, %v1312_v31  ;;  %v1353_v31 = vld [vmem:[%s6235_s1 + $0x448] sm:$0xff] }
 0x140   : > { %3588 = vmatmul.mubr.f32.gmra.mrb[14].mxu1 %v4147_v10 }
 0x141   : > { %3941 = vmatpush3.bf16.msra.mxu1 %v3938_v43  ;;  %v1321_v43 = vld [vmem:[%s6235_s1 + $0x118] sm:$0xff] }
 0x142   : > { %3943 = vmatprep.subr.bf16.mxu1 %v3942_v30  ;;  %v1357_v30 = vld [vmem:[%s6235_s1 + $0x4d8] sm:$0xff] }
 0x143   : > { %v3972_v32 = vpack.c.bf16 %v1357_v30, %v1354_v29  ;;  %v728_v29 = vsub.s32 2, %v5101_v39 }
 0x1f6   : > { %v3568_v45 = vpop.f32.mrb[0].mxu1 }
 0x1f7   : > { %v578_v46 = vadd.f32 %v3568_v45, %v4922_v44  ;;  %v572_v33 = vpop.f32.mrb[1].mxu1  ;;  %v1320_v45 = vld [vmem:[%s6235_s1 + $0xd8] sm:$0xff] }
 0x1f8   : > { %v573_v47 = vadd.f32 %v572_v33, %v4922_v44  ;;  %v1325_v33 = vld [vmem:[%s6235_s1 + $0x170] sm:$0xff] }
 0x1fa   : > { %4150 = vtanh.f32 %v573_v47  ;;  %v3571_v48 = vpop.f32.mrb[2].mxu1 }
 0x1fb   : > { %4152 = vtanh.f32 %v578_v46  ;;  %v588_v49 = vadd.f32 %v3571_v48, %v4922_v44  ;;  %v582_v50 = vpop.f32.mrb[3].mxu1  ;;  %v1323_v46 = vld [vmem:[%s6235_s1 + $0x128] sm:$0xff]  ;;  %v1328_v48 = vld [vmem:[%s6235_s1 + $0x1c0] sm:$0xff] }
 0x1fc   : > { %v583_v51 = vadd.f32 %v582_v50, %v4922_v44  ;;  %v3978_v47 = vpack.c.bf16 %v1323_v46, %v1320_v45  ;;  %v1327_v50 = vld [vmem:[%s6235_s1 + $0x1b8] sm:$0xff] }
 0x1fe   : > { %4154 = vtanh.f32 %v583_v51  ;;  %v3574_v52 = vpop.f32.mrb[4].mxu1  ;;  %v3950_v51 = vpack.c.bf16 %v1328_v48, %v1325_v33 }
 0x1ff   : > { %4156 = vtanh.f32 %v588_v49  ;;  %v598_v53 = vadd.f32 %v3574_v52, %v4922_v44  ;;  %v592_v8 = vpop.f32.mrb[5].mxu1  ;;  %v1324_v49 = vld [vmem:[%s6235_s1 + $0x168] sm:$0xff] }
 0x200   : > { %v593_v54 = vadd.f32 %v592_v8, %v4922_v44  ;;  %v3952_v52 = vpack.c.bf16 %v1327_v50, %v1324_v49  ;;  %v1334_v8 = vld [vmem:[%s6235_s1 + $0x260] sm:$0xff] }
 0x202   : > { %4158 = vtanh.f32 %v593_v54  ;;  %v3577_v55 = vpop.f32.mrb[6].mxu1  ;;  %v1326_v54 = vld [vmem:[%s6235_s1 + $0x178] sm:$0xff] }
 0x203   : > { %4160 = vtanh.f32 %v598_v53  ;;  %v608_v56 = vadd.f32 %v3577_v55, %v4922_v44  ;;  %v602_v57 = vpop.f32.mrb[7].mxu1  ;;  %v1331_v53 = vld [vmem:[%s6235_s1 + $0x210] sm:$0xff] }
 0x204   : > { %v4151_v58 = vpop.eup %4150  ;;  %v603_v59 = vadd.f32 %v602_v57, %v4922_v44  ;;  %v3954_v55 = vpack.c.bf16 %v1334_v8, %v1331_v53  ;;  %v1333_v57 = vld [vmem:[%s6235_s1 + $0x258] sm:$0xff] }
 0x205   : > { %v4153_v60 = vpop.eup %4152  ;;  %798 = vmatmul.mubr.f32.vlgmr.msra.gmra.mrb[16].mxu0 %v4151_v58  ;;  %3622 = vmatprep.mubr.f32.mxu1 %v4151_v58  ;;  %v1329_v58 = vld [vmem:[%s6235_s1 + $0x1c8] sm:$0xff] }
 0x206   : > { %3623 = vmatmul.mubr.f32.vlgmr.msra.gmra.mrb[16].mxu1 %v4153_v60  ;;  %803 = vmatprep.mubr.f32.mxu0 %v4590_v41  ;;  %4162 = vtanh.f32 %v603_v59 }
 0x207   : > { %4164 = vtanh.f32 %v608_v56  ;;  %v3580_v61 = vpop.f32.mrb[8].mxu1  ;;  %3945 = vmatpush1.bf16.msra.mxu1 %v3944_v34  ;;  %3977 = vmatpush3.bf16.msra.mxu0 %v3974_v37  ;;  %v1330_v56 = vld [vmem:[%s6235_s1 + $0x208] sm:$0xff]  ;;  %v4002_v37 = vpack.c.bf16 %v1359_v36, %v1356_v35 }
 0x208   : > { %v4155_v62 = vpop.eup %4154  ;;  %v618_v63 = vadd.f32 %v3580_v61, %v4922_v44  ;;  %v612_v0 = vpop.f32.mrb[9].mxu1  ;;  %3947 = vmatprep.subr.bf16.mxu1 %v3946_v40  ;;  %3979 = vmatprep.subr.bf16.mxu0 %v3978_v47  ;;  %v3956_v59 = vpack.c.bf16 %v1333_v57, %v1330_v56  ;;  %v1337_v61 = vld [vmem:[%s6235_s1 + $0x2b0] sm:$0xff]  ;;  %v720_v40 = vsub.s32 0, %v5101_v39 }
 0x209   : > { %v4157_v1 = vpop.eup %4156  ;;  %804 = vmatmul.mubr.f32.gmra.mrb[18].mxu0 %v4153_v60  ;;  %v613_v2 = vadd.f32 %v612_v0, %v4922_v44  ;;  %3625 = vmatprep.mubr.f32.mxu1 %v4155_v62  ;;  %v3982_v60 = vpack.c.bf16 %v1329_v58, %v1326_v54 }
 0x20a   : > { %809 = vmatprep.mubr.f32.mxu0 %v4590_v41  ;;  %3626 = vmatmul.mubr.f32.gmra.mrb[18].mxu1 %v4157_v1 }
 0x20b   : > { %4166 = vtanh.f32 %v613_v2  ;;  %v3583_v3 = vpop.f32.mrb[10].mxu1  ;;  %3981 = vmatpush3.bf16.msra.mxu0 %v3978_v47  ;;  %v1339_v2 = vld [vmem:[%s6235_s1 + $0x2f8] sm:$0xff] }
 0x20c   : > { %v4159_v4 = vpop.eup %4158  ;;  %4168 = vtanh.f32 %v618_v63  ;;  %v628_v5 = vadd.f32 %v3583_v3, %v4922_v44  ;;  %v622_v6 = vpop.f32.mrb[11].mxu1  ;;  %3983 = vmatprep.subr.bf16.mxu0 %v3982_v60  ;;  %v1332_v63 = vld [vmem:[%s6235_s1 + $0x218] sm:$0xff]  ;;  %v1335_v3 = vld [vmem:[%s6235_s1 + $0x268] sm:$0xff] }
 0x20d   : > { %v4161_v7 = vpop.eup %4160  ;;  %810 = vmatmul.mubr.f32.gmra.mrb[20].mxu0 %v4155_v62  ;;  %v623_v9 = vadd.f32 %v622_v6, %v4922_v44  ;;  %3628 = vmatprep.mubr.f32.mxu1 %v4159_v4  ;;  %v1340_v62 = vld [vmem:[%s6235_s1 + $0x300] sm:$0xff]  ;;  %v1343_v6 = vld [vmem:[%s6235_s1 + $0x350] sm:$0xff] }
 0x20e   : > { %815 = vmatprep.mubr.f32.mxu0 %v4590_v41  ;;  %3629 = vmatmul.mubr.f32.gmra.mrb[20].mxu1 %v4161_v7  ;;  %v3958_v0 = vpack.c.bf16 %v1340_v62, %v1337_v61 }
 0x20f   : > { %4170 = vtanh.f32 %v623_v9  ;;  %v3586_v10 = vpop.f32.mrb[12].mxu1  ;;  %3985 = vmatpush3.bf16.msra.mxu0 %v3982_v60  ;;  %v1338_v9 = vld [vmem:[%s6235_s1 + $0x2b8] sm:$0xff] }
 0x210   : > { %v4163_v11 = vpop.eup %4162  ;;  %4172 = vtanh.f32 %v628_v5  ;;  %v638_v12 = vadd.f32 %v3586_v10, %v4922_v44  ;;  %v632_v13 = vpop.f32.mrb[13].mxu1  ;;  %v3986_v5 = vpack.c.bf16 %v1335_v3, %v1332_v63 }
 0x211   : > { %v4165_v14 = vpop.eup %4164  ;;  %816 = vmatmul.mubr.f32.gmra.mrb[22].mxu0 %v4157_v1  ;;  %v633_v15 = vadd.f32 %v632_v13, %v4922_v44  ;;  %3631 = vmatprep.mubr.f32.mxu1 %v4163_v11  ;;  %v1336_v1 = vld [vmem:[%s6235_s1 + $0x2a8] sm:$0xff] }
 0x212   : > { %821 = vmatprep.mubr.f32.mxu0 %v4590_v41  ;;  %3632 = vmatmul.mubr.f32.gmra.mrb[22].mxu1 %v4165_v14  ;;  %v1341_v13 = vld [vmem:[%s6235_s1 + $0x308] sm:$0xff] }
 0x213   : > { %4174 = vtanh.f32 %v633_v15  ;;  %v3589_v16 = vpop.f32.mrb[14].mxu1  ;;  %3987 = vmatprep.subr.bf16.mxu0 %v3986_v5  ;;  %v3990_v15 = vpack.c.bf16 %v1341_v13, %v1338_v9 }
 0x214   : > { %4176 = vtanh.f32 %v638_v12  ;;  %v648_v17 = vadd.f32 %v3589_v16, %v4922_v44  ;;  %v642_v18 = vpop.f32.mrb[15].mxu1  ;;  %3989 = vmatpush3.bf16.msra.mxu0 %v3986_v5  ;;  %v1345_v12 = vld [vmem:[%s6235_s1 + $0x398] sm:$0xff]  ;;  %v1349_v16 = vld [vmem:[%s6235_s1 + $0x3f0] sm:$0xff] }
 0x215   : > { %v4167_v19 = vpop.eup %4166  ;;  %822 = vmatmul.mubr.f32.gmra.mrb[24].mxu0 %v4159_v4  ;;  %v643_v20 = vadd.f32 %v642_v18, %v4922_v44  ;;  %v3948_v44 = vpack.c.bf16 %v1321_v43, %v1318_v42  ;;  %v3960_v4 = vpack.c.bf16 %v1339_v2, %v1336_v1  ;;  %3991 = vmatprep.subr.bf16.mxu0 %v3990_v15  ;;  %v1344_v18 = vld [vmem:[%s6235_s1 + $0x358] sm:$0xff]  ;;  %v724_v43 = vsub.s32 1, %v5101_v39 }
 0x216   : > { %v4169_v21 = vpop.eup %4168  ;;  %827 = vmatprep.mubr.f32.mxu0 %v4590_v41  ;;  %3634 = vmatprep.mubr.f32.mxu1 %v4167_v19  ;;  %v5107_v42 = vld [vmem:[%s6236_s2 + $0x10] ss:$8 sm:$0x7] }
 0x217   : > { %4178 = vtanh.f32 %v643_v20  ;;  %3635 = vmatmul.mubr.f32.gmra.mrb[24].mxu1 %v4169_v21  ;;  %v1348_v20 = vld [vmem:[%s6235_s1 + $0x3e8] sm:$0xff]  ;;  %v5118_v45 = vrot.slane %v5107_v42, %v724_v43 }
 0x218   : > { %4180 = vtanh.f32 %v648_v17  ;;  %3949 = vmatpush1.bf16.msra.mxu1 %v3948_v44  ;;  %3993 = vmatpush3.bf16.msra.mxu0 %v3990_v15  ;;  %v1352_v17 = vld [vmem:[%s6235_s1 + $0x440] sm:$0xff]  ;;  %v5113_v44 = vrot.slane %v5107_v42, %v720_v40 }
 0x219   : > { %v4171_v22 = vpop.eup %4170  ;;  %828 = vmatmul.mubr.f32.gmra.mrb[26].mxu0 %v4161_v7  ;;  %3951 = vmatprep.subr.bf16.mxu1 %v3950_v51  ;;  %v1346_v7 = vld [vmem:[%s6235_s1 + $0x3a0] sm:$0xff] }
 0x21a   : > { %v4173_v23 = vpop.eup %4172  ;;  %833 = vmatprep.mubr.f32.mxu0 %v4590_v41  ;;  %3637 = vmatprep.mubr.f32.mxu1 %v4171_v22  ;;  %v3962_v10 = vpack.c.bf16 %v1346_v7, %v1343_v6 }
 0x21b   : > { %3638 = vmatmul.mubr.f32.gmra.mrb[26].mxu1 %v4173_v23 }
 0x21c   : > { %3953 = vmatpush1.bf16.msra.mxu1 %v3952_v52 }
 0x21d   : > { %v4175_v24 = vpop.eup %4174  ;;  %834 = vmatmul.mubr.f32.gmra.mrb[28].mxu0 %v4163_v11  ;;  %3955 = vmatprep.subr.bf16.mxu1 %v3954_v55  ;;  %v1342_v11 = vld [vmem:[%s6235_s1 + $0x348] sm:$0xff] }
 0x21e   : > { %v4177_v25 = vpop.eup %4176  ;;  %839 = vmatprep.mubr.f32.mxu0 %v4590_v41  ;;  %3640 = vmatprep.mubr.f32.mxu1 %v4175_v24 }
 0x21f   : > { %3641 = vmatmul.mubr.f32.gmra.mrb[28].mxu1 %v4177_v25 }
 0x220   : > { %3957 = vmatpush1.bf16.msra.mxu1 %v3956_v59 }
 0x221   : > { %v4179_v26 = vpop.eup %4178  ;;  %840 = vmatmul.mubr.f32.gmra.mrb[30].mxu0 %v4165_v14  ;;  %3959 = vmatprep.subr.bf16.mxu1 %v3958_v0  ;;  %v3964_v14 = vpack.c.bf16 %v1345_v12, %v1342_v11 }
 0x222   : > { %v4181_v27 = vpop.eup %4180  ;;  %845 = vmatprep.mubr.f32.mxu0 %v4590_v41  ;;  %3643 = vmatprep.mubr.f32.mxu1 %v4179_v26 }
 0x223   : > { %3644 = vmatmul.mubr.f32.gmra.mrb[30].mxu1 %v4181_v27 }
 0x224   : > { %1442 = vmatprep.mubr.f32.mxu1 %v4590_v41  ;;  %3961 = vmatpush1.bf16.msra.mxu1 %v3960_v4 }
 0x225   : > { %846 = vmatmul.mubr.f32.gmra.mrb[32].mxu0 %v4167_v19  ;;  %3963 = vmatprep.subr.bf16.mxu1 %v3962_v10  ;;  %v3966_v19 = vpack.c.bf16 %v1352_v17, %v1349_v16 }
 0x226   : > { %851 = vmatprep.mubr.f32.mxu0 %v4590_v41 }
 0x228   : > { %3965 = vmatpush1.bf16.msra.mxu1 %v3964_v14 }
 0x229   : > { %852 = vmatmul.mubr.f32.gmra.mrb[34].mxu0 %v4169_v21  ;;  %v1351_v21 = vld [vmem:[%s6235_s1 + $0x438] sm:$0xff]  ;;  %3967 = vmatprep.subr.bf16.mxu1 %v3966_v19 }
 0x22a   : > { %857 = vmatprep.mubr.f32.mxu0 %v4590_v41 }
 0x22d   : > { %858 = vmatmul.mubr.f32.gmra.mrb[36].mxu0 %v4171_v22  ;;  %v1347_v22 = vld [vmem:[%s6235_s1 + $0x3a8] sm:$0xff] }
 0x22e   : > { %863 = vmatprep.mubr.f32.mxu0 %v4590_v41 }
 0x231   : > { %864 = vmatmul.mubr.f32.gmra.mrb[38].mxu0 %v4173_v23  ;;  %v3968_v23 = vpack.c.bf16 %v1351_v21, %v1348_v20 }
 0x232   : > { %869 = vmatprep.mubr.f32.mxu0 %v4590_v41 }
 0x233   : > { %3969 = vmatpush1.bf16.msra.mxu1 %v3968_v23 }
 0x235   : > { %870 = vmatmul.mubr.f32.gmra.mrb[40].mxu0 %v4175_v24  ;;  %v3994_v24 = vpack.c.bf16 %v1347_v22, %v1344_v18 }
 0x236   : > { %875 = vmatprep.mubr.f32.mxu0 %v4590_v41 }
 0x237   : > { %3995 = vmatprep.subr.bf16.mxu0 %v3994_v24 }
 0x238   : > { %3997 = vmatpush3.bf16.msra.mxu0 %v3994_v24 }
 0x239   : > { %876 = vmatmul.mubr.f32.gmra.mrb[42].mxu0 %v4177_v25  ;;  %v1355_v25 = vld [vmem:[%s6235_s1 + $0x490] sm:$0xff] }
 0x23a   : > { %881 = vmatprep.mubr.f32.mxu0 %v4590_v41 }
 0x23d   : > { %882 = vmatmul.mubr.f32.gmra.mrb[44].mxu0 %v4179_v26  ;;  %v1358_v26 = vld [vmem:[%s6235_s1 + $0x4e0] sm:$0xff] }
 0x23e   : > { %887 = vmatprep.mubr.f32.mxu0 %v4590_v41  ;;  %v3970_v28 = vpack.c.bf16 %v1358_v26, %v1355_v25 }
 0x240   : > { %3971 = vmatprep.subr.bf16.mxu1 %v3970_v28 }
 0x241   : > { %888 = vmatmul.mubr.f32.gmra.mrb[46].mxu0 %v4181_v27  ;;  %v1350_v27 = vld [vmem:[%s6235_s1 + $0x3f8] sm:$0xff]  ;;  %3973 = vmatpush1.bf16.msra.mxu1 %v3972_v32 }
 0x242   : > { %v3998_v34 = vpack.c.bf16 %v1353_v31, %v1350_v27 }
 0x244   : > { %3999 = vmatprep.subr.bf16.mxu0 %v3998_v34 }
 0x245   : > { %4001 = vmatpush3.bf16.msra.mxu0 %v3998_v34 }
 0x246   : > { %4003 = vmatprep.subr.bf16.mxu0 %v4002_v37 }
 0x249   : > { %4005 = vmatpush3.bf16.msra.mxu0 %v4002_v37 }
 0x2d8   : > { %v799_v46 = vpop.f32.mrb[16].mxu0 }
 0x2d9   : > { %v800_v33 = vadd.f32 %v799_v46, %v5113_v44  ;;  %v801_v47 = vpop.f32.mrb[17].mxu0  ;;  %v5121_v48 = vpop.f32.mrb[16].mxu1 }
 0x2da   : > { %v802_v49 = vadd.f32 %v801_v47, %v5118_v45  ;;  %v5124_v50 = vpop.f32.mrb[17].mxu1 }
 0x2db   : > { %v3219_v51 = vmul.f32 -1.442695, %v800_v33 }
 0x2dc   : > { %v3235_v52 = vmul.f32 -1.442695, %v802_v49  ;;  %v805_v53 = vpop.f32.mrb[18].mxu0 }
 0x2dd   : > { %4182 = vpow2.f32 %v3219_v51  ;;  %v806_v8 = vadd.f32 %v805_v53, %v5113_v44  ;;  %v807_v54 = vpop.f32.mrb[19].mxu0  ;;  %v5127_v55 = vpop.f32.mrb[18].mxu1 }
 0x2de   : > { %4184 = vpow2.f32 %v3235_v52  ;;  %v808_v56 = vadd.f32 %v807_v54, %v5118_v45  ;;  %v5130_v57 = vpop.f32.mrb[19].mxu1  ;;  %v5160_v52 = vrot.slane %v5107_v42, %v728_v29  ;;  %v5166_v54 = vld [vmem:[%s6236_s2 + $0x21] ss:$0 sm:$0xff] }
 0x2df   : > { %v3220_v58 = vmul.f32 -1.442695, %v806_v8 }
 0x2e0   : > { %v3236_v59 = vmul.f32 -1.442695, %v808_v56  ;;  %v811_v60 = vpop.f32.mrb[20].mxu0 }
 0x2e1   : > { %4186 = vpow2.f32 %v3220_v58  ;;  %v812_v61 = vadd.f32 %v811_v60, %v5113_v44  ;;  %v813_v62 = vpop.f32.mrb[21].mxu0  ;;  %v5133_v63 = vpop.f32.mrb[20].mxu1 }
 0x2e2   : > { %4188 = vpow2.f32 %v3236_v59  ;;  %v814_v0 = vadd.f32 %v813_v62, %v5118_v45  ;;  %v5136_v1 = vpop.f32.mrb[21].mxu1 }
 0x2e3   : > { %v3221_v2 = vmul.f32 -1.442695, %v812_v61 }
 0x2e4   : > { %v3237_v3 = vmul.f32 -1.442695, %v814_v0  ;;  %v817_v4 = vpop.f32.mrb[22].mxu0 }
 0x2e5   : > { %4190 = vpow2.f32 %v3221_v2  ;;  %v818_v5 = vadd.f32 %v817_v4, %v5113_v44  ;;  %v819_v6 = vpop.f32.mrb[23].mxu0  ;;  %v5139_v7 = vpop.f32.mrb[22].mxu1 }
 0x2e6   : > { %4192 = vpow2.f32 %v3237_v3  ;;  %v820_v9 = vadd.f32 %v819_v6, %v5118_v45  ;;  %v5142_v10 = vpop.f32.mrb[23].mxu1  ;;  %v961_v3 = vadd.f32 %v5124_v50, %v5160_v52 }
 0x2e7   : > { %v4183_v11 = vpop.eup %4182  ;;  %v3222_v12 = vmul.f32 -1.442695, %v818_v5 }
 0x2e8   : > { %v4185_v13 = vpop.eup %4184  ;;  %v1087_v14 = vadd.f32 1.0, %v4183_v11  ;;  %v3238_v15 = vmul.f32 -1.442695, %v820_v9  ;;  %v823_v16 = vpop.f32.mrb[24].mxu0 }
 0x2e9   : > { %4194 = vpow2.f32 %v3222_v12  ;;  %v824_v17 = vadd.f32 %v823_v16, %v5113_v44  ;;  %v825_v18 = vpop.f32.mrb[25].mxu0  ;;  %v1183_v22 = vadd.f32 1.0, %v4185_v13 }
 0x2ea   : > { %4196 = vrcp.f32 %v1087_v14  ;;  %v826_v19 = vadd.f32 %v825_v18, %v5118_v45  ;;  %v5146_v20 = vpop.f32.mrb[24].mxu1  ;;  %v966_v14 = vadd.f32 %v5121_v48, %v5160_v52 }
 0x2eb   : > { %v4187_v21 = vpop.eup %4186  ;;  %v3223_v23 = vmul.f32 -1.442695, %v824_v17  ;;  %v5148_v24 = vpop.f32.mrb[25].mxu1  ;;  %4198 = vpow2.f32 %v3238_v15 }
 0x2ec   : > { %v4189_v25 = vpop.eup %4188  ;;  %v1088_v26 = vadd.f32 1.0, %v4187_v21  ;;  %v3239_v27 = vmul.f32 -1.442695, %v826_v19  ;;  %v829_v28 = vpop.f32.mrb[26].mxu0 }
 0x2ed   : > { %4200 = vpow2.f32 %v3223_v23  ;;  %v830_v30 = vadd.f32 %v829_v28, %v5113_v44  ;;  %v831_v31 = vpop.f32.mrb[27].mxu0  ;;  %v1184_v36 = vadd.f32 1.0, %v4189_v25 }
 0x2ee   : > { %4202 = vrcp.f32 %v1088_v26  ;;  %v832_v32 = vadd.f32 %v831_v31, %v5118_v45  ;;  %v5153_v34 = vpop.f32.mrb[26].mxu1  ;;  %v971_v31 = vadd.f32 %v5130_v57, %v5160_v52 }
 0x2ef   : > { %v4191_v35 = vpop.eup %4190  ;;  %4204 = vrcp.f32 %v1183_v22  ;;  %v3224_v37 = vmul.f32 -1.442695, %v830_v30  ;;  %v5155_v46 = vpop.f32.mrb[27].mxu1 }
 0x2f0   : > { %v4193_v33 = vpop.eup %4192  ;;  %v1089_v47 = vadd.f32 1.0, %v4191_v35  ;;  %4206 = vpow2.f32 %v3239_v27  ;;  %v3240_v49 = vmul.f32 -1.442695, %v832_v32  ;;  %v835_v51 = vpop.f32.mrb[28].mxu0 }
 0x2f1   : > { %4208 = vpow2.f32 %v3224_v37  ;;  %v836_v53 = vadd.f32 %v835_v51, %v5113_v44  ;;  %v837_v8 = vpop.f32.mrb[29].mxu0  ;;  %v1185_v60 = vadd.f32 1.0, %v4193_v33 }
 0x2f2   : > { %4210 = vrcp.f32 %v1089_v47  ;;  %v838_v56 = vadd.f32 %v837_v8, %v5118_v45  ;;  %v5169_v58 = vpop.f32.mrb[28].mxu1 }
 0x2f3   : > { %v4195_v59 = vpop.eup %4194  ;;  %4212 = vrcp.f32 %v1184_v36  ;;  %v3225_v61 = vmul.f32 -1.442695, %v836_v53  ;;  %v5171_v42 = vpop.f32.mrb[29].mxu1 }
 0x2f4   : > { %v4197_v62 = vpop.eup %4196  ;;  %v1090_v0 = vadd.f32 1.0, %v4195_v59  ;;  %4214 = vpow2.f32 %v3240_v49  ;;  %v841_v2 = vpop.f32.mrb[30].mxu0  ;;  %v3241_v11 = vmul.f32 -1.442695, %v838_v56 }
 0x2f5   : > { %v1232_v4 = vmul.f32 %v4197_v62, %v5166_v54  ;;  %4216 = vpow2.f32 %v3225_v61  ;;  %v842_v5 = vadd.f32 %v841_v2, %v5113_v44  ;;  %v843_v6 = vpop.f32.mrb[31].mxu0  ;;  %v4199_v9 = vpop.eup %4198 }
 0x2f6   : > { %4218 = vrcp.f32 %v1090_v0  ;;  %v3645_v12 = vpop.f32.mrb[30].mxu1  ;;  %v844_v16 = vadd.f32 %v843_v6, %v5118_v45  ;;  %v1186_v48 = vadd.f32 1.0, %v4199_v9  ;;  %v976_v0 = vadd.f32 %v5127_v55, %v5160_v52 }
 0x2f7   : > { %v4201_v13 = vpop.eup %4200  ;;  %v1248_v15 = vadd.f32 %v1232_v4, %v961_v3  ;;  %4220 = vrcp.f32 %v1185_v60  ;;  %v1030_v17 = vpop.f32.mrb[31].mxu1  ;;  %v3226_v19 = vmul.f32 -1.442695, %v842_v5  ;;  %v5181_v22 = vadd.f32 %v3645_v12, %v5160_v52 }
 0x2f8   : > { %v4203_v50 = vpop.eup %4202  ;;  %v1091_v18 = vadd.f32 1.0, %v4201_v13  ;;  %v847_v21 = vpop.f32.mrb[32].mxu0  ;;  %v5184_v23 = vadd.f32 %v1030_v17, %v5160_v52  ;;  %v3242_v35 = vmul.f32 -1.442695, %v844_v16 }
 0x2f9   : > { %v4205_v25 = vpop.eup %4204  ;;  %4222 = vtanh.f32 %v1248_v15  ;;  %v1233_v26 = vmul.f32 %v4203_v50, %v5166_v54  ;;  %v848_v27 = vadd.f32 %v847_v21, %v5113_v44  ;;  %v849_v28 = vpop.f32.mrb[33].mxu0  ;;  %v981_v50 = vadd.f32 %v5136_v1, %v5160_v52 }
 0x2fa   : > { %v4207_v30 = vpop.eup %4206  ;;  %4224 = vpow2.f32 %v3241_v11  ;;  %v850_v36 = vadd.f32 %v849_v28, %v5118_v45 }
 0x2fb   : > { %v4209_v32 = vpop.eup %4208  ;;  %4226 = vrcp.f32 %v1091_v18  ;;  %v5191_v37 = vadd.f32 %v1233_v26, %v966_v14  ;;  %v3227_v49 = vmul.f32 -1.442695, %v848_v27  ;;  %v1187_v8 = vadd.f32 1.0, %v4207_v30 }
 0x2fc   : > { %v4211_v33 = vpop.eup %4210  ;;  %v1092_v47 = vadd.f32 1.0, %v4209_v32  ;;  %4228 = vpow2.f32 %v3226_v19  ;;  %v853_v51 = vpop.f32.mrb[34].mxu0  ;;  %v3243_v62 = vmul.f32 -1.442695, %v850_v36  ;;  %v1280_v14 = vsub.f32 1.0, %v4205_v25 }
 0x2fd   : > { %v5193_v53 = vpop.eup %4212  ;;  %4230 = vrcp.f32 %v1186_v48  ;;  %v1234_v56 = vmul.f32 %v4211_v33, %v5166_v54  ;;  %v855_v59 = vpop.f32.mrb[35].mxu0  ;;  %v854_v60 = vadd.f32 %v853_v51, %v5113_v44 }
 0x2fe   : > { %v4215_v57 = vpop.eup %4214  ;;  %4232 = vrcp.f32 %v1092_v47  ;;  %v856_v6 = vadd.f32 %v855_v59, %v5118_v45 }
 0x2ff   : > { %v4217_v61 = vpop.eup %4216  ;;  %4234 = vpow2.f32 %v3242_v35  ;;  %v1250_v2 = vadd.f32 %v1234_v56, %v971_v31  ;;  %v1188_v4 = vadd.f32 1.0, %v4215_v57  ;;  %v3228_v15 = vmul.f32 -1.442695, %v854_v60 }
 0x300   : > { %v4219_v3 = vpop.eup %4218  ;;  %v1093_v5 = vadd.f32 1.0, %v4217_v61  ;;  %4236 = vpow2.f32 %v3227_v49  ;;  %v859_v9 = vpop.f32.mrb[36].mxu0  ;;  %v3244_v19 = vmul.f32 -1.442695, %v856_v6  ;;  %v986_v31 = vadd.f32 %v5133_v63, %v5160_v52 }
 0x301   : > { %v5200_v11 = vpop.eup %4220  ;;  %4238 = vrcp.f32 %v1187_v8  ;;  %v1235_v12 = vmul.f32 %v4219_v3, %v5166_v54  ;;  %v861_v13 = vpop.f32.mrb[37].mxu0  ;;  %v860_v16 = vadd.f32 %v859_v9, %v5113_v44  ;;  %v991_v60 = vadd.f32 %v5142_v10, %v5160_v52 }
 0x302   : > { %4240 = vrcp.f32 %v1093_v5  ;;  %v862_v21 = vadd.f32 %v861_v13, %v5118_v45 }
 0x303   : > { %v4223_v55 = vpop.eup %4222  ;;  %4242 = vpow2.f32 %v3243_v62  ;;  %v1251_v17 = vadd.f32 %v1235_v12, %v976_v0  ;;  %v3229_v30 = vmul.f32 -1.442695, %v860_v16 }
 0x304   : > { %v4225_v18 = vpop.eup %4224  ;;  %4244 = vrcp.f32 %v1188_v4  ;;  %v865_v26 = vpop.f32.mrb[38].mxu0  ;;  %v1296_v48 = vmul.f32 %v4223_v55, %v1280_v14  ;;  %v3245_v49 = vmul.f32 -1.442695, %v862_v21  ;;  %v1282_v55 = vsub.f32 1.0, %v5200_v11 }
 0x305   : > { %v4227_v27 = vpop.eup %4226  ;;  %4246 = vtanh.f32 %v1251_v17  ;;  %v867_v25 = vpop.f32.mrb[39].mxu0  ;;  %v1189_v35 = vadd.f32 1.0, %v4225_v18  ;;  %v866_v33 = vadd.f32 %v865_v26, %v5113_v44  ;;  %v996_v11 = vadd.f32 %v5139_v7, %v5160_v52 }
 0x306   : > { %v4229_v28 = vpop.eup %4228  ;;  %4248 = vpow2.f32 %v3228_v15  ;;  %v1236_v32 = vmul.f32 %v4227_v27, %v5166_v54  ;;  %1443 = vmatmul.mubr.f32.vlgmr.msra.gmra.mrb[32].mxu1 %v1296_v48  ;;  %3678 = vmatprep.mubr.f32.mxu0 %v1296_v48  ;;  %v868_v13 = vadd.f32 %v867_v25, %v5118_v45 }
 0x307   : > { %v4231_v1 = vpop.eup %4230  ;;  %v1094_v36 = vadd.f32 1.0, %v4229_v28  ;;  %4250 = vtanh.f32 %v1250_v2  ;;  %1448 = vmatprep.mubr.f32.mxu1 %v4590_v41  ;;  %v3230_v2 = vmul.f32 -1.442695, %v866_v33 }
 0x308   : > { %v4233_v47 = vpop.eup %4232  ;;  %4252 = vpow2.f32 %v3244_v19  ;;  %v1252_v51 = vadd.f32 %v1236_v32, %v981_v50  ;;  %v871_v8 = vpop.f32.mrb[40].mxu0  ;;  %v1283_v9 = vsub.f32 1.0, %v4231_v1  ;;  %v3246_v28 = vmul.f32 -1.442695, %v868_v13 }
 0x309   : > { %v4235_v56 = vpop.eup %4234  ;;  %4254 = vrcp.f32 %v1094_v36  ;;  %v1237_v63 = vmul.f32 %v4233_v47, %v5166_v54  ;;  %v873_v59 = vpop.f32.mrb[41].mxu0  ;;  %v872_v5 = vadd.f32 %v871_v8, %v5113_v44  ;;  %v1001_v47 = vadd.f32 %v5148_v24, %v5160_v52 }
 0x30a   : > { %v4237_v57 = vpop.eup %4236  ;;  %4256 = vpow2.f32 %v3229_v30  ;;  %v1190_v4 = vadd.f32 1.0, %v4235_v56  ;;  %v874_v21 = vadd.f32 %v873_v59, %v5118_v45 }
 0x30b   : > { %v5215_v61 = vpop.eup %4238  ;;  %4258 = vrcp.f32 %v1189_v35  ;;  %v1095_v62 = vadd.f32 1.0, %v4237_v57  ;;  %v1253_v0 = vadd.f32 %v1237_v63, %v986_v31  ;;  %v3231_v19 = vmul.f32 -1.442695, %v872_v5 }
 0x30c   : > { %v4241_v3 = vpop.eup %4240  ;;  %4260 = vpow2.f32 %v3245_v49  ;;  %v877_v6 = vpop.f32.mrb[42].mxu0  ;;  %v3247_v8 = vmul.f32 -1.442695, %v874_v21 }
 0x30d   : > { %v4243_v12 = vpop.eup %4242  ;;  %4262 = vrcp.f32 %v1095_v62  ;;  %v1238_v14 = vmul.f32 %v4241_v3, %v5166_v54  ;;  %v879_v10 = vpop.f32.mrb[43].mxu0  ;;  %v878_v33 = vadd.f32 %v877_v6, %v5113_v44 }
 0x30e   : > { %v4245_v15 = vpop.eup %4244  ;;  %v1191_v16 = vadd.f32 1.0, %v4243_v12  ;;  %4264 = vtanh.f32 %v1253_v0  ;;  %v880_v24 = vadd.f32 %v879_v10, %v5118_v45  ;;  %v1284_v12 = vsub.f32 1.0, %v5215_v61 }
 0x30f   : > { %v4247_v17 = vpop.eup %4246  ;;  %4266 = vpow2.f32 %v3230_v2  ;;  %v1254_v50 = vadd.f32 %v1238_v14, %v991_v60  ;;  %v1285_v60 = vsub.f32 1.0, %v4245_v15  ;;  %v3232_v5 = vmul.f32 -1.442695, %v878_v33 }
 0x310   : > { %v4249_v18 = vpop.eup %4248  ;;  %4268 = vrcp.f32 %v1190_v4  ;;  %v883_v26 = vpop.f32.mrb[44].mxu0  ;;  %v5222_v48 = vmul.f32 %v4247_v17, %v1283_v9  ;;  %v3248_v15 = vmul.f32 -1.442695, %v880_v24 }
 0x311   : > { %v4251_v27 = vpop.eup %4250  ;;  %v1096_v25 = vadd.f32 1.0, %v4249_v18  ;;  %4270 = vtanh.f32 %v1252_v51  ;;  %v884_v30 = vadd.f32 %v883_v26, %v5113_v44  ;;  %v885_v31 = vpop.f32.mrb[45].mxu0  ;;  %v1006_v18 = vadd.f32 %v5146_v20, %v5160_v52 }
 0x312   : > { %v4253_v32 = vpop.eup %4252  ;;  %4272 = vrcp.f32 %v1191_v16  ;;  %v5227_v1 = vmul.f32 %v4251_v27, %v1282_v55  ;;  %v886_v35 = vadd.f32 %v885_v31, %v5118_v45  ;;  %v1281_v31 = vsub.f32 1.0, %v5193_v53 }
 0x313   : > { %v4255_v36 = vpop.eup %4254  ;;  %4274 = vrcp.f32 %v1096_v25  ;;  %v1192_v51 = vadd.f32 1.0, %v4253_v32  ;;  %v3233_v17 = vmul.f32 -1.442695, %v884_v30  ;;  %v1011_v20 = vadd.f32 %v5155_v46, %v5160_v52 }
 0x314   : > { %v4257_v49 = vpop.eup %4256  ;;  %4276 = vpow2.f32 %v3231_v19  ;;  %v1239_v56 = vmul.f32 %v4255_v36, %v5166_v54  ;;  %v889_v63 = vpop.f32.mrb[46].mxu0  ;;  %v3249_v26 = vmul.f32 -1.442695, %v886_v35 }
 0x315   : > { %v5234_v59 = vpop.eup %4258  ;;  %v1097_v7 = vadd.f32 1.0, %v4257_v49  ;;  %4278 = vpow2.f32 %v3246_v28  ;;  %v890_v57 = vadd.f32 %v889_v63, %v5113_v44  ;;  %v891_v62 = vpop.f32.mrb[47].mxu0  ;;  %v1016_v63 = vadd.f32 %v5153_v34, %v5160_v52 }
 0x316   : > { %v4261_v0 = vpop.eup %4260  ;;  %4280 = vtanh.f32 %v5191_v37  ;;  %v1255_v2 = vadd.f32 %v1239_v56, %v996_v11  ;;  %v892_v3 = vadd.f32 %v891_v62, %v5118_v45 }
 0x317   : > { %v4263_v4 = vpop.eup %4262  ;;  %4282 = vrcp.f32 %v1097_v7  ;;  %v1193_v45 = vadd.f32 1.0, %v4261_v0  ;;  %v3234_v11 = vmul.f32 -1.442695, %v890_v57 }
 0x318   : > { %v4265_v6 = vpop.eup %4264  ;;  %4284 = vrcp.f32 %v1192_v51  ;;  %v1240_v9 = vmul.f32 %v4263_v4, %v5166_v54  ;;  %v3250_v7 = vmul.f32 -1.442695, %v892_v3 }
 0x319   : > { %v4267_v44 = vpop.eup %4266  ;;  %4286 = vpow2.f32 %v3247_v8  ;;  %v5242_v13 = vmul.f32 %v4265_v6, %v1285_v60  ;;  %v1286_v8 = vsub.f32 1.0, %v5234_v59 }
 0x31a   : > { %v4269_v14 = vpop.eup %4268  ;;  %v1098_v37 = vadd.f32 1.0, %v4267_v44  ;;  %4288 = vtanh.f32 %v1255_v2  ;;  %v1256_v10 = vadd.f32 %v1240_v9, %v1001_v47 }
 0x31b   : > { %v4271_v16 = vpop.eup %4270  ;;  %4290 = vpow2.f32 %v3232_v5  ;;  %v1287_v33 = vsub.f32 1.0, %v4269_v14 }
 0x31c   : > { %v5244_v55 = vpop.eup %4272  ;;  %4292 = vrcp.f32 %v1098_v37  ;;  %v5248_v61 = vmul.f32 %v4271_v16, %v1284_v12 }
 0x31d   : > { %v4275_v19 = vpop.eup %4274  ;;  %4294 = vtanh.f32 %v1254_v50 }
 0x31e   : > { %v4277_v21 = vpop.eup %4276  ;;  %4296 = vpow2.f32 %v3248_v15  ;;  %v1241_v27 = vmul.f32 %v4275_v19, %v5166_v54  ;;  %v1288_v15 = vsub.f32 1.0, %v5244_v55 }
 0x31f   : > { %v4279_v25 = vpop.eup %4278  ;;  %4298 = vrcp.f32 %v1193_v45  ;;  %v1099_v28 = vadd.f32 1.0, %v4277_v21 }
 0x320   : > { %v4281_v32 = vpop.eup %4280  ;;  %4300 = vpow2.f32 %v3233_v17  ;;  %v1257_v30 = vadd.f32 %v1241_v27, %v1006_v18  ;;  %v1194_v35 = vadd.f32 1.0, %v4279_v25 }
 0x321   : > { %v4283_v36 = vpop.eup %4282  ;;  %4302 = vrcp.f32 %v1099_v28  ;;  %v1297_v50 = vmul.f32 %v4281_v32, %v1281_v31 }
 0x322   : > { %v4285_v47 = vpop.eup %4284  ;;  %4304 = vpow2.f32 %v3249_v26  ;;  %v1242_v49 = vmul.f32 %v4283_v36, %v5166_v54  ;;  %v1026_v26 = vadd.f32 %v5169_v58, %v5160_v52 }
 0x323   : > { %v4287_v51 = vpop.eup %4286  ;;  %1449 = vmatmul.mubr.f32.gmra.mrb[34].mxu1 %v1297_v50  ;;  %3679 = vmatmul.mubr.f32.vlgmr.msra.gmra.mrb[48].mxu0 %v1297_v50  ;;  %4306 = vtanh.f32 %v1257_v30  ;;  %v1289_v6 = vsub.f32 1.0, %v4285_v47 }
 0x324   : > { %v4289_v53 = vpop.eup %4288  ;;  %1454 = vmatprep.mubr.f32.mxu1 %v4590_v41  ;;  %4308 = vpow2.f32 %v3234_v11  ;;  %3681 = vmatprep.mubr.f32.mxu0 %v5227_v1  ;;  %v1258_v46 = vadd.f32 %v1242_v49, %v1011_v20  ;;  %v1195_v62 = vadd.f32 1.0, %v4287_v51 }
 0x325   : > { %v4291_v56 = vpop.eup %4290  ;;  %4310 = vtanh.f32 %v1256_v10  ;;  %v5260_v57 = vmul.f32 %v4289_v53, %v1287_v33 }
 0x326   : > { %v4293_v60 = vpop.eup %4292  ;;  %4312 = vrcp.f32 %v1194_v35  ;;  %v1100_v0 = vadd.f32 1.0, %v4291_v56 }
 0x327   : > { %v4295_v2 = vpop.eup %4294  ;;  %1455 = vmatmul.mubr.f32.gmra.mrb[36].mxu1 %v5227_v1  ;;  %3682 = vmatmul.mubr.f32.gmra.mrb[50].mxu0 %v5222_v48  ;;  %v1243_v24 = vmul.f32 %v4293_v60, %v5166_v54  ;;  %4314 = vtanh.f32 %v1258_v46  ;;  %v1021_v1 = vadd.f32 %v5171_v42, %v5160_v52 }
 0x328   : > { %v4297_v59 = vpop.eup %4296  ;;  %4316 = vrcp.f32 %v1100_v0  ;;  %1460 = vmatprep.mubr.f32.mxu1 %v4590_v41  ;;  %v1302_v34 = vmul.f32 %v4295_v2, %v1286_v8  ;;  %3684 = vmatprep.mubr.f32.mxu0 %v5248_v61  ;;  %v1957_v2 = vld [vmem:[%s6235_s1 + $0x40] sm:$0xff] }
 0x329   : > { %v4299_v3 = vpop.eup %4298  ;;  %v1259_v4 = vadd.f32 %v1243_v24, %v1016_v63  ;;  %4318 = vpow2.f32 %v3250_v7  ;;  %v1196_v12 = vadd.f32 1.0, %v4297_v59  ;;  %v1958_v24 = vld [vmem:[%s6235_s1 + $0x90] sm:$0xff] }
 0x32a   : > { %v4301_v5 = vpop.eup %4300  ;;  %4320 = vrcp.f32 %v1195_v62  ;;  %v1290_v17 = vsub.f32 1.0, %v4299_v3  ;;  %v4006_v59 = vpack.c.bf16 %v1958_v24, %v1957_v2 }
 0x32b   : > { %v4303_v9 = vpop.eup %4302  ;;  %v1101_v44 = vadd.f32 1.0, %v4301_v5  ;;  %1461 = vmatmul.mubr.f32.gmra.mrb[38].mxu1 %v5222_v48  ;;  %3685 = vmatmul.mubr.f32.gmra.mrb[52].mxu0 %v5242_v13  ;;  %4322 = vtanh.f32 %v1259_v4  ;;  %v1961_v4 = vld [vmem:[%s6235_s1 + $0x180] sm:$0xff]  ;;  %v1962_v5 = vld [vmem:[%s6235_s1 + $0x1d0] sm:$0xff] }
 0x32c   : > { %v4305_v14 = vpop.eup %4304  ;;  %1466 = vmatprep.mubr.f32.mxu1 %v4590_v41  ;;  %v1244_v37 = vmul.f32 %v4303_v9, %v5166_v54  ;;  %3687 = vmatprep.mubr.f32.mxu0 %v1302_v34  ;;  %v1964_v9 = vld [vmem:[%s6235_s1 + $0x270] sm:$0xff] }
 0x32d   : > { %v4307_v10 = vpop.eup %4306  ;;  %4324 = vrcp.f32 %v1101_v44  ;;  %v1197_v25 = vadd.f32 1.0, %v4305_v14  ;;  %4007 = vmatprep.subr.bf16.mxu0 %v4006_v59  ;;  %v1965_v44 = vld [vmem:[%s6235_s1 + $0x2c0] sm:$0xff]  ;;  %v1966_v14 = vld [vmem:[%s6235_s1 + $0x310] sm:$0xff] }
 0x32e   : > { %v4309_v42 = vpop.eup %4308  ;;  %v1260_v16 = vadd.f32 %v1244_v37, %v1021_v1  ;;  %v1305_v45 = vmul.f32 %v4307_v10, %v1289_v6  ;;  %4326 = vrcp.f32 %v1196_v12  ;;  %4009 = vmatpush3.bf16.msra.mxu0 %v4006_v59  ;;  %v4014_v1 = vpack.c.bf16 %v1962_v5, %v1961_v4  ;;  %v1963_v6 = vld [vmem:[%s6235_s1 + $0x220] sm:$0xff]  ;;  %v1968_v10 = vld [vmem:[%s6235_s1 + $0x3b0] sm:$0xff] }
 0x32f   : > { %v4311_v18 = vpop.eup %4310  ;;  %v1102_v48 = vadd.f32 1.0, %v4309_v42  ;;  %1467 = vmatmul.mubr.f32.gmra.mrb[40].mxu1 %v5248_v61  ;;  %3688 = vmatmul.mubr.f32.gmra.mrb[54].mxu0 %v5260_v57  ;;  %v4018_v12 = vpack.c.bf16 %v1964_v9, %v1963_v6  ;;  %v4022_v37 = vpack.c.bf16 %v1966_v14, %v1965_v44 }
 0x330   : > { %v4313_v19 = vpop.eup %4312  ;;  %1472 = vmatprep.mubr.f32.mxu1 %v4590_v41  ;;  %4328 = vtanh.f32 %v1260_v16  ;;  %v1304_v21 = vmul.f32 %v4311_v18, %v1288_v15  ;;  %v1967_v15 = vld [vmem:[%s6235_s1 + $0x360] sm:$0xff] }
 0x331   : > { %v4315_v55 = vpop.eup %4314  ;;  %4330 = vrcp.f32 %v1102_v48  ;;  %v1291_v32 = vsub.f32 1.0, %v4313_v19  ;;  %v4026_v42 = vpack.c.bf16 %v1968_v10, %v1967_v15  ;;  %v1969_v16 = vld [vmem:[%s6235_s1 + $0x400] sm:$0xff]  ;;  %v1972_v48 = vld [vmem:[%s6235_s1 + $0x4f0] sm:$0xff]  ;;  %v2149_v10 = vld [vmem:[%s6235_s1 + $0x4a8] sm:$0xff] }
 0x332   : > { %v4317_v27 = vpop.eup %4316  ;;  %v1306_v28 = vmul.f32 %v4315_v55, %v1290_v17  ;;  %3690 = vmatprep.mubr.f32.mxu0 %v1304_v21  ;;  %4332 = vrcp.f32 %v1197_v25  ;;  %v1971_v18 = vld [vmem:[%s6235_s1 + $0x4a0] sm:$0xff] }
 0x333   : > { %v4319_v31 = vpop.eup %4318  ;;  %1473 = vmatmul.mubr.f32.gmra.mrb[42].mxu1 %v5242_v13  ;;  %v1245_v61 = vmul.f32 %v4317_v27, %v5166_v54  ;;  %3691 = vmatmul.mubr.f32.gmra.mrb[56].mxu0 %v1305_v45  ;;  %v4034_v19 = vpack.c.bf16 %v1972_v48, %v1971_v18 }
 0x334   : > { %v4321_v30 = vpop.eup %4320  ;;  %1478 = vmatprep.mubr.f32.mxu1 %v4590_v41  ;;  %3693 = vmatprep.mubr.f32.mxu0 %v1306_v28  ;;  %v1198_v36 = vadd.f32 1.0, %v4319_v31 }
 0x335   : > { %v1261_v11 = vadd.f32 %v1245_v61, %v1026_v26  ;;  %v4323_v20 = vpop.eup %4322  ;;  %v1292_v50 = vsub.f32 1.0, %v4321_v30  ;;  %v2135_v30 = vld [vmem:[%s6235_s1 + $0x48] sm:$0xff] }
 0x336   : > { %v1307_v58 = vmul.f32 %v4323_v20, %v1291_v32 }
 0x337   : > { %v4325_v52 = vpop.eup %4324  ;;  %1479 = vmatmul.mubr.f32.gmra.mrb[44].mxu1 %v1302_v34  ;;  %4334 = vtanh.f32 %v1261_v11  ;;  %v1959_v34 = vld [vmem:[%s6235_s1 + $0xe0] sm:$0xff]  ;;  %v2137_v11 = vld [vmem:[%s6235_s1 + $0xe8] sm:$0xff] }
 0x338   : > { %1484 = vmatprep.mubr.f32.mxu1 %v4590_v41  ;;  %v1246_v13 = vmul.f32 %v4325_v52, %v5166_v54  ;;  %v4327_v33 = vpop.eup %4326  ;;  %3694 = vmatmul.mubr.f32.gmra.mrb[58].mxu0 %v1307_v58  ;;  %4336 = vrcp.f32 %v1198_v36  ;;  %v2138_v36 = vld [vmem:[%s6235_s1 + $0x138] sm:$0xff] }
 0x339   : > { %v1293_v8 = vsub.f32 1.0, %v4327_v33 }
 0x33a   : > { %v4329_v47 = vpop.eup %4328  ;;  %v1262_v35 = vadd.f32 %v1246_v13, %v5184_v23  ;;  %v2140_v13 = vld [vmem:[%s6235_s1 + $0x1d8] sm:$0xff] }
 0x33b   : > { %v4331_v49 = vpop.eup %4330  ;;  %1485 = vmatmul.mubr.f32.gmra.mrb[46].mxu1 %v5260_v57  ;;  %v1308_v51 = vmul.f32 %v4329_v47, %v1292_v50  ;;  %v2139_v50 = vld [vmem:[%s6235_s1 + $0x188] sm:$0xff] }
 0x33c   : > { %1490 = vmatprep.mubr.f32.mxu1 %v4590_v41  ;;  %v1247_v53 = vmul.f32 %v4331_v49, %v5166_v54  ;;  %4338 = vtanh.f32 %v1262_v35  ;;  %v4333_v56 = vpop.eup %4332  ;;  %v4046_v33 = vpack.c.bf16 %v2140_v13, %v2139_v50  ;;  %v2141_v47 = vld [vmem:[%s6235_s1 + $0x228] sm:$0xff]  ;;  %v2142_v35 = vld [vmem:[%s6235_s1 + $0x278] sm:$0xff] }
 0x33d   : > { %3696 = vmatprep.mubr.f32.mxu0 %v1308_v51  ;;  %v1294_v7 = vsub.f32 1.0, %v4333_v56  ;;  %v4050_v49 = vpack.c.bf16 %v2142_v35, %v2141_v47 }
 0x33e   : > { %v1263_v46 = vadd.f32 %v1247_v53, %v5181_v22  ;;  %v2144_v53 = vld [vmem:[%s6235_s1 + $0x318] sm:$0xff] }
 0x33f   : > { %1491 = vmatmul.mubr.f32.gmra.mrb[48].mxu1 %v1304_v21  ;;  %v3251_v21 = vld [vmem:[%s6236_s2 + $0x28] ss:$8 sm:$0x7] }
 0x340   : > { %1496 = vmatprep.mubr.f32.mxu1 %v4590_v41  ;;  %4340 = vtanh.f32 %v1263_v46  ;;  %v5349_v55 = vrot.slane %v3251_v21, %v720_v40  ;;  %v5354_v31 = vrot.slane %v3251_v21, %v724_v43  ;;  %v2136_v40 = vld [vmem:[%s6235_s1 + $0x98] sm:$0xff]  ;;  %v5394_v56 = vrot.slane %v3251_v21, %v728_v29 }
 0x341   : > { %v4335_v63 = vpop.eup %4334  ;;  %v4038_v43 = vpack.c.bf16 %v2136_v40, %v2135_v30 }
 0x342   : > { %v1309_v23 = vmul.f32 %v4335_v63, %v1293_v8  ;;  %v4337_v57 = vpop.eup %4336  ;;  %v5390_v8 = vld [vmem:[%s6236_s2 + $0x39] ss:$0 sm:$0xff] }
 0x343   : > { %1497 = vmatmul.mubr.f32.gmra.mrb[50].mxu1 %v1305_v45  ;;  %v1295_v62 = vsub.f32 1.0, %v4337_v57  ;;  %v1970_v45 = vld [vmem:[%s6235_s1 + $0x450] sm:$0xff]  ;;  %4039 = vmatprep.subr.bf16.mxu1 %v4038_v43  ;;  %v2145_v57 = vld [vmem:[%s6235_s1 + $0x368] sm:$0xff] }
 0x344   : > { %1502 = vmatprep.mubr.f32.mxu1 %v4590_v41  ;;  %3697 = vmatmul.mubr.f32.gmra.mrb[60].mxu0 %v1309_v23  ;;  %v4030_v17 = vpack.c.bf16 %v1970_v45, %v1969_v16 }
 0x345   : > { %4041 = vmatpush3.bf16.msra.mxu1 %v4038_v43 }
 0x346   : > { %v4339_v60 = vpop.eup %4338 }
 0x347   : > { %1503 = vmatmul.mubr.f32.gmra.mrb[52].mxu1 %v1306_v28  ;;  %v1310_v54 = vmul.f32 %v4339_v60, %v1294_v7  ;;  %v2146_v60 = vld [vmem:[%s6235_s1 + $0x3b8] sm:$0xff] }
 0x348   : > { %1508 = vmatprep.mubr.f32.mxu1 %v4590_v41  ;;  %v4058_v59 = vpack.c.bf16 %v2146_v60, %v2145_v57 }
 0x349   : > { %3699 = vmatprep.mubr.f32.mxu0 %v1310_v54 }
 0x34a   : > { %v4341_v22 = vpop.eup %4340 }
 0x34b   : > { %1509 = vmatmul.mubr.f32.gmra.mrb[54].mxu1 %v1307_v58  ;;  %v1311_v0 = vmul.f32 %v4341_v22, %v1295_v62  ;;  %v4042_v58 = vpack.c.bf16 %v2138_v36, %v2137_v11 }
 0x34c   : > { %1514 = vmatprep.mubr.f32.mxu1 %v4590_v41 }
 0x34d   : > { %3700 = vmatmul.mubr.f32.gmra.mrb[62].mxu0 %v1311_v0  ;;  %4043 = vmatprep.subr.bf16.mxu1 %v4042_v58 }
 0x34e   : > { %4045 = vmatpush3.bf16.msra.mxu1 %v4042_v58 }
 0x34f   : > { %1515 = vmatmul.mubr.f32.gmra.mrb[56].mxu1 %v1308_v51  ;;  %4047 = vmatprep.subr.bf16.mxu1 %v4046_v33  ;;  %v2143_v51 = vld [vmem:[%s6235_s1 + $0x2c8] sm:$0xff] }
 0x350   : > { %1520 = vmatprep.mubr.f32.mxu1 %v4590_v41  ;;  %v4054_v63 = vpack.c.bf16 %v2144_v53, %v2143_v51 }
 0x352   : > { %4049 = vmatpush3.bf16.msra.mxu1 %v4046_v33 }
 0x353   : > { %1521 = vmatmul.mubr.f32.gmra.mrb[58].mxu1 %v1309_v23  ;;  %4051 = vmatprep.subr.bf16.mxu1 %v4050_v49 }
 0x354   : > { %1526 = vmatprep.mubr.f32.mxu1 %v4590_v41 }
 0x356   : > { %4053 = vmatpush3.bf16.msra.mxu1 %v4050_v49 }
 0x357   : > { %1527 = vmatmul.mubr.f32.gmra.mrb[60].mxu1 %v1310_v54  ;;  %4055 = vmatprep.subr.bf16.mxu1 %v4054_v63 }
 0x358   : > { %1532 = vmatprep.mubr.f32.mxu1 %v4590_v41  ;;  %v1960_v41 = vld [vmem:[%s6235_s1 + $0x130] sm:$0xff] }
 0x359   : > { %v4010_v3 = vpack.c.bf16 %v1960_v41, %v1959_v34  ;;  %v2147_v41 = vld [vmem:[%s6235_s1 + $0x408] sm:$0xff] }
 0x35a   : > { %4057 = vmatpush3.bf16.msra.mxu1 %v4054_v63 }
 0x35b   : > { %1533 = vmatmul.mubr.f32.gmra.mrb[62].mxu1 %v1311_v0  ;;  %4011 = vmatprep.subr.bf16.mxu0 %v4010_v3 }
 0x35c   : > { %4013 = vmatpush3.bf16.msra.mxu0 %v4010_v3  ;;  %v2148_v3 = vld [vmem:[%s6235_s1 + $0x458] sm:$0xff]  ;;  %4059 = vmatprep.subr.bf16.mxu1 %v4058_v59 }
 0x35d   : > { %4015 = vmatprep.subr.bf16.mxu0 %v4014_v1 }
 0x35e   : > { %4061 = vmatpush3.bf16.msra.mxu1 %v4058_v59 }
 0x360   : > { %4017 = vmatpush3.bf16.msra.mxu0 %v4014_v1 }
 0x361   : > { %4019 = vmatprep.subr.bf16.mxu0 %v4018_v12 }
 0x364   : > { %4021 = vmatpush3.bf16.msra.mxu0 %v4018_v12 }
 0x365   : > { %4023 = vmatprep.subr.bf16.mxu0 %v4022_v37 }
 0x368   : > { %4025 = vmatpush3.bf16.msra.mxu0 %v4022_v37  ;;  %v4062_v37 = vpack.c.bf16 %v2148_v3, %v2147_v41 }
 0x369   : > { %4027 = vmatprep.subr.bf16.mxu0 %v4026_v42 }
 0x36a   : > { %4063 = vmatprep.subr.bf16.mxu1 %v4062_v37 }
 0x36b   : > { %4065 = vmatpush3.bf16.msra.mxu1 %v4062_v37 }
 0x36c   : > { %4029 = vmatpush3.bf16.msra.mxu0 %v4026_v42  ;;  %v2150_v42 = vld [vmem:[%s6235_s1 + $0x4f8] sm:$0xff] }
 0x36d   : > { %4031 = vmatprep.subr.bf16.mxu0 %v4030_v17 }
 0x370   : > { %4033 = vmatpush3.bf16.msra.mxu0 %v4030_v17 }
 0x371   : > { %4035 = vmatprep.subr.bf16.mxu0 %v4034_v19 }
 0x374   : > { %4037 = vmatpush3.bf16.msra.mxu0 %v4034_v19 }
 0x3d9   : > { %v1444_v26 = vpop.f32.mrb[32].mxu1 }
 0x3da   : > { %v1445_v27 = vadd.f32 %v1444_v26, %v5349_v55  ;;  %v1446_v25 = vpop.f32.mrb[33].mxu1  ;;  %v4066_v26 = vpack.c.bf16 %v2150_v42, %v2149_v10 }
 0x3db   : > { %v1447_v61 = vadd.f32 %v1446_v25, %v5354_v31 }
 0x3dc   : > { %v3252_v28 = vmul.f32 -1.442695, %v1445_v27  ;;  %4067 = vmatprep.subr.bf16.mxu1 %v4066_v26 }
 0x3dd   : > { %v3268_v32 = vmul.f32 -1.442695, %v1447_v61  ;;  %4069 = vmatpush3.bf16.msra.mxu1 %v4066_v26 }
 0x3de   : > { %4342 = vpow2.f32 %v3252_v28 }
 0x3df   : > { %4344 = vpow2.f32 %v3268_v32 }
 0x3e8   : > { %v4343_v20 = vpop.eup %4342 }
 0x3e9   : > { %v1732_v52 = vadd.f32 1.0, %v4343_v20  ;;  %v4345_v46 = vpop.eup %4344 }
 0x3ea   : > { %v1828_v7 = vadd.f32 1.0, %v4345_v46 }
 0x3eb   : > { %4346 = vrcp.f32 %v1732_v52 }
 0x3ec   : > { %4348 = vrcp.f32 %v1828_v7 }
 0x3f5   : > { %v4347_v23 = vpop.eup %4346 }
 0x3f6   : > { %v1450_v54 = vpop.f32.mrb[34].mxu1  ;;  %v5402_v62 = vpop.f32.mrb[48].mxu0  ;;  %v1877_v22 = vmul.f32 %v4347_v23, %v5390_v8 }
 0x3f7   : > { %v1451_v39 = vadd.f32 %v1450_v54, %v5349_v55  ;;  %v1452_v29 = vpop.f32.mrb[35].mxu1  ;;  %v1605_v0 = vpop.f32.mrb[49].mxu0 }
 0x3f8   : > { %v1453_v2 = vadd.f32 %v1452_v29, %v5354_v31  ;;  %v1606_v24 = vadd.f32 %v1605_v0, %v5394_v56  ;;  %v4349_v32 = vpop.eup %4348 }
 0x3f9   : > { %v3253_v34 = vmul.f32 -1.442695, %v1451_v39  ;;  %v1925_v13 = vsub.f32 1.0, %v4349_v32 }
 0x3fa   : > { %v1893_v4 = vadd.f32 %v1877_v22, %v1606_v24  ;;  %v1456_v5 = vpop.f32.mrb[36].mxu1  ;;  %v5414_v1 = vpop.f32.mrb[50].mxu0  ;;  %v3269_v44 = vmul.f32 -1.442695, %v1453_v2 }
 0x3fb   : > { %4350 = vpow2.f32 %v3253_v34  ;;  %v1457_v6 = vadd.f32 %v1456_v5, %v5349_v55  ;;  %v1458_v9 = vpop.f32.mrb[37].mxu1  ;;  %v5417_v12 = vpop.f32.mrb[51].mxu0 }
 0x3fc   : > { %v1459_v14 = vadd.f32 %v1458_v9, %v5354_v31  ;;  %4352 = vtanh.f32 %v1893_v4 }
 0x3fd   : > { %v3254_v15 = vmul.f32 -1.442695, %v1457_v6 }
 0x3fe   : > { %v3270_v16 = vmul.f32 -1.442695, %v1459_v14  ;;  %v1462_v45 = vpop.f32.mrb[38].mxu1  ;;  %v5426_v17 = vpop.f32.mrb[52].mxu0 }
 0x3ff   : > { %4354 = vpow2.f32 %v3254_v15  ;;  %v1463_v18 = vadd.f32 %v1462_v45, %v5349_v55  ;;  %v1464_v48 = vpop.f32.mrb[39].mxu1  ;;  %v5429_v19 = vpop.f32.mrb[53].mxu0 }
 0x400   : > { %4356 = vpow2.f32 %v3269_v44  ;;  %v1465_v21 = vadd.f32 %v1464_v48, %v5354_v31 }
 0x401   : > { %4358 = vpow2.f32 %v3270_v16  ;;  %v3255_v27 = vmul.f32 -1.442695, %v1463_v18 }
 0x402   : > { %v3271_v25 = vmul.f32 -1.442695, %v1465_v21  ;;  %v1468_v28 = vpop.f32.mrb[40].mxu1  ;;  %v5432_v61 = vpop.f32.mrb[54].mxu0 }
 0x403   : > { %4360 = vpow2.f32 %v3255_v27  ;;  %v1469_v30 = vadd.f32 %v1468_v28, %v5349_v55  ;;  %v1470_v40 = vpop.f32.mrb[41].mxu1  ;;  %v5435_v11 = vpop.f32.mrb[55].mxu0 }
 0x404   : > { %v1471_v20 = vadd.f32 %v1470_v40, %v5354_v31  ;;  %4362 = vpow2.f32 %v3271_v25  ;;  %v1611_v25 = vadd.f32 %v5402_v62, %v5394_v56  ;;  %v1616_v62 = vadd.f32 %v5417_v12, %v5394_v56 }
 0x405   : > { %v4351_v43 = vpop.eup %4350  ;;  %v3256_v36 = vmul.f32 -1.442695, %v1469_v30 }
 0x406   : > { %v1733_v52 = vadd.f32 1.0, %v4351_v43  ;;  %v3272_v58 = vmul.f32 -1.442695, %v1471_v20  ;;  %v1474_v50 = vpop.f32.mrb[42].mxu1  ;;  %v3692_v33 = vpop.f32.mrb[56].mxu0 }
 0x407   : > { %v4353_v47 = vpop.eup %4352  ;;  %4364 = vpow2.f32 %v3256_v36  ;;  %v1475_v35 = vadd.f32 %v1474_v50, %v5349_v55  ;;  %v1476_v49 = vpop.f32.mrb[43].mxu1  ;;  %v5440_v51 = vadd.f32 %v3692_v33, %v5394_v56 }
 0x408   : > { %v1645_v53 = vpop.f32.mrb[57].mxu0  ;;  %4366 = vrcp.f32 %v1733_v52  ;;  %v1477_v46 = vadd.f32 %v1476_v49, %v5354_v31  ;;  %v1941_v63 = vmul.f32 %v4353_v47, %v1925_v13 }
 0x409   : > { %v5444_v23 = vadd.f32 %v1645_v53, %v5394_v56  ;;  %v4355_v7 = vpop.eup %4354  ;;  %v3257_v57 = vmul.f32 -1.442695, %v1475_v35  ;;  %4368 = vpow2.f32 %v3272_v58 }
 0x40a   : > { %v4357_v60 = vpop.eup %4356  ;;  %v1734_v54 = vadd.f32 1.0, %v4355_v7  ;;  %v3273_v22 = vmul.f32 -1.442695, %v1477_v46  ;;  %v1480_v39 = vpop.f32.mrb[44].mxu1  ;;  %3734 = vmatprep.mubr.f32.mxu0 %v1941_v63 }
 0x40b   : > { %v4359_v29 = vpop.eup %4358  ;;  %4370 = vpow2.f32 %v3257_v57  ;;  %v1481_v0 = vadd.f32 %v1480_v39, %v5349_v55  ;;  %v1482_v2 = vpop.f32.mrb[45].mxu1  ;;  %v1829_v34 = vadd.f32 1.0, %v4357_v60 }
 0x40c   : > { %4372 = vrcp.f32 %v1734_v54  ;;  %v3695_v24 = vpop.f32.mrb[58].mxu0  ;;  %v1830_v5 = vadd.f32 1.0, %v4359_v29  ;;  %v1483_v10 = vadd.f32 %v1482_v2, %v5354_v31  ;;  %v1621_v2 = vadd.f32 %v5414_v1, %v5394_v56 }
 0x40d   : > { %v4361_v59 = vpop.eup %4360  ;;  %v3258_v41 = vmul.f32 -1.442695, %v1481_v0  ;;  %v5448_v3 = vadd.f32 %v3695_v24, %v5394_v56  ;;  %v1655_v4 = vpop.f32.mrb[59].mxu0  ;;  %4374 = vpow2.f32 %v3273_v22  ;;  %v1626_v1 = vadd.f32 %v5429_v19, %v5394_v56 }
 0x40e   : > { %v1735_v6 = vadd.f32 1.0, %v4361_v59  ;;  %v1486_v9 = vpop.f32.mrb[46].mxu1  ;;  %v5451_v44 = vadd.f32 %v1655_v4, %v5394_v56  ;;  %v4363_v14 = vpop.eup %4362  ;;  %v3274_v20 = vmul.f32 -1.442695, %v1483_v10 }
 0x40f   : > { %4376 = vpow2.f32 %v3258_v41  ;;  %v1487_v37 = vadd.f32 %v1486_v9, %v5349_v55  ;;  %v1488_v15 = vpop.f32.mrb[47].mxu1  ;;  %v1831_v48 = vadd.f32 1.0, %v4363_v14 }
 0x410   : > { %4378 = vrcp.f32 %v1735_v6  ;;  %v1489_v42 = vadd.f32 %v1488_v15, %v5354_v31 }
 0x411   : > { %v4365_v16 = vpop.eup %4364  ;;  %4380 = vrcp.f32 %v1829_v34  ;;  %v3259_v45 = vmul.f32 -1.442695, %v1487_v37 }
 0x412   : > { %v4367_v18 = vpop.eup %4366  ;;  %4382 = vrcp.f32 %v1830_v5  ;;  %v1736_v21 = vadd.f32 1.0, %v4365_v16  ;;  %v3275_v26 = vmul.f32 -1.442695, %v1489_v42  ;;  %v1492_v27 = vpop.f32.mrb[48].mxu1 }
 0x413   : > { %v1878_v28 = vmul.f32 %v4367_v18, %v5390_v8  ;;  %4384 = vpow2.f32 %v3259_v45  ;;  %v1493_v32 = vadd.f32 %v1492_v27, %v5349_v55  ;;  %v1494_v30 = vpop.f32.mrb[49].mxu1  ;;  %v4369_v40 = vpop.eup %4368 }
 0x414   : > { %4386 = vrcp.f32 %v1736_v21  ;;  %v1832_v53 = vadd.f32 1.0, %v4369_v40  ;;  %v1495_v46 = vadd.f32 %v1494_v30, %v5354_v31 }
 0x415   : > { %v4371_v43 = vpop.eup %4370  ;;  %v1894_v36 = vadd.f32 %v1878_v28, %v1611_v25  ;;  %4388 = vpow2.f32 %v3275_v26  ;;  %v3260_v50 = vmul.f32 -1.442695, %v1493_v32 }
 0x416   : > { %v4373_v52 = vpop.eup %4372  ;;  %4390 = vrcp.f32 %v1831_v48  ;;  %v1737_v58 = vadd.f32 1.0, %v4371_v43  ;;  %v1498_v13 = vpop.f32.mrb[50].mxu1  ;;  %v3276_v4 = vmul.f32 -1.442695, %v1495_v46 }
 0x417   : > { %4392 = vtanh.f32 %v1894_v36  ;;  %v1879_v33 = vmul.f32 %v4373_v52, %v5390_v8  ;;  %v1500_v47 = vpop.f32.mrb[51].mxu1  ;;  %v3698_v35 = vpop.f32.mrb[60].mxu0  ;;  %v1499_v59 = vadd.f32 %v1498_v13, %v5349_v55 }
 0x418   : > { %v4375_v49 = vpop.eup %4374  ;;  %4394 = vpow2.f32 %v3274_v20  ;;  %v5465_v63 = vadd.f32 %v3698_v35, %v5394_v56  ;;  %v1665_v7 = vpop.f32.mrb[61].mxu0  ;;  %v1501_v5 = vadd.f32 %v1500_v47, %v5354_v31  ;;  %v1636_v35 = vadd.f32 %v5435_v11, %v5394_v56 }
 0x419   : > { %v4377_v57 = vpop.eup %4376  ;;  %v1895_v60 = vadd.f32 %v1879_v33, %v1616_v62  ;;  %4396 = vrcp.f32 %v1737_v58  ;;  %v1833_v22 = vadd.f32 1.0, %v4375_v49  ;;  %v5468_v29 = vadd.f32 %v1665_v7, %v5394_v56 }
 0x41a   : > { %v4379_v54 = vpop.eup %4378  ;;  %v1738_v39 = vadd.f32 1.0, %v4377_v57  ;;  %4398 = vpow2.f32 %v3260_v50  ;;  %v1504_v12 = vpop.f32.mrb[52].mxu1  ;;  %v3261_v18 = vmul.f32 -1.442695, %v1499_v59  ;;  %v3277_v27 = vmul.f32 -1.442695, %v1501_v5 }
 0x41b   : > { %v4381_v0 = vpop.eup %4380  ;;  %v1880_v24 = vmul.f32 %v4379_v54, %v5390_v8  ;;  %4400 = vtanh.f32 %v1895_v60  ;;  %v1506_v34 = vpop.f32.mrb[53].mxu1  ;;  %v1505_v15 = vadd.f32 %v1504_v12, %v5349_v55  ;;  %v1631_v62 = vadd.f32 %v5426_v17, %v5394_v56 }
 0x41c   : > { %v4383_v41 = vpop.eup %4382  ;;  %4402 = vrcp.f32 %v1832_v53  ;;  %v1926_v16 = vsub.f32 1.0, %v4381_v0  ;;  %v1507_v25 = vadd.f32 %v1506_v34, %v5354_v31 }
 0x41d   : > { %v4385_v6 = vpop.eup %4384  ;;  %v1896_v9 = vadd.f32 %v1880_v24, %v1621_v2  ;;  %4404 = vrcp.f32 %v1738_v39  ;;  %v3262_v52 = vmul.f32 -1.442695, %v1505_v15  ;;  %v1927_v47 = vsub.f32 1.0, %v4383_v41 }
 0x41e   : > { %v4387_v14 = vpop.eup %4386  ;;  %4406 = vrcp.f32 %v1833_v22  ;;  %v1739_v37 = vadd.f32 1.0, %v4385_v6  ;;  %v1510_v10 = vpop.f32.mrb[54].mxu1  ;;  %v3278_v46 = vmul.f32 -1.442695, %v1507_v25 }
 0x41f   : > { %v4389_v42 = vpop.eup %4388  ;;  %4408 = vtanh.f32 %v1896_v9  ;;  %v1881_v45 = vmul.f32 %v4387_v14, %v5390_v8  ;;  %v1512_v48 = vpop.f32.mrb[55].mxu1  ;;  %v1511_v30 = vadd.f32 %v1510_v10, %v5349_v55 }
 0x420   : > { %v5479_v21 = vpop.eup %4390  ;;  %v1835_v26 = vadd.f32 1.0, %v4389_v42  ;;  %4410 = vpow2.f32 %v3276_v4  ;;  %v3701_v28 = vpop.f32.mrb[62].mxu0  ;;  %v1513_v7 = vadd.f32 %v1512_v48, %v5354_v31 }
 0x421   : > { %v4393_v32 = vpop.eup %4392  ;;  %4412 = vrcp.f32 %v1739_v37  ;;  %v1897_v19 = vadd.f32 %v1881_v45, %v1626_v1  ;;  %v5484_v40 = vadd.f32 %v3701_v28, %v5394_v56  ;;  %v1675_v20 = vpop.f32.mrb[63].mxu0  ;;  %v3263_v54 = vmul.f32 -1.442695, %v1511_v30 }
 0x422   : > { %v4395_v43 = vpop.eup %4394  ;;  %v1942_v36 = vmul.f32 %v4393_v32, %v1926_v16  ;;  %4414 = vrcp.f32 %v1835_v26  ;;  %v1516_v58 = vpop.f32.mrb[56].mxu1  ;;  %v5487_v50 = vadd.f32 %v1675_v20, %v5394_v56  ;;  %v3279_v4 = vmul.f32 -1.442695, %v1513_v7 }
 0x423   : > { %v4397_v13 = vpop.eup %4396  ;;  %4416 = vtanh.f32 %v1897_v19  ;;  %v1518_v33 = vpop.f32.mrb[57].mxu1  ;;  %v1517_v17 = vadd.f32 %v1516_v58, %v5349_v55  ;;  %v1834_v24 = vadd.f32 1.0, %v4395_v43  ;;  %v1928_v6 = vsub.f32 1.0, %v5479_v21 }
 0x424   : > { %v4399_v49 = vpop.eup %4398  ;;  %v1882_v53 = vmul.f32 %v4397_v13, %v5390_v8  ;;  %4418 = vpow2.f32 %v3261_v18  ;;  %3735 = vmatmul.mubr.f32.vlgmr.msra.gmra.mrb[64].mxu0 %v1942_v36  ;;  %v1519_v12 = vadd.f32 %v1518_v33, %v5354_v31  ;;  %v1641_v37 = vadd.f32 %v5432_v61, %v5394_v56 }
 0x425   : > { %v4401_v57 = vpop.eup %4400  ;;  %v1740_v60 = vadd.f32 1.0, %v4399_v49  ;;  %4420 = vpow2.f32 %v3277_v27  ;;  %v3264_v14 = vmul.f32 -1.442695, %v1517_v17 }
 0x426   : > { %v4403_v22 = vpop.eup %4402  ;;  %v1898_v39 = vadd.f32 %v1882_v53, %v1631_v62  ;;  %4422 = vpow2.f32 %v3262_v52  ;;  %v1522_v11 = vpop.f32.mrb[58].mxu1  ;;  %v1943_v0 = vmul.f32 %v4401_v57, %v1927_v47  ;;  %v3280_v10 = vmul.f32 -1.442695, %v1519_v12 }
 0x427   : > { %v4405_v2 = vpop.eup %4404  ;;  %4424 = vrcp.f32 %v1740_v60  ;;  %v1523_v59 = vadd.f32 %v1522_v11, %v5349_v55  ;;  %v1524_v34 = vpop.f32.mrb[59].mxu1  ;;  %v1929_v1 = vsub.f32 1.0, %v4403_v22 }
 0x428   : > { %v4407_v41 = vpop.eup %4406  ;;  %4426 = vtanh.f32 %v1898_v39  ;;  %3737 = vmatprep.mubr.f32.mxu0 %v1943_v0  ;;  %v1883_v5 = vmul.f32 %v4405_v2, %v5390_v8  ;;  %v1525_v56 = vadd.f32 %v1524_v34, %v5354_v31 }
 0x429   : > { %v4409_v9 = vpop.eup %4408  ;;  %4428 = vpow2.f32 %v3278_v46  ;;  %v3265_v48 = vmul.f32 -1.442695, %v1523_v59  ;;  %v1930_v47 = vsub.f32 1.0, %v4407_v41 }
 0x42a   : > { %v4411_v15 = vpop.eup %4410  ;;  %4430 = vpow2.f32 %v3263_v54  ;;  %v1899_v42 = vadd.f32 %v1883_v5, %v1636_v35  ;;  %v1528_v16 = vpop.f32.mrb[60].mxu1  ;;  %v1944_v45 = vmul.f32 %v4409_v9, %v1928_v6  ;;  %v3281_v33 = vmul.f32 -1.442695, %v1525_v56 }
 0x42b   : > { %v4413_v18 = vpop.eup %4412  ;;  %4432 = vrcp.f32 %v1834_v24  ;;  %v1530_v26 = vpop.f32.mrb[61].mxu1  ;;  %v1836_v28 = vadd.f32 1.0, %v4411_v15  ;;  %v1529_v58 = vadd.f32 %v1528_v16, %v5349_v55 }
 0x42c   : > { %v5502_v27 = vpop.eup %4414  ;;  %4434 = vpow2.f32 %v3279_v4  ;;  %v1884_v21 = vmul.f32 %v4413_v18, %v5390_v8  ;;  %3738 = vmatmul.mubr.f32.gmra.mrb[66].mxu0 %v1944_v45  ;;  %v1531_v12 = vadd.f32 %v1530_v26, %v5354_v31 }
 0x42d   : > { %v4417_v25 = vpop.eup %4416  ;;  %4436 = vpow2.f32 %v3264_v14  ;;  %v3266_v60 = vmul.f32 -1.442695, %v1529_v58  ;;  %v1932_v59 = vsub.f32 1.0, %v5502_v27 }
 0x42e   : > { %v4419_v61 = vpop.eup %4418  ;;  %4438 = vpow2.f32 %v3280_v10  ;;  %v1900_v32 = vadd.f32 %v1884_v21, %v1641_v37  ;;  %v1534_v19 = vpop.f32.mrb[62].mxu1  ;;  %v1945_v30 = vmul.f32 %v4417_v25, %v1929_v1  ;;  %v3282_v4 = vmul.f32 -1.442695, %v1531_v12 }
 0x42f   : > { %v4421_v20 = vpop.eup %4420  ;;  %v1741_v43 = vadd.f32 1.0, %v4419_v61  ;;  %4440 = vpow2.f32 %v3265_v48  ;;  %v1536_v36 = vpop.f32.mrb[63].mxu1  ;;  %v1535_v0 = vadd.f32 %v1534_v19, %v5349_v55 }
 0x430   : > { %v4423_v52 = vpop.eup %4422  ;;  %4442 = vtanh.f32 %v1900_v32  ;;  %3740 = vmatprep.mubr.f32.mxu0 %v1945_v30  ;;  %v1837_v49 = vadd.f32 1.0, %v4421_v20  ;;  %v1537_v14 = vadd.f32 %v1536_v36, %v5354_v31 }
 0x431   : > { %v4425_v13 = vpop.eup %4424  ;;  %4444 = vrcp.f32 %v1741_v43  ;;  %v1742_v62 = vadd.f32 1.0, %v4423_v52  ;;  %v3267_v9 = vmul.f32 -1.442695, %v1535_v0 }
 0x432   : > { %v4427_v35 = vpop.eup %4426  ;;  %4446 = vrcp.f32 %v1836_v28  ;;  %v1885_v53 = vmul.f32 %v4425_v13, %v5390_v8  ;;  %v3283_v26 = vmul.f32 -1.442695, %v1537_v14 }
 0x433   : > { %v4429_v46 = vpop.eup %4428  ;;  %4448 = vrcp.f32 %v1742_v62  ;;  %v1946_v7 = vmul.f32 %v4427_v35, %v1930_v47 }
 0x434   : > { %v4431_v57 = vpop.eup %4430  ;;  %4450 = vtanh.f32 %v1899_v42  ;;  %v1901_v54 = vadd.f32 %v1885_v53, %v5444_v23  ;;  %v1838_v22 = vadd.f32 1.0, %v4429_v46 }
 0x435   : > { %v4433_v17 = vpop.eup %4432  ;;  %v1743_v39 = vadd.f32 1.0, %v4431_v57  ;;  %4452 = vpow2.f32 %v3281_v33  ;;  %3741 = vmatmul.mubr.f32.gmra.mrb[68].mxu0 %v1946_v7 }
 0x436   : > { %v4435_v11 = vpop.eup %4434  ;;  %4454 = vrcp.f32 %v1837_v49  ;;  %v1931_v55 = vsub.f32 1.0, %v4433_v17 }
 0x437   : > { %v4437_v2 = vpop.eup %4436  ;;  %4456 = vrcp.f32 %v1743_v39  ;;  %v1839_v24 = vadd.f32 1.0, %v4435_v11 }
 0x438   : > { %v4439_v34 = vpop.eup %4438  ;;  %v1744_v41 = vadd.f32 1.0, %v4437_v2  ;;  %4458 = vpow2.f32 %v3266_v60 }
 0x439   : > { %v4441_v23 = vpop.eup %4440  ;;  %4460 = vrcp.f32 %v1838_v22  ;;  %v1840_v16 = vadd.f32 1.0, %v4439_v34 }
 0x43a   : > { %v4443_v5 = vpop.eup %4442  ;;  %4462 = vrcp.f32 %v1744_v41  ;;  %v1745_v6 = vadd.f32 1.0, %v4441_v23 }
 0x43b   : > { %v4445_v37 = vpop.eup %4444  ;;  %4464 = vrcp.f32 %v1839_v24  ;;  %v1948_v1 = vmul.f32 %v4443_v5, %v1932_v59 }
 0x43c   : > { %v4447_v15 = vpop.eup %4446  ;;  %4466 = vrcp.f32 %v1745_v6  ;;  %v1886_v10 = vmul.f32 %v4445_v37, %v5390_v8 }
 0x43d   : > { %v4449_v42 = vpop.eup %4448  ;;  %4468 = vpow2.f32 %v3282_v4  ;;  %v1933_v52 = vsub.f32 1.0, %v4447_v15 }
 0x43e   : > { %v4451_v45 = vpop.eup %4450  ;;  %4470 = vpow2.f32 %v3267_v9  ;;  %v1902_v18 = vadd.f32 %v1886_v10, %v5440_v51  ;;  %v1887_v48 = vmul.f32 %v4449_v42, %v5390_v8 }
 0x43f   : > { %v4453_v27 = vpop.eup %4452  ;;  %4472 = vtanh.f32 %v1901_v54  ;;  %v1947_v31 = vmul.f32 %v4451_v45, %v1931_v55 }
 0x440   : > { %v4455_v21 = vpop.eup %4454  ;;  %v1841_v25 = vadd.f32 1.0, %v4453_v27  ;;  %4474 = vtanh.f32 %v1902_v18  ;;  %v1903_v56 = vadd.f32 %v1887_v48, %v5451_v44 }
 0x441   : > { %v4457_v61 = vpop.eup %4456  ;;  %4476 = vrcp.f32 %v1840_v16  ;;  %3743 = vmatprep.mubr.f32.mxu0 %v1947_v31  ;;  %v1934_v33 = vsub.f32 1.0, %v4455_v21 }
 0x442   : > { %v4459_v28 = vpop.eup %4458  ;;  %v1888_v32 = vmul.f32 %v4457_v61, %v5390_v8  ;;  %4478 = vpow2.f32 %v3283_v26  ;;  %3744 = vmatmul.mubr.f32.gmra.mrb[70].mxu0 %v1948_v1 }
 0x443   : > { %v4461_v51 = vpop.eup %4460  ;;  %v1746_v19 = vadd.f32 1.0, %v4459_v28  ;;  %4480 = vtanh.f32 %v1903_v56 }
 0x444   : > { %v4463_v30 = vpop.eup %4462  ;;  %4482 = vrcp.f32 %v1841_v25  ;;  %v1904_v20 = vadd.f32 %v1888_v32, %v5448_v3  ;;  %v1935_v57 = vsub.f32 1.0, %v4461_v51 }
 0x445   : > { %v4465_v43 = vpop.eup %4464  ;;  %4484 = vrcp.f32 %v1746_v19  ;;  %v1889_v36 = vmul.f32 %v4463_v30, %v5390_v8 }
 0x446   : > { %v4467_v44 = vpop.eup %4466  ;;  %4486 = vtanh.f32 %v1904_v20 }
 0x447   : > { %v4469_v58 = vpop.eup %4468  ;;  %v1890_v13 = vmul.f32 %v4467_v44, %v5390_v8  ;;  %v1905_v62 = vadd.f32 %v1889_v36, %v5468_v29  ;;  %v1936_v29 = vsub.f32 1.0, %v4465_v43 }
 0x448   : > { %v4471_v47 = vpop.eup %4470  ;;  %v1842_v46 = vadd.f32 1.0, %v4469_v58 }
 0x449   : > { %v4473_v35 = vpop.eup %4472  ;;  %v1747_v49 = vadd.f32 1.0, %v4471_v47  ;;  %v1906_v53 = vadd.f32 %v1890_v13, %v5465_v63  ;;  %4488 = vtanh.f32 %v1905_v62 }
 0x44a   : > { %v4475_v3 = vpop.eup %4474  ;;  %v1949_v7 = vmul.f32 %v4473_v35, %v1933_v52 }
 0x44b   : > { %v4477_v60 = vpop.eup %4476  ;;  %4490 = vrcp.f32 %v1747_v49  ;;  %v1950_v54 = vmul.f32 %v4475_v3, %v1934_v33 }
 0x44c   : > { %v4479_v17 = vpop.eup %4478  ;;  %4492 = vtanh.f32 %v1906_v53  ;;  %3746 = vmatprep.mubr.f32.mxu0 %v1949_v7  ;;  %v1937_v24 = vsub.f32 1.0, %v4477_v60 }
 0x44d   : > { %v4481_v22 = vpop.eup %4480  ;;  %3747 = vmatmul.mubr.f32.gmra.mrb[72].mxu0 %v1950_v54  ;;  %4494 = vrcp.f32 %v1842_v46  ;;  %v1843_v0 = vadd.f32 1.0, %v4479_v17 }
 0x44e   : > { %v4483_v39 = vpop.eup %4482  ;;  %v1951_v12 = vmul.f32 %v4481_v22, %v1935_v57 }
 0x44f   : > { %v4485_v11 = vpop.eup %4484  ;;  %4496 = vrcp.f32 %v1843_v0  ;;  %v1938_v23 = vsub.f32 1.0, %v4483_v39 }
 0x450   : > { %v4487_v63 = vpop.eup %4486  ;;  %v1891_v2 = vmul.f32 %v4485_v11, %v5390_v8  ;;  %3749 = vmatprep.mubr.f32.mxu0 %v1951_v12 }
 0x451   : > { %v1952_v59 = vmul.f32 %v4487_v63, %v1936_v29 }
 0x452   : > { %v1907_v34 = vadd.f32 %v1891_v2, %v5487_v50 }
 0x453   : > { %v4489_v41 = vpop.eup %4488  ;;  %3750 = vmatmul.mubr.f32.gmra.mrb[74].mxu0 %v1952_v59 }
 0x454   : > { %4498 = vtanh.f32 %v1907_v34  ;;  %v1953_v4 = vmul.f32 %v4489_v41, %v1937_v24 }
 0x455   : > { %v4491_v5 = vpop.eup %4490 }
 0x456   : > { %v4493_v6 = vpop.eup %4492  ;;  %v1892_v9 = vmul.f32 %v4491_v5, %v5390_v8  ;;  %3752 = vmatprep.mubr.f32.mxu0 %v1953_v4  ;;  %v1973_v8 = vld [vmem:[%s6236_s2 + $0x40] ss:$0 sm:$0xff]  ;;  %v5531_v4 = vand.u32 127, %v718_v38  ;;  %v2151_v5 = vld [vmem:[%s6236_s2 + $0x48] ss:$0 sm:$0xff] }
 0x457   : > { %v1954_v14 = vmul.f32 %v4493_v6, %v1938_v23  ;;  %v4495_v37 = vpop.eup %4494 }
 0x458   : > { %v1908_v55 = vadd.f32 %v1892_v9, %v5484_v40  ;;  %v1939_v1 = vsub.f32 1.0, %v4495_v37  ;;  %vm2299_vm0 = vcmp.lt.s32.totalorder %v5531_v4, 5 }
 0x459   : > { %3753 = vmatmul.mubr.f32.gmra.mrb[76].mxu0 %v1954_v14  ;;  %v4497_v15 = vpop.eup %4496 }
 0x45a   : > { %4500 = vtanh.f32 %v1908_v55  ;;  %v1940_v42 = vsub.f32 1.0, %v4497_v15 }
 0x45e   : > { %v4499_v50 = vpop.eup %4498 }
 0x45f   : > { %v1955_v10 = vmul.f32 %v4499_v50, %v1939_v1 }
 0x461   : > { %3755 = vmatprep.mubr.f32.mxu0 %v1955_v10 }
 0x464   : > { %v4501_v16 = vpop.eup %4500 }
 0x465   : > { %v1956_v45 = vmul.f32 %v4501_v16, %v1940_v42 }
 0x467   : > { %3756 = vmatmul.mubr.f32.gmra.mrb[78].mxu0 %v1956_v45 }
 0x4f7   : > { %v3736_v18 = vpop.f32.mrb[64].mxu0 }
 0x4f8   : > { %v2046_v48 = vadd.f32 %v3736_v18, %v1973_v8  ;;  %v2040_v26 = vpop.f32.mrb[65].mxu0 }
 0x4f9   : > { %v2041_v27 = vadd.f32 %v2040_v26, %v1973_v8 }
 0x4fa   : > { %v2120_v31 = vmax.f32 %v2046_v48, 0.0 }
 0x4fb   : > { %v2119_v40 = vmax.f32 %v2041_v27, 0.0 }
 0x4fd   : > { %3790 = vmatprep.mubr.f32.mxu1 %v2119_v40 }
 0x4fe   : > { %3791 = vmatmul.mubr.f32.vlgmr.msra.gmra.mrb[64].mxu1 %v2120_v31 }
 0x4ff   : > { %v3739_v21 = vpop.f32.mrb[66].mxu0 }
 0x500   : > { %v2056_v25 = vadd.f32 %v3739_v21, %v1973_v8  ;;  %v2050_v56 = vpop.f32.mrb[67].mxu0 }
 0x501   : > { %v2051_v61 = vadd.f32 %v2050_v56, %v1973_v8 }
 0x502   : > { %v2122_v32 = vmax.f32 %v2056_v25, 0.0 }
 0x503   : > { %v2121_v28 = vmax.f32 %v2051_v61, 0.0 }
 0x505   : > { %3793 = vmatprep.mubr.f32.mxu1 %v2121_v28 }
 0x506   : > { %3794 = vmatmul.mubr.f32.gmra.mrb[66].mxu1 %v2122_v32 }
 0x508   : > { %v3742_v51 = vpop.f32.mrb[68].mxu0 }
 0x509   : > { %v2066_v19 = vadd.f32 %v3742_v51, %v1973_v8  ;;  %v2060_v30 = vpop.f32.mrb[69].mxu0 }
 0x50a   : > { %v2061_v20 = vadd.f32 %v2060_v30, %v1973_v8 }
 0x50b   : > { %v2124_v36 = vmax.f32 %v2066_v19, 0.0 }
 0x50c   : > { %v2123_v43 = vmax.f32 %v2061_v20, 0.0 }
 0x50e   : > { %3796 = vmatprep.mubr.f32.mxu1 %v2123_v43 }
 0x50f   : > { %3797 = vmatmul.mubr.f32.gmra.mrb[68].mxu1 %v2124_v36 }
 0x515   : > { %v3745_v44 = vpop.f32.mrb[70].mxu0 }
 0x516   : > { %v2076_v52 = vadd.f32 %v3745_v44, %v1973_v8  ;;  %v2070_v58 = vpop.f32.mrb[71].mxu0 }
 0x517   : > { %v2071_v13 = vadd.f32 %v2070_v58, %v1973_v8 }
 0x518   : > { %v2126_v62 = vmax.f32 %v2076_v52, 0.0 }
 0x519   : > { %v2125_v33 = vmax.f32 %v2071_v13, 0.0 }
 0x51b   : > { %3799 = vmatprep.mubr.f32.mxu1 %v2125_v33 }
 0x51c   : > { %3800 = vmatmul.mubr.f32.gmra.mrb[70].mxu1 %v2126_v62 }
 0x520   : > { %v3748_v47 = vpop.f32.mrb[72].mxu0 }
 0x521   : > { %v2086_v35 = vadd.f32 %v3748_v47, %v1973_v8  ;;  %v2080_v49 = vpop.f32.mrb[73].mxu0 }
 0x522   : > { %v2081_v53 = vadd.f32 %v2080_v49, %v1973_v8 }
 0x523   : > { %v2128_v3 = vmax.f32 %v2086_v35, 0.0 }
 0x524   : > { %v2127_v46 = vmax.f32 %v2081_v53, 0.0 }
 0x526   : > { %3802 = vmatprep.mubr.f32.mxu1 %v2127_v46  ;;  %v3751_v7 = vpop.f32.mrb[74].mxu0 }
 0x527   : > { %3803 = vmatmul.mubr.f32.gmra.mrb[72].mxu1 %v2128_v3  ;;  %v2096_v57 = vadd.f32 %v3751_v7, %v1973_v8  ;;  %v2090_v60 = vpop.f32.mrb[75].mxu0 }
 0x528   : > { %v2091_v54 = vadd.f32 %v2090_v60, %v1973_v8 }
 0x529   : > { %v2130_v17 = vmax.f32 %v2096_v57, 0.0 }
 0x52a   : > { %v2129_v22 = vmax.f32 %v2091_v54, 0.0 }
 0x52c   : > { %3805 = vmatprep.mubr.f32.mxu1 %v2129_v22  ;;  %v3754_v29 = vpop.f32.mrb[76].mxu0 }
 0x52d   : > { %3806 = vmatmul.mubr.f32.gmra.mrb[74].mxu1 %v2130_v17  ;;  %v2106_v39 = vadd.f32 %v3754_v29, %v1973_v8  ;;  %v2100_v12 = vpop.f32.mrb[77].mxu0 }
 0x52e   : > { %v2101_v11 = vadd.f32 %v2100_v12, %v1973_v8 }
 0x52f   : > { %v2132_v0 = vmax.f32 %v2106_v39, 0.0 }
 0x530   : > { %v2131_v63 = vmax.f32 %v2101_v11, 0.0 }
 0x532   : > { %3808 = vmatprep.mubr.f32.mxu1 %v2131_v63 }
 0x533   : > { %3809 = vmatmul.mubr.f32.gmra.mrb[76].mxu1 %v2132_v0 }
 0x53a   : > { %v3757_v2 = vpop.f32.mrb[78].mxu0 }
 0x53b   : > { %v2116_v24 = vadd.f32 %v3757_v2, %v1973_v8  ;;  %v2110_v59 = vpop.f32.mrb[79].mxu0 }
 0x53c   : > { %v2111_v34 = vadd.f32 %v2110_v59, %v1973_v8 }
 0x53d   : > { %v2134_v41 = vmax.f32 %v2116_v24, 0.0 }
 0x53e   : > { %v2133_v23 = vmax.f32 %v2111_v34, 0.0 }
 0x540   : > { %3811 = vmatprep.mubr.f32.mxu1 %v2133_v23 }
 0x541   : > { %3812 = vmatmul.mubr.f32.gmra.mrb[78].mxu1 %v2134_v41 }
 0x5d1   : > { %v3792_v6 = vpop.f32.mrb[64].mxu1 }
 0x5d2   : > { %v2224_v9 = vadd.f32 %v3792_v6, %v2151_v5  ;;  %v2218_v14 = vpop.f32.mrb[65].mxu1 }
 0x5d3   : > { %v2219_v37 = vadd.f32 %v2218_v14, %v2151_v5 }
 0x5d4   : > { %v2301_v55 = vsel %vm2299_vm0, %v2224_v9, -1e+30 }
 0x5d5   : > { %2318 = vmax.xlane.f32.xlu0 %v2301_v55  ;;  %v5541_v1 = vsel %vm2299_vm0, %v2219_v37, -1e+30 }
 0x5d9   : > { %v3795_v38 = vpop.f32.mrb[66].mxu1  ;;  %2316 = vmax.xlane.f32.xlu0 %v5541_v1 }
 0x5da   : > { %v2234_v15 = vadd.f32 %v3795_v38, %v2151_v5  ;;  %v2228_v50 = vpop.f32.mrb[67].mxu1 }
 0x5db   : > { %v2229_v10 = vadd.f32 %v2228_v50, %v2151_v5 }
 0x5dc   : > { %v5546_v42 = vsel %vm2299_vm0, %v2234_v15, -1e+30 }
 0x5dd   : > { %2322 = vmax.xlane.f32.xlu1 %v5546_v42  ;;  %v5551_v16 = vsel %vm2299_vm0, %v2229_v10, -1e+30 }
 0x5e1   : > { %2320 = vmax.xlane.f32.xlu1 %v5551_v16 }
 0x5e2   : > { %v3798_v45 = vpop.f32.mrb[68].mxu1 }
 0x5e3   : > { %v2244_v8 = vadd.f32 %v3798_v45, %v2151_v5  ;;  %v2238_v18 = vpop.f32.mrb[69].mxu1 }
 0x5e4   : > { %v2239_v48 = vadd.f32 %v2238_v18, %v2151_v5 }
 0x5e5   : > { %v5556_v26 = vsel %vm2299_vm0, %v2244_v8, -1e+30 }
 0x5e6   : > { %2326 = vmax.xlane.f32.xlu1 %v5556_v26  ;;  %v5561_v27 = vsel %vm2299_vm0, %v2239_v48, -1e+30 }
 0x5e7   : > { %2324 = vmax.xlane.f32.xlu0 %v5561_v27 }
 0x5ef   : > { %v3801_v40 = vpop.f32.mrb[70].mxu1 }
 0x5f0   : > { %v2254_v31 = vadd.f32 %v3801_v40, %v2151_v5  ;;  %v2248_v21 = vpop.f32.mrb[71].mxu1 }
 0x5f1   : > { %v2249_v25 = vadd.f32 %v2248_v21, %v2151_v5 }
 0x5f2   : > { %v5566_v56 = vsel %vm2299_vm0, %v2254_v31, -1e+30 }
 0x5f3   : > { %2330 = vmax.xlane.f32.xlu1 %v5566_v56  ;;  %v5571_v61 = vsel %vm2299_vm0, %v2249_v25, -1e+30 }
 0x5f4   : > { %2328 = vmax.xlane.f32.xlu0 %v5571_v61 }
 0x5fa   : > { %v3804_v28 = vpop.f32.mrb[72].mxu1 }
 0x5fb   : > { %v2264_v32 = vadd.f32 %v3804_v28, %v2151_v5  ;;  %v2258_v51 = vpop.f32.mrb[73].mxu1 }
 0x5fc   : > { %v2259_v19 = vadd.f32 %v2258_v51, %v2151_v5 }
 0x5fd   : > { %v5576_v30 = vsel %vm2299_vm0, %v2264_v32, -1e+30 }
 0x5fe   : > { %2334 = vmax.xlane.f32.xlu1 %v5576_v30  ;;  %v5581_v20 = vsel %vm2299_vm0, %v2259_v19, -1e+30 }
 0x5ff   : > { %2332 = vmax.xlane.f32.xlu0 %v5581_v20 }
 0x600   : > { %v3807_v43 = vpop.f32.mrb[74].mxu1 }
 0x601   : > { %v2274_v36 = vadd.f32 %v3807_v43, %v2151_v5  ;;  %v2268_v44 = vpop.f32.mrb[75].mxu1 }
 0x602   : > { %v2269_v52 = vadd.f32 %v2268_v44, %v2151_v5 }
 0x603   : > { %v5586_v58 = vsel %vm2299_vm0, %v2274_v36, -1e+30 }
 0x604   : > { %2338 = vmax.xlane.f32.xlu1 %v5586_v58  ;;  %v5591_v13 = vsel %vm2299_vm0, %v2269_v52, -1e+30 }
 0x605   : > { %2336 = vmax.xlane.f32.xlu0 %v5591_v13 }
 0x606   : > { %v3810_v62 = vpop.f32.mrb[76].mxu1 }
 0x607   : > { %v2284_v33 = vadd.f32 %v3810_v62, %v2151_v5  ;;  %v2278_v47 = vpop.f32.mrb[77].mxu1 }
 0x608   : > { %v2279_v35 = vadd.f32 %v2278_v47, %v2151_v5 }
 0x609   : > { %v5596_v49 = vsel %vm2299_vm0, %v2284_v33, -1e+30 }
 0x60a   : > { %2342 = vmax.xlane.f32.xlu1 %v5596_v49  ;;  %v5601_v53 = vsel %vm2299_vm0, %v2279_v35, -1e+30 }
 0x60b   : > { %2340 = vmax.xlane.f32.xlu0 %v5601_v53 }
 0x614   : > { %v3813_v3 = vpop.f32.mrb[78].mxu1 }
 0x615   : > { %v2294_v46 = vadd.f32 %v3813_v3, %v2151_v5  ;;  %v2288_v7 = vpop.f32.mrb[79].mxu1 }
 0x616   : > { %v2289_v57 = vadd.f32 %v2288_v7, %v2151_v5 }
 0x617   : > { %v5606_v60 = vsel %vm2299_vm0, %v2294_v46, -1e+30 }
 0x618   : > { %2346 = vmax.xlane.f32.xlu1 %v5606_v60  ;;  %v5611_v54 = vsel %vm2299_vm0, %v2289_v57, -1e+30 }
 0x619   : > { %2344 = vmax.xlane.f32.xlu0 %v5611_v54 }
 0x662   : > { %v2319_v17 = vpop.xlane.xlu0 %2318 }
 0x663   : > { %v5614_v22 = vsub.f32 %v2301_v55, %v2319_v17 }
 0x665   : > { %v2366_v29 = vmul.f32 1.442695, %v5614_v22 }
 0x666   : > { %v2317_v39 = vpop.xlane.xlu0 %2316 }
 0x667   : > { %4502 = vpow2.f32 %v2366_v29  ;;  %v5618_v12 = vsub.f32 %v5541_v1, %v2317_v39 }
 0x669   : > { %v2364_v11 = vmul.f32 1.442695, %v5618_v12 }
 0x66a   : > { %v2323_v59 = vpop.xlane.xlu1 %2322 }
 0x66b   : > { %4504 = vpow2.f32 %v2364_v11  ;;  %v5634_v34 = vsub.f32 %v5546_v42, %v2323_v59 }
 0x66d   : > { %v2370_v23 = vmul.f32 1.442695, %v5634_v34 }
 0x66e   : > { %v2321_v41 = vpop.xlane.xlu1 %2320 }
 0x66f   : > { %v5638_v5 = vsub.f32 %v5551_v16, %v2321_v41  ;;  %4506 = vpow2.f32 %v2370_v23  ;;  %v4592_v41 = vmov 127  }
 0x670   : > { %4085 = vset.pattern.permute.xlu0 %v4592_v41  ;;  %4084 = vset.pattern.permute.xlu1 %v4592_v41 }
 0x671   : > { %v4503_v0 = vpop.eup %4502  ;;  %v2368_v6 = vmul.f32 1.442695, %v5638_v5 }
 0x672   : > { %v5623_v63 = vsel %vm2299_vm0, %v4503_v0, 0.0 }
 0x673   : > { %2446 = vrot.lane.b32.xlu1 %v5623_v63, %s4591_s9  ;;  %4508 = vpow2.f32 %v2368_v6  ;;  %v2327_v14 = vpop.xlane.xlu1 %2326 }
 0x674   : > { %v5648_v1 = vsub.f32 %v5556_v26, %v2327_v14  ;;  %v2325_v38 = vpop.xlane.xlu0 %2324 }
 0x675   : > { %v4505_v2 = vpop.eup %4504  ;;  %v5657_v10 = vsub.f32 %v5561_v27, %v2325_v38 }
 0x676   : > { %v5629_v24 = vsel %vm2299_vm0, %v4505_v2, 0.0  ;;  %v2374_v50 = vmul.f32 1.442695, %v5648_v1 }
 0x677   : > { %2444 = vrot.lane.b32.xlu0 %v5629_v24, %s4591_s9  ;;  %v2372_v42 = vmul.f32 1.442695, %v5657_v10 }
 0x678   : > { %4510 = vpow2.f32 %v2374_v50 }
 0x679   : > { %v4507_v9 = vpop.eup %4506  ;;  %4512 = vpow2.f32 %v2372_v42 }
 0x67a   : > { %v5645_v37 = vsel %vm2299_vm0, %v4507_v9, 0.0 }
 0x67d   : > { %v4509_v55 = vpop.eup %4508 }
 0x67e   : > { %v5653_v15 = vsel %vm2299_vm0, %v4509_v55, 0.0 }
 0x680   : > { %v2331_v48 = vpop.xlane.xlu1 %2330 }
 0x681   : > { %v5678_v26 = vsub.f32 %v5566_v56, %v2331_v48  ;;  %v2329_v27 = vpop.xlane.xlu0 %2328 }
 0x682   : > { %v4511_v16 = vpop.eup %4510  ;;  %v5682_v31 = vsub.f32 %v5571_v61, %v2329_v27 }
 0x683   : > { %v5667_v45 = vsel %vm2299_vm0, %v4511_v16, 0.0  ;;  %v4513_v8 = vpop.eup %4512  ;;  %v2378_v40 = vmul.f32 1.442695, %v5678_v26 }
 0x684   : > { %v5673_v18 = vsel %vm2299_vm0, %v4513_v8, 0.0  ;;  %v2376_v21 = vmul.f32 1.442695, %v5682_v31 }
 0x685   : > { %4514 = vpow2.f32 %v2378_v40 }
 0x686   : > { %4516 = vpow2.f32 %v2376_v21 }
 0x68b   : > { %v2335_v32 = vpop.xlane.xlu1 %2334 }
 0x68c   : > { %v5700_v51 = vsub.f32 %v5576_v30, %v2335_v32  ;;  %v2333_v19 = vpop.xlane.xlu0 %2332 }
 0x68d   : > { %v5704_v36 = vsub.f32 %v5581_v20, %v2333_v19 }
 0x68e   : > { %v2382_v43 = vmul.f32 1.442695, %v5700_v51 }
 0x68f   : > { %v4515_v25 = vpop.eup %4514  ;;  %v2380_v44 = vmul.f32 1.442695, %v5704_v36 }
 0x690   : > { %v5689_v28 = vsel %vm2299_vm0, %v4515_v25, 0.0  ;;  %v4517_v56 = vpop.eup %4516  ;;  %4518 = vpow2.f32 %v2382_v43 }
 0x691   : > { %v5695_v61 = vsel %vm2299_vm0, %v4517_v56, 0.0  ;;  %4520 = vpow2.f32 %v2380_v44  ;;  %v2339_v33 = vpop.xlane.xlu1 %2338 }
 0x692   : > { %v5722_v47 = vsub.f32 %v5586_v58, %v2339_v33  ;;  %v2337_v35 = vpop.xlane.xlu0 %2336 }
 0x693   : > { %v5726_v46 = vsub.f32 %v5591_v13, %v2337_v35 }
 0x694   : > { %v2386_v3 = vmul.f32 1.442695, %v5722_v47 }
 0x695   : > { %v2384_v7 = vmul.f32 1.442695, %v5726_v46 }
 0x696   : > { %2412 = vadd.xlane.f32.xlu0 %v5629_v24  ;;  %4522 = vpow2.f32 %v2386_v3 }
 0x697   : > { %2414 = vadd.xlane.f32.xlu1 %v5623_v63  ;;  %4524 = vpow2.f32 %v2384_v7  ;;  %v2343_v29 = vpop.xlane.xlu1 %2342 }
 0x698   : > { %v5744_v39 = vsub.f32 %v5596_v49, %v2343_v29  ;;  %v2341_v11 = vpop.xlane.xlu0 %2340 }
 0x699   : > { %v5748_v2 = vsub.f32 %v5601_v53, %v2341_v11 }
 0x69a   : > { %2418 = vadd.xlane.f32.xlu0 %v5645_v37  ;;  %v4519_v52 = vpop.eup %4518  ;;  %v2390_v0 = vmul.f32 1.442695, %v5744_v39 }
 0x69b   : > { %v5711_v62 = vsel %vm2299_vm0, %v4519_v52, 0.0  ;;  %v4521_v30 = vpop.eup %4520  ;;  %v2388_v59 = vmul.f32 1.442695, %v5748_v2 }
 0x69c   : > { %v5717_v20 = vsel %vm2299_vm0, %v4521_v30, 0.0  ;;  %4526 = vpow2.f32 %v2390_v0 }
 0x69d   : > { %4528 = vpow2.f32 %v2388_v59 }
 0x69e   : > { %2416 = vadd.xlane.f32.xlu0 %v5653_v15 }
 0x6a0   : > { %v4523_v57 = vpop.eup %4522 }
 0x6a1   : > { %v5733_v17 = vsel %vm2299_vm0, %v4523_v57, 0.0  ;;  %v4525_v58 = vpop.eup %4524 }
 0x6a2   : > { %v5739_v13 = vsel %vm2299_vm0, %v4525_v58, 0.0 }
 0x6a5   : > { %v2347_v9 = vpop.xlane.xlu1 %2346 }
 0x6a6   : > { %v4527_v23 = vpop.eup %4526  ;;  %v5766_v14 = vsub.f32 %v5606_v60, %v2347_v9  ;;  %v2345_v55 = vpop.xlane.xlu0 %2344 }
 0x6a7   : > { %v5755_v49 = vsel %vm2299_vm0, %v4527_v23, 0.0  ;;  %v4529_v6 = vpop.eup %4528  ;;  %v5770_v50 = vsub.f32 %v5611_v54, %v2345_v55 }
 0x6a8   : > { %2450 = vrot.lane.b32.xlu1 %v5645_v37, %s4591_s9  ;;  %v5761_v53 = vsel %vm2299_vm0, %v4529_v6, 0.0  ;;  %v2394_v38 = vmul.f32 1.442695, %v5766_v14  ;;  %v4567_v6 = vld [vmem:[%s4665_s16 + $0x8] sm:$0xff] }
 0x6a9   : > { %v2392_v42 = vmul.f32 1.442695, %v5770_v50 }
 0x6aa   : > { %4530 = vpow2.f32 %v2394_v38 }
 0x6ab   : > { %4532 = vpow2.f32 %v2392_v42  ;;  %v4568_v42 = vld [vmem:[%s4665_s16 + $0x18] sm:$0xff] }
 0x6ac   : > { %2448 = vrot.lane.b32.xlu1 %v5653_v15, %s4591_s9 }
 0x6b0   : > { %2454 = vrot.lane.b32.xlu1 %v5667_v45, %s4591_s9 }
 0x6b4   : > { %2452 = vrot.lane.b32.xlu0 %v5673_v18, %s4591_s9  ;;  %v4531_v16 = vpop.eup %4530 }
 0x6b5   : > { %v5777_v8 = vsel %vm2299_vm0, %v4531_v16, 0.0  ;;  %v4533_v60 = vpop.eup %4532 }
 0x6b6   : > { %v5783_v54 = vsel %vm2299_vm0, %v4533_v60, 0.0 }
 0x6d3   : > { %2420 = vadd.xlane.f32.xlu0 %v5673_v18 }
 0x6d4   : > { %2422 = vadd.xlane.f32.xlu1 %v5667_v45 }
 0x6e5   : > { %2458 = vrot.lane.b32.xlu1 %v5689_v28, %s4591_s9  ;;  %v2447_v27 = vpop.permute.xlu1 %2446 }
 0x6e6   : > { %v5802_v35 = vadd.f32 %v2447_v27, %v5623_v63 }
 0x6e9   : > { %2456 = vrot.lane.b32.xlu0 %v5695_v61, %s4591_s9  ;;  %v2445_v48 = vpop.permute.xlu0 %2444 }
 0x6ea   : > { %v5809_v57 = vadd.f32 %v2445_v48, %v5629_v24  ;;  %v4569_v48 = vld [vmem:[%s4665_s16 + $0x10] sm:$0xff] }
 0x708   : > { %2424 = vadd.xlane.f32.xlu0 %v5695_v61 }
 0x709   : > { %2426 = vadd.xlane.f32.xlu1 %v5689_v28 }
 0x71a   : > { %2462 = vrot.lane.b32.xlu1 %v5711_v62, %s4591_s9 }
 0x71e   : > { %2460 = vrot.lane.b32.xlu0 %v5717_v20, %s4591_s9 }
 0x723   : > { %v5787_v40 = vpop.xlane.xlu0 %2412 }
 0x724   : > { %v5789_v21 = vpop.xlane.xlu1 %2414  ;;  %4534 = vlog2.f32 %v5787_v40 }
 0x725   : > { %v2589_v9 = vmul.f32 %v4567_v6, %v5789_v21  ;;  %v4572_v6 = vld [vmem:[%s4665_s16 + $0x48] sm:$0xff]  ;;  %4536 = vlog2.f32 %v5789_v21 }
 0x727   : > { %v5791_v25 = vpop.xlane.xlu0 %2418 }
 0x728   : > { %v2451_v56 = vpop.permute.xlu1 %2450  ;;  %v2591_v16 = vmul.f32 %v4568_v42, %v5791_v25  ;;  %v4574_v42 = vld [vmem:[%s4665_s16 + $0x58] sm:$0xff]  ;;  %4538 = vlog2.f32 %v5791_v25 }
 0x729   : > { %v5812_v58 = vadd.f32 %v2451_v56, %v5645_v37 }
 0x72b   : > { %v5793_v32 = vpop.xlane.xlu0 %2416 }
 0x72c   : > { %v2449_v19 = vpop.permute.xlu1 %2448  ;;  %v2590_v27 = vmul.f32 %v4569_v48, %v5793_v32  ;;  %4540 = vlog2.f32 %v5793_v32 }
 0x72d   : > { %v5821_v29 = vadd.f32 %v2449_v19, %v5653_v15 }
 0x72f   : > { %v2453_v43 = vpop.permute.xlu0 %2452 }
 0x730   : > { %v2455_v44 = vpop.permute.xlu1 %2454  ;;  %v5824_v11 = vadd.f32 %v2453_v43, %v5673_v18  ;;  %v4566_v18 = vld [vmem:[%s4665_s16] sm:$0xff] }
 0x731   : > { %v5831_v37 = vadd.f32 %v2455_v44, %v5667_v45  ;;  %v2588_v41 = vmul.f32 %v4566_v18, %v5787_v40 }
 0x73d   : > { %2428 = vadd.xlane.f32.xlu0 %v5717_v20 }
 0x73e   : > { %2430 = vadd.xlane.f32.xlu1 %v5711_v62 }
 0x74f   : > { %2466 = vrot.lane.b32.xlu1 %v5733_v17, %s4591_s9 }
 0x753   : > { %2464 = vrot.lane.b32.xlu0 %v5739_v13, %s4591_s9 }
 0x760   : > { %v5797_v52 = vpop.xlane.xlu0 %2420 }
 0x761   : > { %v5799_v30 = vpop.xlane.xlu1 %2422  ;;  %4542 = vlog2.f32 %v5797_v52 }
 0x762   : > { %4544 = vlog2.f32 %v5799_v30 }
 0x764   : > { %v2457_v33 = vpop.permute.xlu0 %2456 }
 0x765   : > { %v2459_v3 = vpop.permute.xlu1 %2458  ;;  %v5834_v0 = vadd.f32 %v2457_v33, %v5695_v61 }
 0x766   : > { %v5845_v23 = vadd.f32 %v2459_v3, %v5689_v28 }
 0x772   : > { %2432 = vadd.xlane.f32.xlu0 %v5739_v13 }
 0x773   : > { %2434 = vadd.xlane.f32.xlu1 %v5733_v17 }
 0x784   : > { %2470 = vrot.lane.b32.xlu1 %v5755_v49, %s4591_s9 }
 0x788   : > { %2468 = vrot.lane.b32.xlu0 %v5761_v53, %s4591_s9 }
 0x795   : > { %v5806_v7 = vpop.xlane.xlu0 %2424 }
 0x796   : > { %6249 = vst [vmem:[#allocation2_spill] sm:$0xff] %v5806_v7  ;;  %v5818_v63 = vpop.xlane.xlu1 %2426 }
 0x797   : > { %6250 = vst [vmem:[#allocation3_spill] sm:$0xff] %v5818_v63 }
 0x799   : > { %v2461_v24 = vpop.permute.xlu0 %2460 }
 0x79a   : > { %v2463_v59 = vpop.permute.xlu1 %2462  ;;  %v5854_v55 = vadd.f32 %v2461_v24, %v5717_v20 }
 0x79b   : > { %v5863_v60 = vadd.f32 %v2463_v59, %v5711_v62 }
 0x7a7   : > { %2436 = vadd.xlane.f32.xlu0 %v5761_v53 }
 0x7a8   : > { %2438 = vadd.xlane.f32.xlu1 %v5755_v49 }
 0x7b9   : > { %2474 = vrot.lane.b32.xlu1 %v5777_v8, %s4591_s9 }
 0x7bd   : > { %2472 = vrot.lane.b32.xlu0 %v5783_v54, %s4591_s9 }
 0x7ca   : > { %v5836_v15 = vpop.xlane.xlu0 %2428 }
 0x7cb   : > { %6251 = vst [vmem:[#allocation4_spill] sm:$0xff] %v5836_v15  ;;  %v5847_v45 = vpop.xlane.xlu1 %2430 }
 0x7cc   : > { %6252 = vst [vmem:[#allocation5_spill] sm:$0xff] %v5847_v45 }
 0x7ce   : > { %v2465_v61 = vpop.permute.xlu0 %2464 }
 0x7cf   : > { %v2467_v28 = vpop.permute.xlu1 %2466  ;;  %v5872_v56 = vadd.f32 %v2465_v61, %v5739_v13  ;;  %v4570_v13 = vld [vmem:[%s4665_s16 + $0x28] sm:$0xff] }
 0x7d0   : > { %v5877_v62 = vadd.f32 %v2467_v28, %v5733_v17  ;;  %v2593_v33 = vmul.f32 %v4570_v13, %v5799_v30  ;;  %v4571_v17 = vld [vmem:[%s4665_s16 + $0x38] sm:$0xff]  ;;  %v4573_v28 = vld [vmem:[%s4665_s16 + $0x20] sm:$0xff] }
 0x7d2   : > { %v6260_v32 = vld [vmem:[#allocation4_spill] sm:$0xff] }
 0x7dc   : > { %2440 = vadd.xlane.f32.xlu0 %v5783_v54 }
 0x7dd   : > { %2442 = vadd.xlane.f32.xlu1 %v5777_v8 }
 0x7ee   : > { %2494 = vrot.lane.b32.xlu1 %v5802_v35, %s4593_s10 }
 0x7f2   : > { %2498 = vrot.lane.b32.xlu1 %v5812_v58, %s4593_s10  ;;  %2492 = vrot.lane.b32.xlu0 %v5809_v57, %s4593_s10 }
 0x7f6   : > { %2496 = vrot.lane.b32.xlu1 %v5821_v29, %s4593_s10  ;;  %2500 = vrot.lane.b32.xlu0 %v5824_v11, %s4593_s10 }
 0x7fa   : > { %2502 = vrot.lane.b32.xlu1 %v5831_v37, %s4593_s10  ;;  %2504 = vrot.lane.b32.xlu0 %v5834_v0, %s4593_s10 }
 0x7fe   : > { %2506 = vrot.lane.b32.xlu1 %v5845_v23, %s4593_s10  ;;  %2606 = vperm.xlu0 %4085, %v2588_v41  }
 0x7ff   : > { %v5858_v38 = vpop.xlane.xlu0 %2432 }
 0x800   : > { %6253 = vst [vmem:[#allocation6_spill] sm:$0xff] %v5858_v38  ;;  %v5867_v20 = vpop.xlane.xlu1 %2434 }
 0x801   : > { %6254 = vst [vmem:[#allocation7_spill] sm:$0xff] %v5867_v20 }
 0x802   : > { %2611 = vperm.xlu1 %4084, %v2589_v9   ;;  %2508 = vrot.lane.b32.xlu0 %v5854_v55, %s4593_s10  ;;  %v2597_v9 = vmul.f32 %v4572_v6, %v5847_v45  ;;  %v4580_v6 = vld [vmem:[%s4665_s16 + $0x70] sm:$0xff] }
 0x803   : > { %v2469_v19 = vpop.permute.xlu0 %2468 }
 0x804   : > { %v5880_v43 = vadd.f32 %v2469_v19, %v5761_v53  ;;  %v2471_v44 = vpop.permute.xlu1 %2470  ;;  %v2595_v53 = vmul.f32 %v4571_v17, %v5818_v63 }
 0x805   : > { %v5889_v3 = vadd.f32 %v2471_v44, %v5755_v49  ;;  %v4577_v44 = vld [vmem:[%s4665_s16 + $0x40] sm:$0xff] }
 0x806   : > { %2510 = vrot.lane.b32.xlu1 %v5863_v60, %s4593_s10  ;;  %2621 = vperm.xlu0 %4085, %v2591_v16   ;;  %v4575_v16 = vld [vmem:[%s4665_s16 + $0x30] sm:$0xff]  ;;  %v2596_v13 = vmul.f32 %v4577_v44, %v5836_v15 }
 0x807   : > { %v2594_v48 = vmul.f32 %v4575_v16, %v5806_v7 }
 0x80a   : > { %2616 = vperm.xlu1 %4084, %v2590_v27   ;;  %2512 = vrot.lane.b32.xlu0 %v5872_v56, %s4593_s10  ;;  %v4576_v27 = vld [vmem:[%s4665_s16 + $0x68] sm:$0xff] }
 0x80e   : > { %2514 = vrot.lane.b32.xlu1 %v5877_v62, %s4593_s10  ;;  %2516 = vrot.lane.b32.xlu0 %v5880_v43, %s4593_s10 }
 0x812   : > { %2518 = vrot.lane.b32.xlu1 %v5889_v3, %s4593_s10  ;;  %2631 = vperm.xlu0 %4085, %v2593_v33   ;;  %v4578_v33 = vld [vmem:[%s4665_s16 + $0x50] sm:$0xff] }
 0x813   : > { %v2598_v17 = vmul.f32 %v4578_v33, %v5858_v38  ;;  %v4595_v38 = vmov 0  }
 0x816   : > { %2641 = vperm.xlu0 %4085, %v2595_v53   ;;  %v4579_v53 = vld [vmem:[%s4665_s16 + $0x60] sm:$0xff] }
 0x834   : > { %v5895_v24 = vpop.xlane.xlu0 %2436 }
 0x835   : > { %6255 = vst [vmem:[#allocation8_spill] sm:$0xff] %v5895_v24  ;;  %v5897_v59 = vpop.xlane.xlu1 %2438 }
 0x836   : > { %6256 = vst [vmem:[#allocation9_spill] sm:$0xff] %v5897_v59  ;;  %v2601_v19 = vmul.f32 %v4576_v27, %v5897_v59 }
 0x838   : > { %v2473_v18 = vpop.permute.xlu0 %2472 }
 0x839   : > { %v5900_v41 = vadd.f32 %v2473_v18, %v5783_v54  ;;  %v2475_v49 = vpop.permute.xlu1 %2474  ;;  %v2592_v54 = vmul.f32 %v4573_v28, %v5797_v52  ;;  %v2600_v18 = vmul.f32 %v4579_v53, %v5895_v24 }
 0x83a   : > { %v5903_v61 = vadd.f32 %v2475_v49, %v5777_v8  ;;  %v2599_v8 = vmul.f32 %v4574_v42, %v5867_v20 }
 0x83b   : > { %2520 = vrot.lane.b32.xlu0 %v5900_v41, %s4593_s10 }
 0x83c   : > { %2522 = vrot.lane.b32.xlu1 %v5903_v61, %s4593_s10 }
 0x83f   : > { %2651 = vperm.xlu0 %4085, %v2597_v9  }
 0x840   : > { %2626 = vperm.xlu1 %4084, %v2592_v54   ;;  %v4581_v54 = vld [vmem:[%s4665_s16 + $0x78] sm:$0xff] }
 0x843   : > { %2661 = vperm.xlu0 %4085, %v2599_v8  }
 0x844   : > { %2636 = vperm.xlu1 %4084, %v2594_v48  }
 0x847   : > { %2671 = vperm.xlu0 %4085, %v2601_v19  }
 0x848   : > { %2646 = vperm.xlu1 %4084, %v2596_v13  }
 0x84c   : > { %2656 = vperm.xlu1 %4084, %v2598_v17  }
 0x850   : > { %2666 = vperm.xlu1 %4084, %v2600_v18  }
 0x869   : > { %v5925_v49 = vpop.xlane.xlu0 %2440 }
 0x86a   : > { %6257 = vst [vmem:[#allocation10_spill] sm:$0xff] %v5925_v49  ;;  %v2602_v9 = vmul.f32 %v4580_v6, %v5925_v49  ;;  %v5929_v28 = vpop.xlane.xlu1 %2442 }
 0x86b   : > { %6258 = vst [vmem:[#allocation11_spill] sm:$0xff] %v5929_v28  ;;  %v2603_v42 = vmul.f32 %v4581_v54, %v5929_v28 }
 0x86c   : > { %2676 = vperm.xlu1 %4084, %v2602_v9  }
 0x86d   : > { %2681 = vperm.xlu0 %4085, %v2603_v42   ;;  %v2493_v8 = vpop.permute.xlu0 %2492 }
 0x86e   : > { %v5934_v16 = vadd.f32 %v2493_v8, %v5809_v57  ;;  %v2495_v48 = vpop.permute.xlu1 %2494 }
 0x86f   : > { %v5937_v27 = vadd.f32 %v2495_v48, %v5802_v35 }
 0x870   : > { %2540 = vrot.lane.b32.xlu1 %v5934_v16, %s4594_s11 }
 0x871   : > { %2542 = vrot.lane.b32.xlu0 %v5937_v27, %s4594_s11  ;;  %v2501_v44 = vpop.permute.xlu0 %2500 }
 0x872   : > { %v2499_v19 = vpop.permute.xlu1 %2498  ;;  %v5954_v53 = vadd.f32 %v2501_v44, %v5824_v11 }
 0x873   : > { %v5944_v13 = vadd.f32 %v2499_v19, %v5812_v58 }
 0x875   : > { %2546 = vrot.lane.b32.xlu0 %v5944_v13, %s4594_s11  ;;  %v2505_v35 = vpop.permute.xlu0 %2504 }
 0x876   : > { %v2497_v57 = vpop.permute.xlu1 %2496  ;;  %v5964_v6 = vadd.f32 %v2505_v35, %v5834_v0 }
 0x877   : > { %v5949_v33 = vadd.f32 %v2497_v57, %v5821_v29 }
 0x879   : > { %2544 = vrot.lane.b32.xlu1 %v5949_v33, %s4594_s11 }
 0x87a   : > { %v2503_v17 = vpop.permute.xlu1 %2502 }
 0x87b   : > { %v5957_v18 = vadd.f32 %v2503_v17, %v5831_v37 }
 0x87d   : > { %2550 = vrot.lane.b32.xlu0 %v5957_v18, %s4594_s11  ;;  %2548 = vrot.lane.b32.xlu1 %v5954_v53, %s4594_s11  ;;  %v2607_v58 = vpop.permute.xlu0 %2606 }
 0x87e   : > { %v2507_v29 = vpop.permute.xlu1 %2506 }
 0x87f   : > { %v5967_v9 = vadd.f32 %v2507_v29, %v5845_v23 }
 0x881   : > { %2554 = vrot.lane.b32.xlu0 %v5967_v9, %s4594_s11  ;;  %2552 = vrot.lane.b32.xlu1 %v5964_v6, %s4594_s11  ;;  %v2509_v11 = vpop.permute.xlu0 %2508 }
 0x882   : > { %v5974_v37 = vadd.f32 %v2509_v11, %v5854_v55  ;;  %v2612_v54 = vpop.permute.xlu1 %2611 }
 0x885   : > { %2556 = vrot.lane.b32.xlu1 %v5974_v37, %s4594_s11  ;;  %v2622_v42 = vpop.permute.xlu0 %2621 }
 0x886   : > { %v2511_v0 = vpop.permute.xlu1 %2510 }
 0x887   : > { %v5979_v8 = vadd.f32 %v2511_v0, %v5863_v60 }
 0x889   : > { %2558 = vrot.lane.b32.xlu0 %v5979_v8, %s4594_s11  ;;  %v2513_v23 = vpop.permute.xlu0 %2512 }
 0x88a   : > { %v5984_v48 = vadd.f32 %v2513_v23, %v5872_v56  ;;  %v2617_v19 = vpop.permute.xlu1 %2616 }
 0x88c   : > { %2560 = vrot.lane.b32.xlu1 %v5984_v48, %s4594_s11 }
 0x88d   : > { %v2517_v55 = vpop.permute.xlu0 %2516 }
 0x88e   : > { %v5989_v44 = vadd.f32 %v2517_v55, %v5880_v43  ;;  %v2515_v57 = vpop.permute.xlu1 %2514 }
 0x88f   : > { %v5992_v35 = vadd.f32 %v2515_v57, %v5877_v62 }
 0x890   : > { %2564 = vrot.lane.b32.xlu1 %v5989_v44, %s4594_s11 }
 0x891   : > { %2562 = vrot.lane.b32.xlu0 %v5992_v35, %s4594_s11  ;;  %v6003_v17 = vpop.permute.xlu0 %2631 }
 0x892   : > { %v2519_v60 = vpop.permute.xlu1 %2518 }
 0x893   : > { %v5999_v56 = vadd.f32 %v2519_v60, %v5889_v3 }
 0x895   : > { %2566 = vrot.lane.b32.xlu0 %v5999_v56, %s4594_s11  ;;  %v6005_v43 = vpop.permute.xlu0 %2641 }
 0x8ad   : > { %v2521_v29 = vpop.permute.xlu0 %2520 }
 0x8ae   : > { %v6008_v62 = vadd.f32 %v2521_v29, %v5900_v41  ;;  %v2523_v11 = vpop.permute.xlu1 %2522 }
 0x8af   : > { %v6011_v0 = vadd.f32 %v2523_v11, %v5903_v61 }
 0x8b0   : > { %2568 = vrot.lane.b32.xlu1 %v6008_v62, %s4594_s11 }
 0x8b1   : > { %2570 = vrot.lane.b32.xlu0 %v6011_v0, %s4594_s11 }
 0x8be   : > { %v6019_v57 = vpop.permute.xlu0 %2651 }
 0x8bf   : > { %v2627_v3 = vpop.permute.xlu1 %2626 }
 0x8c2   : > { %v6023_v41 = vpop.permute.xlu0 %2661 }
 0x8c3   : > { %v2637_v23 = vpop.permute.xlu1 %2636 }
 0x8c6   : > { %v6027_v61 = vpop.permute.xlu0 %2671 }
 0x8c7   : > { %v6017_v55 = vpop.permute.xlu1 %2646 }
 0x8cb   : > { %v6021_v60 = vpop.permute.xlu1 %2656 }
 0x8cf   : > { %v6025_v29 = vpop.permute.xlu1 %2666 }
 0x8eb   : > { %v6029_v11 = vpop.permute.xlu1 %2676 }
 0x8ec   : > { %v6031_v28 = vpop.permute.xlu0 %2681 }
 0x8ef   : > { %v2541_v59 = vpop.permute.xlu1 %2540 }
 0x8f0   : > { %v2572_v49 = vadd.f32 %v2541_v59, %v5934_v16  ;;  %v2543_v20 = vpop.permute.xlu0 %2542 }
 0x8f1   : > { %v2573_v24 = vadd.f32 %v2543_v20, %v5937_v27 }
 0x8f2   : > { %vm2684_vm1 = vcmp.lt.f32.partialorder %v2572_v49, %v2607_v58 }
 0x8f3   : > { %vm2700_vm2 = vmand %vm2684_vm1, %vm2299_vm0  ;;  %vm2685_vm3 = vcmp.lt.f32.partialorder %v2573_v24, %v2612_v54  ;;  %v2545_v45 = vpop.permute.xlu1 %2544 }
 0x8f4   : > { %v2716_v63 = vsel %vm2700_vm2, 1, %v4595_v38  ;;  %vm2701_vm4 = vmand %vm2685_vm3, %vm2299_vm0  ;;  %v2574_v15 = vadd.f32 %v2545_v45, %v5949_v33  ;;  %v2547_v7 = vpop.permute.xlu0 %2546 }
 0x8f5   : > { %v2575_v59 = vadd.f32 %v2547_v7, %v5944_v13  ;;  %v2733_v16 = vshrl.u32 %v2716_v63, 16  ;;  %v2717_v20 = vsel %vm2701_vm4, 1, %v4595_v38  ;;  %v2732_v58 = vand.u32 65535, %v2716_v63 }
 0x8f6   : > { %vm2686_vm5 = vcmp.lt.f32.partialorder %v2574_v15, %v2617_v19  ;;  %v2745_v49 = vshrl.u32 %v2717_v20, 16  ;;  %v2744_v33 = vand.u32 65535, %v2717_v20 }
 0x8f7   : > { %vm2702_vm6 = vmand %vm2686_vm5, %vm2299_vm0  ;;  %vm2687_vm7 = vcmp.lt.f32.partialorder %v2575_v59, %v2622_v42  ;;  %v2549_v24 = vpop.permute.xlu1 %2548  ;;  %v2735_v27 = vcvt.s32.f32 %v2733_v16  ;;  %v2734_v19 = vcvt.s32.f32 %v2732_v58 }
 0x8f8   : > { %v2718_v54 = vsel %vm2702_vm6, 1, %v4595_v38  ;;  %vm2703_vm8 = vmand %vm2687_vm7, %vm2299_vm0  ;;  %v2576_v45 = vadd.f32 %v2549_v24, %v5954_v53  ;;  %v2551_v7 = vpop.permute.xlu0 %2550  ;;  %v2747_v13 = vcvt.s32.f32 %v2745_v49  ;;  %v2746_v24 = vcvt.s32.f32 %v2744_v33 }
 0x8f9   : > { %v2719_v15 = vsel %vm2703_vm8, 1, %v4595_v38  ;;  %2738 = vadd.xlane.f32.xlu1 %v2735_v27  ;;  %v2577_v63 = vadd.f32 %v2551_v7, %v5957_v18  ;;  %v2756_v59 = vand.u32 65535, %v2718_v54 }
 0x8fa   : > { %vm2688_vm9 = vcmp.lt.f32.partialorder %v2576_v45, %v2627_v3  ;;  %2750 = vadd.xlane.f32.xlu0 %v2747_v13  ;;  %v2769_v49 = vshrl.u32 %v2719_v15, 16  ;;  %v2768_v18 = vand.u32 65535, %v2719_v15 }
 0x8fb   : > { %vm2704_vm10 = vmand %vm2688_vm9, %vm2299_vm0  ;;  %v2553_v42 = vpop.permute.xlu1 %2552  ;;  %vm2689_vm12 = vcmp.lt.f32.partialorder %v2577_v63, %v6003_v17  ;;  %v2758_v20 = vcvt.s32.f32 %v2756_v59  ;;  %v2757_v63 = vshrl.u32 %v2718_v54, 16 }
 0x8fc   : > { %v2720_v16 = vsel %vm2704_vm10, 1, %v4595_v38  ;;  %v2578_v53 = vadd.f32 %v2553_v42, %v5964_v6  ;;  %v2555_v45 = vpop.permute.xlu0 %2554  ;;  %v2771_v13 = vcvt.s32.f32 %v2769_v49  ;;  %vm2705_vm14 = vmand %vm2689_vm12, %vm2299_vm0  ;;  %v2770_v33 = vcvt.s32.f32 %v2768_v18 }
 0x8fd   : > { %2736 = vadd.xlane.f32.xlu1 %v2734_v19  ;;  %v2781_v27 = vshrl.u32 %v2720_v16, 16  ;;  %v2780_v17 = vand.u32 65535, %v2720_v16  ;;  %v2721_v15 = vsel %vm2705_vm14, 1, %v4595_v38 }
 0x8fe   : > { %vm2690_vm11 = vcmp.lt.f32.partialorder %v2578_v53, %v2637_v23  ;;  %2748 = vadd.xlane.f32.xlu0 %v2746_v24  ;;  %v2579_v23 = vadd.f32 %v2555_v45, %v5967_v9  ;;  %v2759_v53 = vcvt.s32.f32 %v2757_v63  ;;  %v2793_v9 = vshrl.u32 %v2721_v15, 16 }
 0x8ff   : > { %v2557_v3 = vpop.permute.xlu1 %2556  ;;  %vm2706_vm13 = vmand %vm2690_vm11, %vm2299_vm0  ;;  %v2783_v58 = vcvt.s32.f32 %v2781_v27  ;;  %v2782_v19 = vcvt.s32.f32 %v2780_v17 }
 0x900   : > { %v2580_v6 = vadd.f32 %v2557_v3, %v5974_v37  ;;  %v2722_v7 = vsel %vm2706_vm13, 1, %v4595_v38  ;;  %vm2691_vm1 = vcmp.lt.f32.partialorder %v2579_v23, %v6005_v43  ;;  %v2559_v59 = vpop.permute.xlu0 %2558  ;;  %v2795_v49 = vcvt.s32.f32 %v2793_v9 }
 0x901   : > { %2760 = vadd.xlane.f32.xlu1 %v2758_v20  ;;  %v2805_v37 = vshrl.u32 %v2722_v7, 16  ;;  %vm2707_vm3 = vmand %vm2691_vm1, %vm2299_vm0  ;;  %v2804_v43 = vand.u32 65535, %v2722_v7  ;;  %v2792_v3 = vand.u32 65535, %v2721_v15 }
 0x902   : > { %2774 = vadd.xlane.f32.xlu0 %v2771_v13  ;;  %vm2692_vm15 = vcmp.lt.f32.partialorder %v2580_v6, %v6017_v55  ;;  %v2581_v55 = vadd.f32 %v2559_v59, %v5979_v8  ;;  %v2723_v20 = vsel %vm2707_vm3, 1, %v4595_v38 }
 0x903   : > { %v2561_v42 = vpop.permute.xlu1 %2560  ;;  %vm2708_vm2 = vmand %vm2692_vm15, %vm2299_vm0  ;;  %v2807_v16 = vcvt.s32.f32 %v2805_v37  ;;  %v2806_v45 = vcvt.s32.f32 %v2804_v43  ;;  %v2794_v18 = vcvt.s32.f32 %v2792_v3  ;;  %v2817_v8 = vshrl.u32 %v2723_v20, 16 }
 0x904   : > { %v2582_v54 = vadd.f32 %v2561_v42, %v5984_v48  ;;  %v2724_v24 = vsel %vm2708_vm2, 1, %v4595_v38  ;;  %vm2693_vm5 = vcmp.lt.f32.partialorder %v2581_v55, %v6019_v57  ;;  %v2563_v13 = vpop.permute.xlu0 %2562  ;;  %v2816_v7 = vand.u32 65535, %v2723_v20 }
 0x905   : > { %2786 = vadd.xlane.f32.xlu1 %v2783_v58  ;;  %v2829_v48 = vshrl.u32 %v2724_v24, 16  ;;  %vm2709_vm7 = vmand %vm2693_vm5, %vm2299_vm0  ;;  %v2828_v57 = vand.u32 65535, %v2724_v24  ;;  %v2819_v17 = vcvt.s32.f32 %v2817_v8 }
 0x906   : > { %2772 = vadd.xlane.f32.xlu0 %v2770_v33  ;;  %vm2694_vm4 = vcmp.lt.f32.partialorder %v2582_v54, %v6021_v60  ;;  %v2583_v60 = vadd.f32 %v2563_v13, %v5992_v35  ;;  %v2725_v33 = vsel %vm2709_vm7, 1, %v4595_v38  ;;  %v2818_v42 = vcvt.s32.f32 %v2816_v7 }
 0x907   : > { %v2565_v27 = vpop.permute.xlu1 %2564  ;;  %vm2710_vm6 = vmand %vm2694_vm4, %vm2299_vm0  ;;  %v2831_v23 = vcvt.s32.f32 %v2829_v48  ;;  %v2830_v63 = vcvt.s32.f32 %v2828_v57 }
 0x908   : > { %v2584_v6 = vadd.f32 %v2565_v27, %v5989_v44  ;;  %v2726_v58 = vsel %vm2710_vm6, 1, %v4595_v38  ;;  %vm2695_vm9 = vcmp.lt.f32.partialorder %v2583_v60, %v6023_v41  ;;  %v2567_v44 = vpop.permute.xlu0 %2566 }
 0x909   : > { %2784 = vadd.xlane.f32.xlu1 %v2782_v19  ;;  %v2853_v15 = vshrl.u32 %v2726_v58, 16  ;;  %v2841_v19 = vshrl.u32 %v2725_v33, 16  ;;  %vm2711_vm11 = vmand %vm2695_vm9, %vm2299_vm0  ;;  %v2585_v35 = vadd.f32 %v2567_v44, %v5999_v56 }
 0x90a   : > { %2762 = vadd.xlane.f32.xlu0 %v2759_v53  ;;  %vm2696_vm8 = vcmp.lt.f32.partialorder %v2584_v6, %v6025_v29  ;;  %v2852_v29 = vand.u32 65535, %v2726_v58  ;;  %v2840_v53 = vand.u32 65535, %v2725_v33  ;;  %v2727_v9 = vsel %vm2711_vm11, 1, %v4595_v38 }
 0x90b   : > { %vm2712_vm10 = vmand %vm2696_vm8, %vm2299_vm0  ;;  %v2855_v37 = vcvt.s32.f32 %v2853_v15  ;;  %v2843_v41 = vcvt.s32.f32 %v2841_v19  ;;  %vm2697_vm12 = vcmp.lt.f32.partialorder %v2585_v35, %v6027_v61  ;;  %v2865_v43 = vshrl.u32 %v2727_v9, 16 }
 0x90c   : > { %v2728_v59 = vsel %vm2712_vm10, 1, %v4595_v38  ;;  %v2854_v54 = vcvt.s32.f32 %v2852_v29  ;;  %vm2713_vm13 = vmand %vm2697_vm12, %vm2299_vm0  ;;  %v2864_v48 = vand.u32 65535, %v2727_v9 }
 0x90d   : > { %2810 = vadd.xlane.f32.xlu1 %v2807_v16  ;;  %v2877_v55 = vshrl.u32 %v2728_v59, 16  ;;  %v2842_v16 = vcvt.s32.f32 %v2840_v53  ;;  %v2876_v20 = vand.u32 65535, %v2728_v59  ;;  %v2729_v61 = vsel %vm2713_vm13, 1, %v4595_v38 }
 0x90e   : > { %2798 = vadd.xlane.f32.xlu0 %v2795_v49  ;;  %v2889_v6 = vshrl.u32 %v2729_v61, 16 }
 0x90f   : > { %v2879_v3 = vcvt.s32.f32 %v2877_v55 }
 0x910   : > { %v2891_v60 = vcvt.s32.f32 %v2889_v6 }
 0x911   : > { %2808 = vadd.xlane.f32.xlu1 %v2806_v45  ;;  %v2867_v45 = vcvt.s32.f32 %v2865_v43 }
 0x912   : > { %2796 = vadd.xlane.f32.xlu0 %v2794_v18  ;;  %v2866_v18 = vcvt.s32.f32 %v2864_v48 }
 0x915   : > { %2834 = vadd.xlane.f32.xlu1 %v2831_v23  ;;  %v2888_v23 = vand.u32 65535, %v2729_v61 }
 0x916   : > { %2822 = vadd.xlane.f32.xlu0 %v2819_v17 }
 0x917   : > { %v2890_v17 = vcvt.s32.f32 %v2888_v23 }
 0x919   : > { %2832 = vadd.xlane.f32.xlu1 %v2830_v63 }
 0x91a   : > { %2820 = vadd.xlane.f32.xlu0 %v2818_v42 }
 0x91d   : > { %2858 = vadd.xlane.f32.xlu1 %v2855_v37 }
 0x91e   : > { %2846 = vadd.xlane.f32.xlu0 %v2843_v41 }
 0x921   : > { %2856 = vadd.xlane.f32.xlu1 %v2854_v54 }
 0x922   : > { %v2569_v56 = vpop.permute.xlu1 %2568  ;;  %2844 = vadd.xlane.f32.xlu0 %v2842_v16 }
 0x923   : > { %v2586_v24 = vadd.f32 %v2569_v56, %v6008_v62  ;;  %v2571_v49 = vpop.permute.xlu0 %2570  ;;  %v2878_v62 = vcvt.s32.f32 %v2876_v20 }
 0x924   : > { %v2587_v27 = vadd.f32 %v2571_v49, %v6011_v0 }
 0x925   : > { %vm2698_vm14 = vcmp.lt.f32.partialorder %v2586_v24, %v6029_v11  ;;  %2882 = vadd.xlane.f32.xlu1 %v2879_v3 }
 0x926   : > { %vm2714_vm15 = vmand %vm2698_vm14, %vm2299_vm0  ;;  %2870 = vadd.xlane.f32.xlu0 %v2867_v45  ;;  %vm2699_vm1 = vcmp.lt.f32.partialorder %v2587_v27, %v6031_v28 }
 0x927   : > { %v2730_v13 = vsel %vm2714_vm15, 1, %v4595_v38  ;;  %vm2715_vm2 = vmand %vm2699_vm1, %vm2299_vm0  ;;  %vm3068_vm0 = vcmask 7168  }
 0x928   : > { %v2901_v8 = vshrl.u32 %v2730_v13, 16  ;;  %v2900_v11 = vand.u32 65535, %v2730_v13  ;;  %v2731_v57 = vsel %vm2715_vm2, 1, %v4595_v38 }
 0x929   : > { %2880 = vadd.xlane.f32.xlu1 %v2878_v62  ;;  %v2913_v28 = vshrl.u32 %v2731_v57, 16  ;;  %v2912_v33 = vand.u32 65535, %v2731_v57 }
 0x92a   : > { %2868 = vadd.xlane.f32.xlu0 %v2866_v18  ;;  %v2903_v0 = vcvt.s32.f32 %v2901_v8  ;;  %v2902_v58 = vcvt.s32.f32 %v2900_v11 }
 0x92b   : > { %v2915_v7 = vcvt.s32.f32 %v2913_v28  ;;  %v2914_v63 = vcvt.s32.f32 %v2912_v33 }
 0x92d   : > { %2906 = vadd.xlane.f32.xlu1 %v2903_v0 }
 0x92e   : > { %2894 = vadd.xlane.f32.xlu0 %v2891_v60 }
 0x931   : > { %2904 = vadd.xlane.f32.xlu1 %v2902_v58 }
 0x932   : > { %2892 = vadd.xlane.f32.xlu0 %v2890_v17 }
 0x936   : > { %2918 = vadd.xlane.f32.xlu0 %v2915_v7 }
 0x93a   : > { %2916 = vadd.xlane.f32.xlu0 %v2914_v63 }
 0x986   : > { %v2739_v15 = vpop.xlane.xlu1 %2738 }
 0x987   : > { %v2741_v44 = vcvt.f32.s32 %v2739_v15  ;;  %v2751_v42 = vpop.xlane.xlu0 %2750 }
 0x988   : > { %v2753_v19 = vcvt.f32.s32 %v2751_v42 }
 0x989   : > { %v2742_v37 = vshll.u32 %v2741_v44, 16 }
 0x98a   : > { %v2737_v35 = vpop.xlane.xlu1 %2736  ;;  %v2754_v59 = vshll.u32 %v2753_v19, 16 }
 0x98b   : > { %v2740_v38 = vcvt.f32.s32 %v2737_v35  ;;  %v2749_v29 = vpop.xlane.xlu0 %2748 }
 0x98c   : > { %v2752_v41 = vcvt.f32.s32 %v2749_v29 }
 0x98d   : > { %v2743_v53 = vadd.s32 %v2742_v37, %v2740_v38 }
 0x98e   : > { %v2755_v9 = vadd.s32 %v2754_v59, %v2752_v41  ;;  %v2761_v54 = vpop.xlane.xlu1 %2760 }
 0x98f   : > { %vm2924_vm3 = vcmp.lt.s32.totalorder %v2743_v53, 4  ;;  %v2775_v55 = vpop.xlane.xlu0 %2774  ;;  %v2764_v11 = vcvt.f32.s32 %v2761_v54 }
 0x990   : > { %vm2926_vm4 = vcmp.lt.s32.totalorder %v2755_v9, 4  ;;  %v2777_v16 = vcvt.f32.s32 %v2775_v55  ;;  %v2925_v43 = vsel %vm2924_vm3, %v2743_v53, 4 }
 0x991   : > { %vm2956_vm5 = vcmp.eq.s32.totalorder %v5531_v4, %v2925_v43  ;;  %3069 = vst.msk [vmem:[%s6111_s13] sm:$0xff] %vm3068_vm0, %v2925_v43  ;;  %v2927_v56 = vsel %vm2926_vm4, %v2755_v9, 4 }
 0x992   : > { %v2787_v24 = vpop.xlane.xlu1 %2786  ;;  %v2972_v49 = vsel %vm2956_vm5, %v5618_v12, 0.0  ;;  %vm2957_vm6 = vcmp.eq.s32.totalorder %v5531_v4, %v2927_v56  ;;  %3070 = vst.msk [vmem:[%s6111_s13 + $0x8] sm:$0xff] %vm3068_vm0, %v2927_v56  ;;  %v2778_v45 = vshll.u32 %v2777_v16, 16 }
 0x993   : > { %v2789_v3 = vcvt.f32.s32 %v2787_v24  ;;  %2988 = vadd.xlane.f32.xlu1 %v2972_v49  ;;  %v2773_v20 = vpop.xlane.xlu0 %2772  ;;  %v2973_v27 = vsel %vm2957_vm6, %v5614_v22, 0.0 }
 0x994   : > { %v2776_v48 = vcvt.f32.s32 %v2773_v20  ;;  %2990 = vadd.xlane.f32.xlu0 %v2973_v27 }
 0x995   : > { %v2790_v62 = vshll.u32 %v2789_v3, 16 }
 0x996   : > { %v2779_v61 = vadd.s32 %v2778_v45, %v2776_v48  ;;  %v2785_v13 = vpop.xlane.xlu1 %2784 }
 0x997   : > { %v2788_v18 = vcvt.f32.s32 %v2785_v13  ;;  %v2763_v8 = vpop.xlane.xlu0 %2762 }
 0x998   : > { %vm2930_vm7 = vcmp.lt.s32.totalorder %v2779_v61, 4  ;;  %v2765_v12 = vcvt.f32.s32 %v2763_v8 }
 0x999   : > { %v2791_v6 = vadd.s32 %v2790_v62, %v2788_v18  ;;  %v2931_v0 = vsel %vm2930_vm7, %v2779_v61, 4 }
 0x99a   : > { %v2766_v60 = vshll.u32 %v2765_v12, 16  ;;  %v2811_v23 = vpop.xlane.xlu1 %2810  ;;  %vm2959_vm8 = vcmp.eq.s32.totalorder %v5531_v4, %v2931_v0  ;;  %3072 = vst.msk [vmem:[%s6111_s13 + $0x18] sm:$0xff] %vm3068_vm0, %v2931_v0 }
 0x99b   : > { %vm2932_vm9 = vcmp.lt.s32.totalorder %v2791_v6, 4  ;;  %v2813_v22 = vcvt.f32.s32 %v2811_v23  ;;  %v2799_v57 = vpop.xlane.xlu0 %2798  ;;  %v2975_v58 = vsel %vm2959_vm8, %v5634_v34, 0.0 }
 0x99c   : > { %v2767_v17 = vadd.s32 %v2766_v60, %v2764_v11  ;;  %v2801_v28 = vcvt.f32.s32 %v2799_v57  ;;  %2994 = vadd.xlane.f32.xlu0 %v2975_v58  ;;  %v2933_v7 = vsel %vm2932_vm9, %v2791_v6, 4 }
 0x99d   : > { %3073 = vst.msk [vmem:[%s6111_s13 + $0x20] sm:$0xff] %vm3068_vm0, %v2933_v7  ;;  %v2814_v63 = vshll.u32 %v2813_v22, 16  ;;  %vm2960_vm12 = vcmp.eq.s32.totalorder %v5531_v4, %v2933_v7 }
 0x99e   : > { %v2809_v33 = vpop.xlane.xlu1 %2808  ;;  %vm2928_vm10 = vcmp.lt.s32.totalorder %v2767_v17, 4  ;;  %v2802_v19 = vshll.u32 %v2801_v28, 16  ;;  %v2976_v54 = vsel %vm2960_vm12, %v5657_v10, 0.0 }
 0x99f   : > { %v2812_v15 = vcvt.f32.s32 %v2809_v33  ;;  %v2797_v44 = vpop.xlane.xlu0 %2796  ;;  %v2929_v42 = vsel %vm2928_vm10, %v2767_v17, 4 }
 0x9a0   : > { %v2800_v35 = vcvt.f32.s32 %v2797_v44  ;;  %vm2958_vm11 = vcmp.eq.s32.totalorder %v5531_v4, %v2929_v42  ;;  %3071 = vst.msk [vmem:[%s6111_s13 + $0x10] sm:$0xff] %vm3068_vm0, %v2929_v42 }
 0x9a1   : > { %v2815_v34 = vadd.s32 %v2814_v63, %v2812_v15  ;;  %v2974_v37 = vsel %vm2958_vm11, %v5638_v5, 0.0 }
 0x9a2   : > { %v2803_v38 = vadd.s32 %v2802_v19, %v2800_v35  ;;  %v2835_v29 = vpop.xlane.xlu1 %2834  ;;  %2992 = vadd.xlane.f32.xlu1 %v2974_v37 }
 0x9a3   : > { %vm2936_vm13 = vcmp.lt.s32.totalorder %v2815_v34, 4  ;;  %v2837_v59 = vcvt.f32.s32 %v2835_v29  ;;  %v2823_v41 = vpop.xlane.xlu0 %2822 }
 0x9a4   : > { %vm2934_vm14 = vcmp.lt.s32.totalorder %v2803_v38, 4  ;;  %v2825_v53 = vcvt.f32.s32 %v2823_v41  ;;  %v2937_v9 = vsel %vm2936_vm13, %v2815_v34, 4 }
 0x9a5   : > { %v2935_v55 = vsel %vm2934_vm14, %v2803_v38, 4  ;;  %3075 = vst.msk [vmem:[%s6111_s13 + $0x30] sm:$0xff] %vm3068_vm0, %v2937_v9  ;;  %vm2962_vm1 = vcmp.eq.s32.totalorder %v5531_v4, %v2937_v9  ;;  %v2838_v5 = vshll.u32 %v2837_v59, 16 }
 0x9a6   : > { %v2833_v16 = vpop.xlane.xlu1 %2832  ;;  %2996 = vadd.xlane.f32.xlu1 %v2976_v54  ;;  %vm2961_vm15 = vcmp.eq.s32.totalorder %v5531_v4, %v2935_v55  ;;  %3074 = vst.msk [vmem:[%s6111_s13 + $0x28] sm:$0xff] %vm3068_vm0, %v2935_v55  ;;  %v2826_v49 = vshll.u32 %v2825_v53, 16  ;;  %v2978_v20 = vsel %vm2962_vm1, %v5682_v31, 0.0 }
 0x9a7   : > { %v2836_v43 = vcvt.f32.s32 %v2833_v16  ;;  %v2821_v56 = vpop.xlane.xlu0 %2820  ;;  %v2977_v24 = vsel %vm2961_vm15, %v5648_v1, 0.0 }
 0x9a8   : > { %v2824_v3 = vcvt.f32.s32 %v2821_v56  ;;  %2998 = vadd.xlane.f32.xlu0 %v2977_v24 }
 0x9a9   : > { %v2839_v10 = vadd.s32 %v2838_v5, %v2836_v43 }
 0x9aa   : > { %v2827_v27 = vadd.s32 %v2826_v49, %v2824_v3  ;;  %v2859_v45 = vpop.xlane.xlu1 %2858  ;;  %3000 = vadd.xlane.f32.xlu1 %v2978_v20 }
 0x9ab   : > { %vm2940_vm2 = vcmp.lt.s32.totalorder %v2839_v10, 4  ;;  %v2861_v48 = vcvt.f32.s32 %v2859_v45  ;;  %v2847_v61 = vpop.xlane.xlu0 %2846 }
 0x9ac   : > { %vm2938_vm3 = vcmp.lt.s32.totalorder %v2827_v27, 4  ;;  %v2849_v13 = vcvt.f32.s32 %v2847_v61  ;;  %v2941_v62 = vsel %vm2940_vm2, %v2839_v10, 4 }
 0x9ad   : > { %vm2964_vm4 = vcmp.eq.s32.totalorder %v5531_v4, %v2941_v62  ;;  %3077 = vst.msk [vmem:[%s6111_s13 + $0x40] sm:$0xff] %vm3068_vm0, %v2941_v62  ;;  %v2939_v1 = vsel %vm2938_vm3, %v2827_v27, 4  ;;  %v2862_v31 = vshll.u32 %v2861_v48, 16 }
 0x9ae   : > { %v2857_v18 = vpop.xlane.xlu1 %2856  ;;  %v2980_v8 = vsel %vm2964_vm4, %v5704_v36, 0.0  ;;  %vm2963_vm5 = vcmp.eq.s32.totalorder %v5531_v4, %v2939_v1  ;;  %3076 = vst.msk [vmem:[%s6111_s13 + $0x38] sm:$0xff] %vm3068_vm0, %v2939_v1  ;;  %v2850_v11 = vshll.u32 %v2849_v13, 16 }
 0x9af   : > { %v2860_v12 = vcvt.f32.s32 %v2857_v18  ;;  %3004 = vadd.xlane.f32.xlu1 %v2980_v8  ;;  %v2845_v6 = vpop.xlane.xlu0 %2844  ;;  %v2979_v0 = vsel %vm2963_vm5, %v5678_v26, 0.0 }
 0x9b0   : > { %v2848_v60 = vcvt.f32.s32 %v2845_v6  ;;  %3002 = vadd.xlane.f32.xlu0 %v2979_v0 }
 0x9b1   : > { %v2863_v23 = vadd.s32 %v2862_v31, %v2860_v12  ;;  %v6259_v12 = vld [vmem:[#allocation2_spill] sm:$0xff] }
 0x9b2   : > { %v2851_v22 = vadd.s32 %v2850_v11, %v2848_v60  ;;  %v2883_v57 = vpop.xlane.xlu1 %2882  ;;  %4546 = vlog2.f32 %v6259_v12 }
 0x9b3   : > { %vm2944_vm6 = vcmp.lt.s32.totalorder %v2863_v23, 4  ;;  %v2885_v36 = vcvt.f32.s32 %v2883_v57  ;;  %v2871_v58 = vpop.xlane.xlu0 %2870  ;;  %4548 = vlog2.f32 %v6260_v32 }
 0x9b4   : > { %vm2942_vm7 = vcmp.lt.s32.totalorder %v2851_v22, 4  ;;  %v2873_v17 = vcvt.f32.s32 %v2871_v58  ;;  %v2945_v28 = vsel %vm2944_vm6, %v2863_v23, 4 }
 0x9b5   : > { %vm2966_vm8 = vcmp.eq.s32.totalorder %v5531_v4, %v2945_v28  ;;  %3079 = vst.msk [vmem:[%s6111_s13 + $0x50] sm:$0xff] %vm3068_vm0, %v2945_v28  ;;  %v2943_v7 = vsel %vm2942_vm7, %v2851_v22, 4  ;;  %v2886_v63 = vshll.u32 %v2885_v36, 16  ;;  %v6261_v22 = vld [vmem:[#allocation3_spill] sm:$0xff] }
 0x9b6   : > { %v2881_v33 = vpop.xlane.xlu1 %2880  ;;  %v2982_v26 = vsel %vm2966_vm8, %v5726_v46, 0.0  ;;  %vm2965_vm9 = vcmp.eq.s32.totalorder %v5531_v4, %v2943_v7  ;;  %3078 = vst.msk [vmem:[%s6111_s13 + $0x48] sm:$0xff] %vm3068_vm0, %v2943_v7  ;;  %v2874_v19 = vshll.u32 %v2873_v17, 16  ;;  %4550 = vlog2.f32 %v6261_v22 }
 0x9b7   : > { %v2884_v15 = vcvt.f32.s32 %v2881_v33  ;;  %3008 = vadd.xlane.f32.xlu1 %v2982_v26  ;;  %v2869_v44 = vpop.xlane.xlu0 %2868  ;;  %v2981_v42 = vsel %vm2965_vm9, %v5700_v51, 0.0  ;;  %v6262_v26 = vld [vmem:[#allocation6_spill] sm:$0xff] }
 0x9b8   : > { %v2872_v35 = vcvt.f32.s32 %v2869_v44  ;;  %3006 = vadd.xlane.f32.xlu0 %v2981_v42  ;;  %4552 = vlog2.f32 %v6262_v26  ;;  %v6263_v44 = vld [vmem:[#allocation5_spill] sm:$0xff] }
 0x9b9   : > { %v2887_v34 = vadd.s32 %v2886_v63, %v2884_v15  ;;  %4554 = vlog2.f32 %v6263_v44 }
 0x9ba   : > { %v2875_v37 = vadd.s32 %v2874_v19, %v2872_v35  ;;  %v2907_v38 = vpop.xlane.xlu1 %2906 }
 0x9bb   : > { %vm2948_vm10 = vcmp.lt.s32.totalorder %v2887_v34, 4  ;;  %v2909_v46 = vcvt.f32.s32 %v2907_v38  ;;  %v2895_v29 = vpop.xlane.xlu0 %2894 }
 0x9bc   : > { %vm2946_vm11 = vcmp.lt.s32.totalorder %v2875_v37, 4  ;;  %v2897_v59 = vcvt.f32.s32 %v2895_v29  ;;  %v2949_v41 = vsel %vm2948_vm10, %v2887_v34, 4 }
 0x9bd   : > { %vm2968_vm12 = vcmp.eq.s32.totalorder %v5531_v4, %v2949_v41  ;;  %3081 = vst.msk [vmem:[%s6111_s13 + $0x60] sm:$0xff] %vm3068_vm0, %v2949_v41  ;;  %v2947_v53 = vsel %vm2946_vm11, %v2875_v37, 4  ;;  %v2910_v54 = vshll.u32 %v2909_v46, 16  ;;  %v6264_v41 = vld [vmem:[#allocation8_spill] sm:$0xff] }
 0x9be   : > { %v2905_v9 = vpop.xlane.xlu1 %2904  ;;  %v2984_v51 = vsel %vm2968_vm12, %v5748_v2, 0.0  ;;  %vm2967_vm13 = vcmp.eq.s32.totalorder %v5531_v4, %v2947_v53  ;;  %3080 = vst.msk [vmem:[%s6111_s13 + $0x58] sm:$0xff] %vm3068_vm0, %v2947_v53  ;;  %v2898_v43 = vshll.u32 %v2897_v59, 16  ;;  %4556 = vlog2.f32 %v6264_v41 }
 0x9bf   : > { %v2908_v55 = vcvt.f32.s32 %v2905_v9  ;;  %3012 = vadd.xlane.f32.xlu1 %v2984_v51  ;;  %v2893_v16 = vpop.xlane.xlu0 %2892  ;;  %v2983_v5 = vsel %vm2967_vm13, %v5722_v47, 0.0  ;;  %v6265_v9 = vld [vmem:[#allocation7_spill] sm:$0xff] }
 0x9c0   : > { %v2896_v56 = vcvt.f32.s32 %v2893_v16  ;;  %3010 = vadd.xlane.f32.xlu0 %v2983_v5  ;;  %4558 = vlog2.f32 %v6265_v9 }
 0x9c1   : > { %v2911_v24 = vadd.s32 %v2910_v54, %v2908_v55 }
 0x9c2   : > { %v2899_v49 = vadd.s32 %v2898_v43, %v2896_v56 }
 0x9c3   : > { %vm2952_vm14 = vcmp.lt.s32.totalorder %v2911_v24, 4  ;;  %v2919_v3 = vpop.xlane.xlu0 %2918 }
 0x9c4   : > { %vm2950_vm15 = vcmp.lt.s32.totalorder %v2899_v49, 4  ;;  %v2921_v2 = vcvt.f32.s32 %v2919_v3  ;;  %v2953_v10 = vsel %vm2952_vm14, %v2911_v24, 4  ;;  %v6266_v24 = vld [vmem:[#allocation10_spill] sm:$0xff]  ;;  %v6267_v3 = vld [vmem:[#allocation9_spill] sm:$0xff] }
 0x9c5   : > { %vm2970_vm1 = vcmp.eq.s32.totalorder %v5531_v4, %v2953_v10  ;;  %3083 = vst.msk [vmem:[%s6111_s13 + $0x70] sm:$0xff] %vm3068_vm0, %v2953_v10  ;;  %v2951_v20 = vsel %vm2950_vm15, %v2899_v49, 4  ;;  %4560 = vlog2.f32 %v6266_v24 }
 0x9c6   : > { %v2986_v27 = vsel %vm2970_vm1, %v5770_v50, 0.0  ;;  %vm2969_vm2 = vcmp.eq.s32.totalorder %v5531_v4, %v2951_v20  ;;  %3082 = vst.msk [vmem:[%s6111_s13 + $0x68] sm:$0xff] %vm3068_vm0, %v2951_v20  ;;  %v2922_v48 = vshll.u32 %v2921_v2, 16  ;;  %4562 = vlog2.f32 %v6267_v3 }
 0x9c7   : > { %3016 = vadd.xlane.f32.xlu1 %v2986_v27  ;;  %v2917_v47 = vpop.xlane.xlu0 %2916  ;;  %v2985_v45 = vsel %vm2969_vm2, %v5744_v39, 0.0  ;;  %v4535_v39 = vpop.eup %4534 }
 0x9c8   : > { %v2920_v61 = vcvt.f32.s32 %v2917_v47  ;;  %3014 = vadd.xlane.f32.xlu0 %v2985_v45  ;;  %v4537_v1 = vpop.eup %4536  ;;  %v3021_v18 = vmul.f32 0.6931472, %v4535_v39 }
 0x9c9   : > { %v4539_v25 = vpop.eup %4538 }
 0x9ca   : > { %v2923_v13 = vadd.s32 %v2922_v48, %v2920_v61  ;;  %v3027_v31 = vmul.f32 0.6931472, %v4539_v25  ;;  %v4541_v11 = vpop.eup %4540 }
 0x9cb   : > { %v3025_v60 = vmul.f32 0.6931472, %v4541_v11  ;;  %v4543_v23 = vpop.eup %4542 }
 0x9cc   : > { %vm2954_vm3 = vcmp.lt.s32.totalorder %v2923_v13, 4  ;;  %v4545_v52 = vpop.eup %4544  ;;  %v3029_v30 = vmul.f32 0.6931472, %v4543_v23 }
 0x9cd   : > { %v2955_v62 = vsel %vm2954_vm3, %v2923_v13, 4  ;;  %v4547_v58 = vpop.eup %4546  ;;  %v3031_v7 = vmul.f32 0.6931472, %v4545_v52  ;;  %v6268_v13 = vld [vmem:[#allocation11_spill] sm:$0xff] }
 0x9ce   : > { %vm2971_vm4 = vcmp.eq.s32.totalorder %v5531_v4, %v2955_v62  ;;  %3084 = vst.msk [vmem:[%s6111_s13 + $0x78] sm:$0xff] %vm3068_vm0, %v2955_v62  ;;  %v3033_v15 = vmul.f32 0.6931472, %v4547_v58  ;;  %v4549_v19 = vpop.eup %4548  ;;  %4564 = vlog2.f32 %v6268_v13 }
 0x9cf   : > { %v2987_v50 = vsel %vm2971_vm4, %v5766_v14, 0.0  ;;  %v3023_v14 = vmul.f32 0.6931472, %v4537_v1  ;;  %v4551_v34 = vpop.eup %4550  ;;  %v3037_v37 = vmul.f32 0.6931472, %v4549_v19 }
 0x9d0   : > { %3018 = vadd.xlane.f32.xlu0 %v2987_v50  ;;  %v3035_v46 = vmul.f32 0.6931472, %v4551_v34  ;;  %v4553_v51 = vpop.eup %4552 }
 0x9d1   : > { %v4555_v54 = vpop.eup %4554  ;;  %v3041_v55 = vmul.f32 0.6931472, %v4553_v51 }
 0x9d2   : > { %v3039_v5 = vmul.f32 0.6931472, %v4555_v54  ;;  %v4557_v2 = vpop.eup %4556 }
 0x9d3   : > { %v4559_v10 = vpop.eup %4558  ;;  %v3045_v20 = vmul.f32 0.6931472, %v4557_v2 }
 0x9d4   : > { %v3043_v47 = vmul.f32 0.6931472, %v4559_v10  ;;  %v4561_v62 = vpop.eup %4560 }
 0x9d5   : > { %v4563_v50 = vpop.eup %4562  ;;  %v3049_v39 = vmul.f32 0.6931472, %v4561_v62 }
 0xa20   : > { %v2989_v4 = vpop.xlane.xlu1 %2988 }
 0xa21   : > { %v3052_v40 = vsub.f32 %v2989_v4, %v3021_v18  ;;  %v2991_v8 = vpop.xlane.xlu0 %2990  ;;  %v3047_v18 = vmul.f32 0.6931472, %v4563_v50 }
 0xa22   : > { %v3053_v21 = vsub.f32 %v2991_v8, %v3023_v14  ;;  %v4565_v8 = vpop.eup %4564 }
 0xa23   : > { %3085 = vst.msk [vmem:[%s6184_s18] sm:$0xff] %vm3068_vm0, %v3052_v40 }
 0xa24   : > { %3086 = vst.msk [vmem:[%s6184_s18 + $0x8] sm:$0xff] %vm3068_vm0, %v3053_v21  ;;  %v3051_v21 = vmul.f32 0.6931472, %v4565_v8 }
 0xa29   : > { %v2995_v6 = vpop.xlane.xlu0 %2994 }
 0xa2a   : > { %v3055_v0 = vsub.f32 %v2995_v6, %v3027_v31 }
 0xa2c   : > { %3088 = vst.msk [vmem:[%s6184_s18 + $0x18] sm:$0xff] %vm3068_vm0, %v3055_v0 }
 0xa2f   : > { %v2993_v57 = vpop.xlane.xlu1 %2992 }
 0xa30   : > { %v3054_v36 = vsub.f32 %v2993_v57, %v3025_v60 }
 0xa32   : > { %3087 = vst.msk [vmem:[%s6184_s18 + $0x10] sm:$0xff] %vm3068_vm0, %v3054_v36 }
 0xa33   : > { %v2997_v17 = vpop.xlane.xlu1 %2996 }
 0xa34   : > { %v3056_v28 = vsub.f32 %v2997_v17, %v3029_v30 }
 0xa35   : > { %v2999_v33 = vpop.xlane.xlu0 %2998 }
 0xa36   : > { %3089 = vst.msk [vmem:[%s6184_s18 + $0x20] sm:$0xff] %vm3068_vm0, %v3056_v28  ;;  %v3057_v63 = vsub.f32 %v2999_v33, %v3031_v7 }
 0xa37   : > { %v3001_v42 = vpop.xlane.xlu1 %3000 }
 0xa38   : > { %3090 = vst.msk [vmem:[%s6184_s18 + $0x28] sm:$0xff] %vm3068_vm0, %v3057_v63  ;;  %v3058_v35 = vsub.f32 %v3001_v42, %v3033_v15 }
 0xa3a   : > { %3091 = vst.msk [vmem:[%s6184_s18 + $0x30] sm:$0xff] %vm3068_vm0, %v3058_v35 }
 0xa3c   : > { %v3005_v38 = vpop.xlane.xlu1 %3004 }
 0xa3d   : > { %v3060_v29 = vsub.f32 %v3005_v38, %v3037_v37  ;;  %v3003_v59 = vpop.xlane.xlu0 %3002 }
 0xa3e   : > { %v3059_v53 = vsub.f32 %v3003_v59, %v3035_v46 }
 0xa3f   : > { %3093 = vst.msk [vmem:[%s6184_s18 + $0x40] sm:$0xff] %vm3068_vm0, %v3060_v29 }
 0xa40   : > { %3092 = vst.msk [vmem:[%s6184_s18 + $0x38] sm:$0xff] %vm3068_vm0, %v3059_v53 }
 0xa44   : > { %v3009_v16 = vpop.xlane.xlu1 %3008 }
 0xa45   : > { %v3062_v43 = vsub.f32 %v3009_v16, %v3041_v55  ;;  %v3007_v56 = vpop.xlane.xlu0 %3006 }
 0xa46   : > { %v3061_v49 = vsub.f32 %v3007_v56, %v3039_v5 }
 0xa47   : > { %3095 = vst.msk [vmem:[%s6184_s18 + $0x50] sm:$0xff] %vm3068_vm0, %v3062_v43 }
 0xa48   : > { %3094 = vst.msk [vmem:[%s6184_s18 + $0x48] sm:$0xff] %vm3068_vm0, %v3061_v49 }
 0xa4c   : > { %v3013_v27 = vpop.xlane.xlu1 %3012 }
 0xa4d   : > { %v3064_v45 = vsub.f32 %v3013_v27, %v3045_v20  ;;  %v3011_v48 = vpop.xlane.xlu0 %3010 }
 0xa4e   : > { %v3063_v61 = vsub.f32 %v3011_v48, %v3043_v47 }
 0xa4f   : > { %3097 = vst.msk [vmem:[%s6184_s18 + $0x60] sm:$0xff] %vm3068_vm0, %v3064_v45 }
 0xa50   : > { %3096 = vst.msk [vmem:[%s6184_s18 + $0x58] sm:$0xff] %vm3068_vm0, %v3063_v61 }
 0xa54   : > { %v3017_v1 = vpop.xlane.xlu1 %3016 }
 0xa55   : > { %v3066_v4 = vsub.f32 %v3017_v1, %v3049_v39  ;;  %v3015_v14 = vpop.xlane.xlu0 %3014 }
 0xa56   : > { %v3065_v40 = vsub.f32 %v3015_v14, %v3047_v18 }
 0xa57   : > { %3099 = vst.msk [vmem:[%s6184_s18 + $0x70] sm:$0xff] %vm3068_vm0, %v3066_v4 }
 0xa58   : > { %3098 = vst.msk [vmem:[%s6184_s18 + $0x68] sm:$0xff] %vm3068_vm0, %v3065_v40 }
 0xa5d   : > { %v3019_v25 = vpop.xlane.xlu0 %3018 }
 0xa5e   : > { %v3067_v31 = vsub.f32 %v3019_v25, %v3051_v21 }
 0xa60   : > { %3100 = vst.msk [vmem:[%s6184_s18 + $0x78] sm:$0xff] %vm3068_vm0, %v3067_v31 }
 0xa61 PF: > { %s15_s15 = sadd.s32 1, %s4588_s15  }
 0xa62   : > { %p12_p4 = scmp.ge.s32.totalorder %s15_s15, 4  }
 0xa64   :  { %14 = sbr.rel (!%p12_p4) target bundleno = 1 (0x1), region = 76 }

</bundles_post_ra>
